<compile_context>
chip_gen: v5e
topology: v5e:2x2
jax: 0.10.0
libtpu: 0.0.40
codegen_flags: <defaults>
</compile_context>

<pallas_src>
import math

import jax
import jax.numpy as jnp
from jax.experimental import pallas as pl
from jax.experimental.pallas import tpu as pltpu


_ATTN_PARAM_NAMES = ('wq', 'bq', 'wk', 'bk', 'wv', 'bv', 'wo', 'bo',
                     'ln1_g', 'ln1_b', 'w1', 'b1', 'w2', 'b2', 'ln2_g', 'ln2_b')
_ATTN_MATRIX_NAMES = frozenset({'wq', 'wk', 'wv', 'wo', 'w1', 'w2'})


# ----------------------------------------------------------------------------
# Deterministic parameter initialization
# ----------------------------------------------------------------------------
def _init_mlp(key, n_layers, d_in, d_hidden, d_out, scale=0.05):
    dims = [d_in] + [d_hidden] * (n_layers - 1) + [d_out]
    weights, biases = [], []
    keys = jax.random.split(key, n_layers)
    for i in range(n_layers):
        weights.append(scale * jax.random.normal(keys[i], (dims[i], dims[i + 1]), jnp.float32))
        biases.append(jnp.zeros((1, dims[i + 1]), jnp.float32))
    return weights, biases


def _init_attn_block(key, d_model, num_heads, mlp_hidden, scale=0.05):
    # Per-head projections stored pre-fused as (D, D) so the kernel does a
    # single full-lane matmul per Q/K/V and for the output projection.
    assert d_model % num_heads == 0
    ks = jax.random.split(key, 6)
    return {
        'wq': scale * jax.random.normal(ks[0], (d_model, d_model), jnp.float32),
        'bq': jnp.zeros((1, d_model), jnp.float32),
        'wk': scale * jax.random.normal(ks[1], (d_model, d_model), jnp.float32),
        'bk': jnp.zeros((1, d_model), jnp.float32),
        'wv': scale * jax.random.normal(ks[2], (d_model, d_model), jnp.float32),
        'bv': jnp.zeros((1, d_model), jnp.float32),
        'wo': scale * jax.random.normal(ks[3], (d_model, d_model), jnp.float32),
        'bo': jnp.zeros((1, d_model), jnp.float32),
        'ln1_g': jnp.ones((1, d_model), jnp.float32),
        'ln1_b': jnp.zeros((1, d_model), jnp.float32),
        'w1': scale * jax.random.normal(ks[4], (d_model, mlp_hidden), jnp.float32),
        'b1': jnp.zeros((1, mlp_hidden), jnp.float32),
        'w2': scale * jax.random.normal(ks[5], (mlp_hidden, d_model), jnp.float32),
        'b2': jnp.zeros((1, d_model), jnp.float32),
        'ln2_g': jnp.ones((1, d_model), jnp.float32),
        'ln2_b': jnp.zeros((1, d_model), jnp.float32),
    }


def init_encoder_params(key, cfg):
    n_s = cfg['num_s_self_attn_layers']
    n_q = cfg['num_q_cross_attn_layers']
    if cfg['num_weight_tied_layers'] == 0:
        n_s += 1
        n_q += 1
    keys = jax.random.split(key, 8 + n_s + n_q)
    D = cfg['attn_head_key_dim']
    H = cfg['num_attn_heads']
    params = {
        'S_pooling': _init_mlp(keys[0], 2, cfg['n_bins'],
                               cfg['pooling_mlp_hidden_dim'], D),
        'Q_pooling': _init_mlp(keys[1], 2, cfg['query_part_feature_dim'],
                               cfg['pooling_mlp_hidden_dim'], D),
        'S_self_attn_layers': [
            _init_attn_block(keys[2 + i], D, H, cfg['attn_mlp_hidden_dim'])
            for i in range(n_s)],
        'Q_cross_attn_layers': [
            _init_attn_block(keys[2 + n_s + i], D, H, cfg['attn_mlp_hidden_dim'])
            for i in range(n_q)],
    }
    if cfg['num_weight_tied_layers'] > 0:
        params['S_self_weight_tied_attn'] = _init_attn_block(
            keys[-4], D, H, cfg['attn_mlp_hidden_dim'])
        params['Q_cross_weight_tied_attn'] = _init_attn_block(
            keys[-3], D, H, cfg['attn_mlp_hidden_dim'])
    if cfg['use_s_ff']:
        params['S_feed_forward'] = _init_mlp(
            keys[-2], cfg['ff_mlp_num_layers'], D, cfg['ff_mlp_hidden_dim'], D)
    if cfg['use_q_ff']:
        params['Q_feed_forward'] = _init_mlp(
            keys[-1], cfg['ff_mlp_num_layers'], D, cfg['ff_mlp_hidden_dim'],
            cfg['query_emb_dim'])
    return params


# ----------------------------------------------------------------------------
# Fully fused encoder forward: one pallas_call, batch-parallel grid, packed
# parameter slabs (2 input DMAs for all weights), VMEM-resident everywhere.
# ----------------------------------------------------------------------------
def encoder_forward(params, s, q, cfg):
    B = s.shape[0]
    A = cfg['num_attrs']
    D = cfg['attn_head_key_dim']
    H = cfg['num_attn_heads']
    hd = D // H
    n_tied = cfg['num_weight_tied_layers']
    n_s = len(params['S_self_attn_layers'])
    n_q = len(params['Q_cross_attn_layers'])
    use_s_ff = cfg['use_s_ff']
    use_q_ff = cfg['use_q_ff']
    ff_layers = cfg['ff_mlp_num_layers']
    pool_layers = 2
    qemb = cfg['query_emb_dim']
    score_scale = 1.0 / math.sqrt(hd)

    if not use_q_ff:
        # Original torch module reshapes to [-1, query_emb_dim] directly; that
        # only makes sense when the dims match.
        assert qemb == D, "use_q_ff=False requires query_emb_dim == attn_head_key_dim"

    # ---- Pack all parameters into two tile-aligned f32 slabs --------------
    max_col = max(cfg['pooling_mlp_hidden_dim'], D, cfg['attn_mlp_hidden_dim'],
                  cfg['ff_mlp_hidden_dim'], qemb)
    CPAD = ((max_col + 127) // 128) * 128

    w_blocks, v_rows, schedule = [], [], []
    w_off = [0]

    def add_w(w):
        r, c = w.shape
        assert c <= CPAD
        rp = ((r + 7) // 8) * 8
        w_blocks.append(jnp.pad(w.astype(jnp.float32), ((0, rp - r), (0, CPAD - c))))
        schedule.append(('W', w_off[0], r, c))
        w_off[0] += rp

    def add_v(v):
        v = jnp.asarray(v, jnp.float32).reshape(1, -1)
        c = v.shape[-1]
        assert c <= CPAD
        schedule.append(('V', len(v_rows), c))
        v_rows.append(jnp.pad(v, ((0, 0), (0, CPAD - c))))

    def add_mlp(mlp):
        for w, b in zip(*mlp):
            add_w(w)
            add_v(b)

    def add_attn(blk):
        for name in _ATTN_PARAM_NAMES:
            (add_w if name in _ATTN_MATRIX_NAMES else add_v)(blk[name])

    # Packing order == exact consumption order inside the kernel.
    add_mlp(params['S_pooling'])
    add_mlp(params['Q_pooling'])
    for blk in params['S_self_attn_layers']:
        add_attn(blk)
    if n_tied > 0:
        add_attn(params['S_self_weight_tied_attn'])
    if use_s_ff:
        add_mlp(params['S_feed_forward'])
    for blk in params['Q_cross_attn_layers']:
        add_attn(blk)
    if n_tied > 0:
        add_attn(params['Q_cross_weight_tied_attn'])
    if use_q_ff:
        add_mlp(params['Q_feed_forward'])

    w_slab = jnp.concatenate(w_blocks, axis=0)                       # (Wr, CPAD)
    n_v = len(v_rows)
    n_vpad = ((n_v + 7) // 8) * 8
    v_rows += [jnp.zeros((1, CPAD), jnp.float32)] * (n_vpad - n_v)
    v_slab = jnp.concatenate(v_rows, axis=0)                         # (Vr, CPAD)
    Wr, Vr = w_slab.shape[0], v_slab.shape[0]

    # Activations: keep batch as a leading grid axis.
    s3 = s.reshape(B, A, cfg['n_bins']).astype(jnp.float32)
    q3 = q.reshape(B, 1, cfg['query_part_feature_dim']).astype(jnp.float32)

    # ---- Kernel ------------------------------------------------------------
    def kernel(s_ref, q_ref, w_ref, v_ref, out_ref):
        pos = [0]

        def next_param():
            ent = schedule[pos[0]]
            pos[0] += 1
            if ent[0] == 'W':
                _, off, r, c = ent
                return w_ref[off:off + r, :c]          # static slice load
            _, off, c = ent
            return v_ref[off:off + 1, :c]              # (1, c) row load

        def layer_norm(z, g, b):
            mu = jnp.mean(z, axis=-1, keepdims=True)
            var = jnp.mean((z - mu) ** 2, axis=-1, keepdims=True)
            return (z - mu) * jax.lax.rsqrt(var + 1e-5) * g + b

        def run_mlp(h, n_layers):
            for layer in range(n_layers):
                w = next_param()
                b = next_param()
                h = jnp.dot(h, w, preferred_element_type=jnp.float32) + b
                if layer < n_layers - 1:
                    h = jnp.maximum(h, 0.0)
            return h

        def load_attn_params():
            return tuple(next_param() for _ in range(16))

        def attn_block(prm, kv, x):
            (wq, bq, wk, bk, wv, bv, wo, bo,
             ln1_g, ln1_b, w1, b1, w2, b2, ln2_g, ln2_b) = prm
            t_q, t_kv = x.shape[0], kv.shape[0]
            # Fused full-width projections: (rows, D) @ (D, D).
            qp = jnp.dot(x, wq, preferred_element_type=jnp.float32) + bq
            kp = jnp.dot(kv, wk, preferred_element_type=jnp.float32) + bk
            vp = jnp.dot(kv, wv, preferred_element_type=jnp.float32) + bv
            # Batched per-head attention: contract last dims directly
            # (no explicit transpose, no per-head Python loop / concatenate).
            qh = qp.reshape(t_q, H, hd)
            kh = kp.reshape(t_kv, H, hd)
            vh = vp.reshape(t_kv, H, hd)
            sc = jnp.einsum('qhd,khd->hqk', qh, kh,
                            preferred_element_type=jnp.float32) * score_scale
            sc = sc - jnp.max(sc, axis=-1, keepdims=True)
            pm = jnp.exp(sc)
            pm = pm * pl.reciprocal(jnp.sum(pm, axis=-1, keepdims=True),
                                    approx=True)
            ctx = jnp.einsum('hqk,khd->qhd', pm, vh,
                             preferred_element_type=jnp.float32).reshape(t_q, D)
            attn_out = jnp.dot(ctx, wo, preferred_element_type=jnp.float32) + bo
            h1 = layer_norm(x + attn_out, ln1_g, ln1_b)
            m = jnp.maximum(
                jnp.dot(h1, w1, preferred_element_type=jnp.float32) + b1, 0.0)
            m = jnp.dot(m, w2, preferred_element_type=jnp.float32) + b2
            return layer_norm(h1 + m, ln2_g, ln2_b)

        s_h = run_mlp(s_ref[0], pool_layers)     # (A, D)
        q_h = run_mlp(q_ref[0], pool_layers)     # (1, D)

        for _ in range(n_s):
            s_h = attn_block(load_attn_params(), s_h, s_h)       # self-attn on s
        if n_tied > 0:
            tied_s = load_attn_params()                          # load once
            for _ in range(n_tied):
                s_h = attn_block(tied_s, s_h, s_h)
        if use_s_ff:
            s_h = run_mlp(s_h, ff_layers)
        for _ in range(n_q):
            q_h = attn_block(load_attn_params(), s_h, q_h)       # q attends to s
        if n_tied > 0:
            tied_q = load_attn_params()                          # load once
            for _ in range(n_tied):
                q_h = attn_block(tied_q, s_h, q_h)
        if use_q_ff:
            q_h = run_mlp(q_h, ff_layers)

        out_ref[0] = q_h.astype(out_ref.dtype)

    out = pl.pallas_call(
        kernel,
        out_shape=jax.ShapeDtypeStruct((B, 1, qemb), jnp.float32),
        grid_spec=pltpu.PrefetchScalarGridSpec(
            num_scalar_prefetch=0,
            grid=(B,),
            in_specs=[
                pl.BlockSpec((1, A, cfg['n_bins']), lambda b: (b, 0, 0)),
                pl.BlockSpec((1, 1, cfg['query_part_feature_dim']),
                             lambda b: (b, 0, 0)),
                # Parameter slabs: constant index_map -> DMA'd once, resident.
                pl.BlockSpec((Wr, CPAD), lambda b: (0, 0)),
                pl.BlockSpec((Vr, CPAD), lambda b: (0, 0)),
            ],
            out_specs=pl.BlockSpec((1, 1, qemb), lambda b: (b, 0, 0)),
        ),
        compiler_params=pltpu.CompilerParams(
            dimension_semantics=("parallel",),     # second TC active on v7x
            vmem_limit_bytes=16 << 20),
    )(s3, q3, w_slab, v_slab)
    return out.reshape(B, qemb)


# ----------------------------------------------------------------------------
if __name__ == "__main__":
    cfg = dict(
        num_attrs=8,
        n_bins=16,
        query_part_feature_dim=16,
        pooling_mlp_hidden_dim=32,
        num_s_self_attn_layers=1,      # +1 applied (no weight tying) -> 2 layers
        num_q_cross_attn_layers=1,     # +1 applied -> 2 layers
        num_attn_heads=4,
        attn_head_key_dim=32,
        query_emb_dim=32,
        attn_mlp_hidden_dim=32,
        use_s_ff=True,
        use_q_ff=True,
        ff_mlp_num_layers=2,
        ff_mlp_hidden_dim=32,
        dropout_rate=0.0,              # identity at inference
        use_float64=False,
        num_weight_tied_layers=0,
    )

    key = jax.random.PRNGKey(0)
    k_param, k_s, k_q = jax.random.split(key, 3)

    params = init_encoder_params(k_param, cfg)

    batch = 2
    s = jax.random.normal(k_s, (batch, cfg['num_attrs'], cfg['n_bins']), jnp.float32)
    q = jax.random.normal(k_q, (batch, 1, cfg['query_part_feature_dim']), jnp.float32)

    out = encoder_forward(params, s, q, cfg)
    out = jax.block_until_ready(out)

    assert out.shape == (batch, cfg['query_emb_dim'])
    assert bool(jnp.all(jnp.isfinite(out)))
    print("KERNEL_OK")
</pallas_src>

<mosaic_0001>
module attributes {stable_mosaic.version = 11 : i64} {
  func.func @kernel(%arg0: i32, %arg1: memref<1x8x16xf32, #tpu.memory_space<vmem>>, %arg2: memref<1x1x16xf32, #tpu.memory_space<vmem>>, %arg3: memref<992x128xf32, #tpu.memory_space<vmem>>, %arg4: memref<48x128xf32, #tpu.memory_space<vmem>>, %arg5: memref<1x1x32xf32, #tpu.memory_space<vmem>>) attributes {dimension_semantics = [#tpu.dimension_semantics<parallel>], iteration_bounds = array<i64: 2>, scalar_prefetch = 0 : i64, scratch_operands = 0 : i64, tpu.core_type = #tpu.core_type<tc>, window_params = [{transform_indices = @transform_0, window_bounds = array<i64: 1, 8, 16>}, {transform_indices = @transform_1, window_bounds = array<i64: 1, 1, 16>}, {pipeline_mode = #tpu.pipeline_mode<synchronous>, transform_indices = @transform_2, window_bounds = array<i64: 992, 128>}, {pipeline_mode = #tpu.pipeline_mode<synchronous>, transform_indices = @transform_3, window_bounds = array<i64: 48, 128>}, {transform_indices = @transform_4, window_bounds = array<i64: 1, 1, 32>}]} {
    %c0 = arith.constant 0 : index
    %c0_0 = arith.constant 0 : index
    %c0_1 = arith.constant 0 : index
    %0 = vector.load %arg1[%c0, %c0_0, %c0_1] : memref<1x8x16xf32, #tpu.memory_space<vmem>>, vector<1x8x16xf32>
    %1 = vector.shape_cast %0 : vector<1x8x16xf32> to vector<8x16xf32>
    %c0_2 = arith.constant 0 : index
    %c0_3 = arith.constant 0 : index
    %2 = vector.load %arg3[%c0_2, %c0_3] : memref<992x128xf32, #tpu.memory_space<vmem>>, vector<16x32xf32>
    %c0_4 = arith.constant 0 : index
    %c0_5 = arith.constant 0 : index
    %3 = vector.load %arg4[%c0_4, %c0_5] : memref<48x128xf32, #tpu.memory_space<vmem>>, vector<1x32xf32>
    %cst = arith.constant dense<0.000000e+00> : vector<8x32xf32>
    %4 = tpu.matmul %1, %2, %cst {dimension_numbers = #tpu.dot_dimension_numbers<[1], [0], [0], [1], [0, 0, 1, 1], [], []>} : vector<8x16xf32>, vector<16x32xf32>, vector<8x32xf32> -> vector<8x32xf32>
    %5 = vector.broadcast %3 : vector<1x32xf32> to vector<8x32xf32>
    %6 = arith.addf %4, %5 : vector<8x32xf32>
    %cst_6 = arith.constant 0.000000e+00 : f32
    %7 = vector.broadcast %cst_6 : f32 to vector<8x32xf32>
    %8 = arith.maximumf %6, %7 : vector<8x32xf32>
    %c16 = arith.constant 16 : index
    %c0_7 = arith.constant 0 : index
    %9 = vector.load %arg3[%c16, %c0_7] : memref<992x128xf32, #tpu.memory_space<vmem>>, vector<32x32xf32>
    %c1 = arith.constant 1 : index
    %c0_8 = arith.constant 0 : index
    %10 = vector.load %arg4[%c1, %c0_8] : memref<48x128xf32, #tpu.memory_space<vmem>>, vector<1x32xf32>
    %cst_9 = arith.constant dense<0.000000e+00> : vector<8x32xf32>
    %11 = tpu.matmul %8, %9, %cst_9 {dimension_numbers = #tpu.dot_dimension_numbers<[1], [0], [0], [1], [0, 0, 1, 1], [], []>} : vector<8x32xf32>, vector<32x32xf32>, vector<8x32xf32> -> vector<8x32xf32>
    %12 = vector.broadcast %10 : vector<1x32xf32> to vector<8x32xf32>
    %13 = arith.addf %11, %12 : vector<8x32xf32>
    %c0_10 = arith.constant 0 : index
    %c0_11 = arith.constant 0 : index
    %c0_12 = arith.constant 0 : index
    %14 = vector.load %arg2[%c0_10, %c0_11, %c0_12] : memref<1x1x16xf32, #tpu.memory_space<vmem>>, vector<1x1x16xf32>
    %15 = vector.shape_cast %14 : vector<1x1x16xf32> to vector<1x16xf32>
    %c48 = arith.constant 48 : index
    %c0_13 = arith.constant 0 : index
    %16 = vector.load %arg3[%c48, %c0_13] : memref<992x128xf32, #tpu.memory_space<vmem>>, vector<16x32xf32>
    %c2 = arith.constant 2 : index
    %c0_14 = arith.constant 0 : index
    %17 = vector.load %arg4[%c2, %c0_14] : memref<48x128xf32, #tpu.memory_space<vmem>>, vector<1x32xf32>
    %cst_15 = arith.constant dense<0.000000e+00> : vector<1x32xf32>
    %18 = tpu.matmul %15, %16, %cst_15 {dimension_numbers = #tpu.dot_dimension_numbers<[1], [0], [0], [1], [0, 0, 1, 1], [], []>} : vector<1x16xf32>, vector<16x32xf32>, vector<1x32xf32> -> vector<1x32xf32>
    %19 = arith.addf %18, %17 : vector<1x32xf32>
    %cst_16 = arith.constant 0.000000e+00 : f32
    %20 = vector.broadcast %cst_16 : f32 to vector<1x32xf32>
    %21 = arith.maximumf %19, %20 : vector<1x32xf32>
    %c64 = arith.constant 64 : index
    %c0_17 = arith.constant 0 : index
    %22 = vector.load %arg3[%c64, %c0_17] : memref<992x128xf32, #tpu.memory_space<vmem>>, vector<32x32xf32>
    %c3 = arith.constant 3 : index
    %c0_18 = arith.constant 0 : index
    %23 = vector.load %arg4[%c3, %c0_18] : memref<48x128xf32, #tpu.memory_space<vmem>>, vector<1x32xf32>
    %cst_19 = arith.constant dense<0.000000e+00> : vector<1x32xf32>
    %24 = tpu.matmul %21, %22, %cst_19 {dimension_numbers = #tpu.dot_dimension_numbers<[1], [0], [0], [1], [0, 0, 1, 1], [], []>} : vector<1x32xf32>, vector<32x32xf32>, vector<1x32xf32> -> vector<1x32xf32>
    %25 = arith.addf %24, %23 : vector<1x32xf32>
    %c96 = arith.constant 96 : index
    %c0_20 = arith.constant 0 : index
    %26 = vector.load %arg3[%c96, %c0_20] : memref<992x128xf32, #tpu.memory_space<vmem>>, vector<32x32xf32>
    %c4 = arith.constant 4 : index
    %c0_21 = arith.constant 0 : index
    %27 = vector.load %arg4[%c4, %c0_21] : memref<48x128xf32, #tpu.memory_space<vmem>>, vector<1x32xf32>
    %c128 = arith.constant 128 : index
    %c0_22 = arith.constant 0 : index
    %28 = vector.load %arg3[%c128, %c0_22] : memref<992x128xf32, #tpu.memory_space<vmem>>, vector<32x32xf32>
    %c5 = arith.constant 5 : index
    %c0_23 = arith.constant 0 : index
    %29 = vector.load %arg4[%c5, %c0_23] : memref<48x128xf32, #tpu.memory_space<vmem>>, vector<1x32xf32>
    %c160 = arith.constant 160 : index
    %c0_24 = arith.constant 0 : index
    %30 = vector.load %arg3[%c160, %c0_24] : memref<992x128xf32, #tpu.memory_space<vmem>>, vector<32x32xf32>
    %c6 = arith.constant 6 : index
    %c0_25 = arith.constant 0 : index
    %31 = vector.load %arg4[%c6, %c0_25] : memref<48x128xf32, #tpu.memory_space<vmem>>, vector<1x32xf32>
    %c192 = arith.constant 192 : index
    %c0_26 = arith.constant 0 : index
    %32 = vector.load %arg3[%c192, %c0_26] : memref<992x128xf32, #tpu.memory_space<vmem>>, vector<32x32xf32>
    %c7 = arith.constant 7 : index
    %c0_27 = arith.constant 0 : index
    %33 = vector.load %arg4[%c7, %c0_27] : memref<48x128xf32, #tpu.memory_space<vmem>>, vector<1x32xf32>
    %c8 = arith.constant 8 : index
    %c0_28 = arith.constant 0 : index
    %34 = vector.load %arg4[%c8, %c0_28] : memref<48x128xf32, #tpu.memory_space<vmem>>, vector<1x32xf32>
    %c9 = arith.constant 9 : index
    %c0_29 = arith.constant 0 : index
    %35 = vector.load %arg4[%c9, %c0_29] : memref<48x128xf32, #tpu.memory_space<vmem>>, vector<1x32xf32>
    %c224 = arith.constant 224 : index
    %c0_30 = arith.constant 0 : index
    %36 = vector.load %arg3[%c224, %c0_30] : memref<992x128xf32, #tpu.memory_space<vmem>>, vector<32x32xf32>
    %c10 = arith.constant 10 : index
    %c0_31 = arith.constant 0 : index
    %37 = vector.load %arg4[%c10, %c0_31] : memref<48x128xf32, #tpu.memory_space<vmem>>, vector<1x32xf32>
    %c256 = arith.constant 256 : index
    %c0_32 = arith.constant 0 : index
    %38 = vector.load %arg3[%c256, %c0_32] : memref<992x128xf32, #tpu.memory_space<vmem>>, vector<32x32xf32>
    %c11 = arith.constant 11 : index
    %c0_33 = arith.constant 0 : index
    %39 = vector.load %arg4[%c11, %c0_33] : memref<48x128xf32, #tpu.memory_space<vmem>>, vector<1x32xf32>
    %c12 = arith.constant 12 : index
    %c0_34 = arith.constant 0 : index
    %40 = vector.load %arg4[%c12, %c0_34] : memref<48x128xf32, #tpu.memory_space<vmem>>, vector<1x32xf32>
    %c13 = arith.constant 13 : index
    %c0_35 = arith.constant 0 : index
    %41 = vector.load %arg4[%c13, %c0_35] : memref<48x128xf32, #tpu.memory_space<vmem>>, vector<1x32xf32>
    %cst_36 = arith.constant dense<0.000000e+00> : vector<8x32xf32>
    %42 = tpu.matmul %13, %26, %cst_36 {dimension_numbers = #tpu.dot_dimension_numbers<[1], [0], [0], [1], [0, 0, 1, 1], [], []>} : vector<8x32xf32>, vector<32x32xf32>, vector<8x32xf32> -> vector<8x32xf32>
    %43 = vector.broadcast %27 : vector<1x32xf32> to vector<8x32xf32>
    %44 = arith.addf %42, %43 : vector<8x32xf32>
    %cst_37 = arith.constant dense<0.000000e+00> : vector<8x32xf32>
    %45 = tpu.matmul %13, %28, %cst_37 {dimension_numbers = #tpu.dot_dimension_numbers<[1], [0], [0], [1], [0, 0, 1, 1], [], []>} : vector<8x32xf32>, vector<32x32xf32>, vector<8x32xf32> -> vector<8x32xf32>
    %46 = vector.broadcast %29 : vector<1x32xf32> to vector<8x32xf32>
    %47 = arith.addf %45, %46 : vector<8x32xf32>
    %cst_38 = arith.constant dense<0.000000e+00> : vector<8x32xf32>
    %48 = tpu.matmul %13, %30, %cst_38 {dimension_numbers = #tpu.dot_dimension_numbers<[1], [0], [0], [1], [0, 0, 1, 1], [], []>} : vector<8x32xf32>, vector<32x32xf32>, vector<8x32xf32> -> vector<8x32xf32>
    %49 = vector.broadcast %31 : vector<1x32xf32> to vector<8x32xf32>
    %50 = arith.addf %48, %49 : vector<8x32xf32>
    %51 = vector.shape_cast %44 : vector<8x32xf32> to vector<8x4x8xf32>
    %52 = vector.shape_cast %47 : vector<8x32xf32> to vector<8x4x8xf32>
    %53 = vector.shape_cast %50 : vector<8x32xf32> to vector<8x4x8xf32>
    "tpu.trace_start"() <{level = 10 : i32, message = "qhd,khd->hqk"}> : () -> ()
    %cst_39 = arith.constant dense<0.000000e+00> : vector<4x8x8xf32>
    %54 = tpu.matmul %51, %52, %cst_39 {dimension_numbers = #tpu.dot_dimension_numbers<[2], [2], [0], [0], [0, 1, 0, 0, 1, 0], [1], [1]>} : vector<8x4x8xf32>, vector<8x4x8xf32>, vector<4x8x8xf32> -> vector<4x8x8xf32>
    "tpu.trace_stop"() : () -> ()
    %cst_40 = arith.constant 0.353553385 : f32
    %55 = vector.broadcast %cst_40 : f32 to vector<4x8x8xf32>
    %56 = arith.mulf %54, %55 : vector<4x8x8xf32>
    %cst_41 = arith.constant dense<0xFF800000> : vector<4x8xf32>
    %57 = vector.multi_reduction <maximumf>, %56, %cst_41 [2] : vector<4x8x8xf32> to vector<4x8xf32>
    %58 = vector.shape_cast %57 : vector<4x8xf32> to vector<4x8x1xf32>
    %59 = vector.broadcast %58 : vector<4x8x1xf32> to vector<4x8x8xf32>
    %60 = arith.subf %56, %59 : vector<4x8x8xf32>
    %61 = math.exp %60 : vector<4x8x8xf32>
    %cst_42 = arith.constant dense<0.000000e+00> : vector<4x8xf32>
    %62 = vector.multi_reduction <add>, %61, %cst_42 [2] : vector<4x8x8xf32> to vector<4x8xf32>
    %63 = vector.shape_cast %62 : vector<4x8xf32> to vector<4x8x1xf32>
    %64 = tpu.reciprocal %63 {approx = true} : vector<4x8x1xf32> -> vector<4x8x1xf32>
    %65 = vector.broadcast %64 : vector<4x8x1xf32> to vector<4x8x8xf32>
    %66 = arith.mulf %61, %65 : vector<4x8x8xf32>
    "tpu.trace_start"() <{level = 10 : i32, message = "hqk,khd->qhd"}> : () -> ()
    %cst_43 = arith.constant dense<0.000000e+00> : vector<4x8x8xf32>
    %67 = tpu.matmul %53, %66, %cst_43 {dimension_numbers = #tpu.dot_dimension_numbers<[0], [2], [2], [1], [0, 1, 0, 2, 1, 1], [1], [0]>} : vector<8x4x8xf32>, vector<4x8x8xf32>, vector<4x8x8xf32> -> vector<4x8x8xf32>
    %68 = tpu.transpose %67, [2, 0, 1] : vector<4x8x8xf32> -> vector<8x4x8xf32>
    "tpu.trace_stop"() : () -> ()
    %69 = vector.shape_cast %68 : vector<8x4x8xf32> to vector<8x32xf32>
    %cst_44 = arith.constant dense<0.000000e+00> : vector<8x32xf32>
    %70 = tpu.matmul %69, %32, %cst_44 {dimension_numbers = #tpu.dot_dimension_numbers<[1], [0], [0], [1], [0, 0, 1, 1], [], []>} : vector<8x32xf32>, vector<32x32xf32>, vector<8x32xf32> -> vector<8x32xf32>
    %71 = vector.broadcast %33 : vector<1x32xf32> to vector<8x32xf32>
    %72 = arith.addf %70, %71 : vector<8x32xf32>
    %73 = arith.addf %13, %72 : vector<8x32xf32>
    %cst_45 = arith.constant dense<0.000000e+00> : vector<8xf32>
    %74 = vector.multi_reduction <add>, %73, %cst_45 [1] : vector<8x32xf32> to vector<8xf32>
    %75 = vector.shape_cast %74 : vector<8xf32> to vector<8x1xf32>
    %cst_46 = arith.constant 3.200000e+01 : f32
    %76 = vector.broadcast %cst_46 : f32 to vector<8x1xf32>
    %77 = arith.divf %75, %76 : vector<8x1xf32>
    %78 = vector.broadcast %77 : vector<8x1xf32> to vector<8x32xf32>
    %79 = arith.subf %73, %78 : vector<8x32xf32>
    %80 = arith.mulf %79, %79 : vector<8x32xf32>
    %cst_47 = arith.constant dense<0.000000e+00> : vector<8xf32>
    %81 = vector.multi_reduction <add>, %80, %cst_47 [1] : vector<8x32xf32> to vector<8xf32>
    %82 = vector.shape_cast %81 : vector<8xf32> to vector<8x1xf32>
    %cst_48 = arith.constant 3.200000e+01 : f32
    %83 = vector.broadcast %cst_48 : f32 to vector<8x1xf32>
    %84 = arith.divf %82, %83 : vector<8x1xf32>
    %85 = vector.broadcast %77 : vector<8x1xf32> to vector<8x32xf32>
    %86 = arith.subf %73, %85 : vector<8x32xf32>
    %cst_49 = arith.constant 9.99999974E-6 : f32
    %87 = vector.broadcast %cst_49 : f32 to vector<8x1xf32>
    %88 = arith.addf %84, %87 : vector<8x1xf32>
    %89 = math.rsqrt %88 : vector<8x1xf32>
    %90 = vector.broadcast %89 : vector<8x1xf32> to vector<8x32xf32>
    %91 = arith.mulf %86, %90 : vector<8x32xf32>
    %92 = vector.broadcast %34 : vector<1x32xf32> to vector<8x32xf32>
    %93 = arith.mulf %91, %92 : vector<8x32xf32>
    %94 = vector.broadcast %35 : vector<1x32xf32> to vector<8x32xf32>
    %95 = arith.addf %93, %94 : vector<8x32xf32>
    %cst_50 = arith.constant dense<0.000000e+00> : vector<8x32xf32>
    %96 = tpu.matmul %95, %36, %cst_50 {dimension_numbers = #tpu.dot_dimension_numbers<[1], [0], [0], [1], [0, 0, 1, 1], [], []>} : vector<8x32xf32>, vector<32x32xf32>, vector<8x32xf32> -> vector<8x32xf32>
    %97 = vector.broadcast %37 : vector<1x32xf32> to vector<8x32xf32>
    %98 = arith.addf %96, %97 : vector<8x32xf32>
    %cst_51 = arith.constant 0.000000e+00 : f32
    %99 = vector.broadcast %cst_51 : f32 to vector<8x32xf32>
    %100 = arith.maximumf %98, %99 : vector<8x32xf32>
    %cst_52 = arith.constant dense<0.000000e+00> : vector<8x32xf32>
    %101 = tpu.matmul %100, %38, %cst_52 {dimension_numbers = #tpu.dot_dimension_numbers<[1], [0], [0], [1], [0, 0, 1, 1], [], []>} : vector<8x32xf32>, vector<32x32xf32>, vector<8x32xf32> -> vector<8x32xf32>
    %102 = vector.broadcast %39 : vector<1x32xf32> to vector<8x32xf32>
    %103 = arith.addf %101, %102 : vector<8x32xf32>
    %104 = arith.addf %95, %103 : vector<8x32xf32>
    %cst_53 = arith.constant dense<0.000000e+00> : vector<8xf32>
    %105 = vector.multi_reduction <add>, %104, %cst_53 [1] : vector<8x32xf32> to vector<8xf32>
    %106 = vector.shape_cast %105 : vector<8xf32> to vector<8x1xf32>
    %cst_54 = arith.constant 3.200000e+01 : f32
    %107 = vector.broadcast %cst_54 : f32 to vector<8x1xf32>
    %108 = arith.divf %106, %107 : vector<8x1xf32>
    %109 = vector.broadcast %108 : vector<8x1xf32> to vector<8x32xf32>
    %110 = arith.subf %104, %109 : vector<8x32xf32>
    %111 = arith.mulf %110, %110 : vector<8x32xf32>
    %cst_55 = arith.constant dense<0.000000e+00> : vector<8xf32>
    %112 = vector.multi_reduction <add>, %111, %cst_55 [1] : vector<8x32xf32> to vector<8xf32>
    %113 = vector.shape_cast %112 : vector<8xf32> to vector<8x1xf32>
    %cst_56 = arith.constant 3.200000e+01 : f32
    %114 = vector.broadcast %cst_56 : f32 to vector<8x1xf32>
    %115 = arith.divf %113, %114 : vector<8x1xf32>
    %116 = vector.broadcast %108 : vector<8x1xf32> to vector<8x32xf32>
    %117 = arith.subf %104, %116 : vector<8x32xf32>
    %cst_57 = arith.constant 9.99999974E-6 : f32
    %118 = vector.broadcast %cst_57 : f32 to vector<8x1xf32>
    %119 = arith.addf %115, %118 : vector<8x1xf32>
    %120 = math.rsqrt %119 : vector<8x1xf32>
    %121 = vector.broadcast %120 : vector<8x1xf32> to vector<8x32xf32>
    %122 = arith.mulf %117, %121 : vector<8x32xf32>
    %123 = vector.broadcast %40 : vector<1x32xf32> to vector<8x32xf32>
    %124 = arith.mulf %122, %123 : vector<8x32xf32>
    %125 = vector.broadcast %41 : vector<1x32xf32> to vector<8x32xf32>
    %126 = arith.addf %124, %125 : vector<8x32xf32>
    %c288 = arith.constant 288 : index
    %c0_58 = arith.constant 0 : index
    %127 = vector.load %arg3[%c288, %c0_58] : memref<992x128xf32, #tpu.memory_space<vmem>>, vector<32x32xf32>
    %c14 = arith.constant 14 : index
    %c0_59 = arith.constant 0 : index
    %128 = vector.load %arg4[%c14, %c0_59] : memref<48x128xf32, #tpu.memory_space<vmem>>, vector<1x32xf32>
    %c320 = arith.constant 320 : index
    %c0_60 = arith.constant 0 : index
    %129 = vector.load %arg3[%c320, %c0_60] : memref<992x128xf32, #tpu.memory_space<vmem>>, vector<32x32xf32>
    %c15 = arith.constant 15 : index
    %c0_61 = arith.constant 0 : index
    %130 = vector.load %arg4[%c15, %c0_61] : memref<48x128xf32, #tpu.memory_space<vmem>>, vector<1x32xf32>
    %c352 = arith.constant 352 : index
    %c0_62 = arith.constant 0 : index
    %131 = vector.load %arg3[%c352, %c0_62] : memref<992x128xf32, #tpu.memory_space<vmem>>, vector<32x32xf32>
    %c16_63 = arith.constant 16 : index
    %c0_64 = arith.constant 0 : index
    %132 = vector.load %arg4[%c16_63, %c0_64] : memref<48x128xf32, #tpu.memory_space<vmem>>, vector<1x32xf32>
    %c384 = arith.constant 384 : index
    %c0_65 = arith.constant 0 : index
    %133 = vector.load %arg3[%c384, %c0_65] : memref<992x128xf32, #tpu.memory_space<vmem>>, vector<32x32xf32>
    %c17 = arith.constant 17 : index
    %c0_66 = arith.constant 0 : index
    %134 = vector.load %arg4[%c17, %c0_66] : memref<48x128xf32, #tpu.memory_space<vmem>>, vector<1x32xf32>
    %c18 = arith.constant 18 : index
    %c0_67 = arith.constant 0 : index
    %135 = vector.load %arg4[%c18, %c0_67] : memref<48x128xf32, #tpu.memory_space<vmem>>, vector<1x32xf32>
    %c19 = arith.constant 19 : index
    %c0_68 = arith.constant 0 : index
    %136 = vector.load %arg4[%c19, %c0_68] : memref<48x128xf32, #tpu.memory_space<vmem>>, vector<1x32xf32>
    %c416 = arith.constant 416 : index
    %c0_69 = arith.constant 0 : index
    %137 = vector.load %arg3[%c416, %c0_69] : memref<992x128xf32, #tpu.memory_space<vmem>>, vector<32x32xf32>
    %c20 = arith.constant 20 : index
    %c0_70 = arith.constant 0 : index
    %138 = vector.load %arg4[%c20, %c0_70] : memref<48x128xf32, #tpu.memory_space<vmem>>, vector<1x32xf32>
    %c448 = arith.constant 448 : index
    %c0_71 = arith.constant 0 : index
    %139 = vector.load %arg3[%c448, %c0_71] : memref<992x128xf32, #tpu.memory_space<vmem>>, vector<32x32xf32>
    %c21 = arith.constant 21 : index
    %c0_72 = arith.constant 0 : index
    %140 = vector.load %arg4[%c21, %c0_72] : memref<48x128xf32, #tpu.memory_space<vmem>>, vector<1x32xf32>
    %c22 = arith.constant 22 : index
    %c0_73 = arith.constant 0 : index
    %141 = vector.load %arg4[%c22, %c0_73] : memref<48x128xf32, #tpu.memory_space<vmem>>, vector<1x32xf32>
    %c23 = arith.constant 23 : index
    %c0_74 = arith.constant 0 : index
    %142 = vector.load %arg4[%c23, %c0_74] : memref<48x128xf32, #tpu.memory_space<vmem>>, vector<1x32xf32>
    %cst_75 = arith.constant dense<0.000000e+00> : vector<8x32xf32>
    %143 = tpu.matmul %126, %127, %cst_75 {dimension_numbers = #tpu.dot_dimension_numbers<[1], [0], [0], [1], [0, 0, 1, 1], [], []>} : vector<8x32xf32>, vector<32x32xf32>, vector<8x32xf32> -> vector<8x32xf32>
    %144 = vector.broadcast %128 : vector<1x32xf32> to vector<8x32xf32>
    %145 = arith.addf %143, %144 : vector<8x32xf32>
    %cst_76 = arith.constant dense<0.000000e+00> : vector<8x32xf32>
    %146 = tpu.matmul %126, %129, %cst_76 {dimension_numbers = #tpu.dot_dimension_numbers<[1], [0], [0], [1], [0, 0, 1, 1], [], []>} : vector<8x32xf32>, vector<32x32xf32>, vector<8x32xf32> -> vector<8x32xf32>
    %147 = vector.broadcast %130 : vector<1x32xf32> to vector<8x32xf32>
    %148 = arith.addf %146, %147 : vector<8x32xf32>
    %cst_77 = arith.constant dense<0.000000e+00> : vector<8x32xf32>
    %149 = tpu.matmul %126, %131, %cst_77 {dimension_numbers = #tpu.dot_dimension_numbers<[1], [0], [0], [1], [0, 0, 1, 1], [], []>} : vector<8x32xf32>, vector<32x32xf32>, vector<8x32xf32> -> vector<8x32xf32>
    %150 = vector.broadcast %132 : vector<1x32xf32> to vector<8x32xf32>
    %151 = arith.addf %149, %150 : vector<8x32xf32>
    %152 = vector.shape_cast %145 : vector<8x32xf32> to vector<8x4x8xf32>
    %153 = vector.shape_cast %148 : vector<8x32xf32> to vector<8x4x8xf32>
    %154 = vector.shape_cast %151 : vector<8x32xf32> to vector<8x4x8xf32>
    "tpu.trace_start"() <{level = 10 : i32, message = "qhd,khd->hqk"}> : () -> ()
    %cst_78 = arith.constant dense<0.000000e+00> : vector<4x8x8xf32>
    %155 = tpu.matmul %152, %153, %cst_78 {dimension_numbers = #tpu.dot_dimension_numbers<[2], [2], [0], [0], [0, 1, 0, 0, 1, 0], [1], [1]>} : vector<8x4x8xf32>, vector<8x4x8xf32>, vector<4x8x8xf32> -> vector<4x8x8xf32>
    "tpu.trace_stop"() : () -> ()
    %cst_79 = arith.constant 0.353553385 : f32
    %156 = vector.broadcast %cst_79 : f32 to vector<4x8x8xf32>
    %157 = arith.mulf %155, %156 : vector<4x8x8xf32>
    %cst_80 = arith.constant dense<0xFF800000> : vector<4x8xf32>
    %158 = vector.multi_reduction <maximumf>, %157, %cst_80 [2] : vector<4x8x8xf32> to vector<4x8xf32>
    %159 = vector.shape_cast %158 : vector<4x8xf32> to vector<4x8x1xf32>
    %160 = vector.broadcast %159 : vector<4x8x1xf32> to vector<4x8x8xf32>
    %161 = arith.subf %157, %160 : vector<4x8x8xf32>
    %162 = math.exp %161 : vector<4x8x8xf32>
    %cst_81 = arith.constant dense<0.000000e+00> : vector<4x8xf32>
    %163 = vector.multi_reduction <add>, %162, %cst_81 [2] : vector<4x8x8xf32> to vector<4x8xf32>
    %164 = vector.shape_cast %163 : vector<4x8xf32> to vector<4x8x1xf32>
    %165 = tpu.reciprocal %164 {approx = true} : vector<4x8x1xf32> -> vector<4x8x1xf32>
    %166 = vector.broadcast %165 : vector<4x8x1xf32> to vector<4x8x8xf32>
    %167 = arith.mulf %162, %166 : vector<4x8x8xf32>
    "tpu.trace_start"() <{level = 10 : i32, message = "hqk,khd->qhd"}> : () -> ()
    %cst_82 = arith.constant dense<0.000000e+00> : vector<4x8x8xf32>
    %168 = tpu.matmul %154, %167, %cst_82 {dimension_numbers = #tpu.dot_dimension_numbers<[0], [2], [2], [1], [0, 1, 0, 2, 1, 1], [1], [0]>} : vector<8x4x8xf32>, vector<4x8x8xf32>, vector<4x8x8xf32> -> vector<4x8x8xf32>
    %169 = tpu.transpose %168, [2, 0, 1] : vector<4x8x8xf32> -> vector<8x4x8xf32>
    "tpu.trace_stop"() : () -> ()
    %170 = vector.shape_cast %169 : vector<8x4x8xf32> to vector<8x32xf32>
    %cst_83 = arith.constant dense<0.000000e+00> : vector<8x32xf32>
    %171 = tpu.matmul %170, %133, %cst_83 {dimension_numbers = #tpu.dot_dimension_numbers<[1], [0], [0], [1], [0, 0, 1, 1], [], []>} : vector<8x32xf32>, vector<32x32xf32>, vector<8x32xf32> -> vector<8x32xf32>
    %172 = vector.broadcast %134 : vector<1x32xf32> to vector<8x32xf32>
    %173 = arith.addf %171, %172 : vector<8x32xf32>
    %174 = arith.addf %126, %173 : vector<8x32xf32>
    %cst_84 = arith.constant dense<0.000000e+00> : vector<8xf32>
    %175 = vector.multi_reduction <add>, %174, %cst_84 [1] : vector<8x32xf32> to vector<8xf32>
    %176 = vector.shape_cast %175 : vector<8xf32> to vector<8x1xf32>
    %cst_85 = arith.constant 3.200000e+01 : f32
    %177 = vector.broadcast %cst_85 : f32 to vector<8x1xf32>
    %178 = arith.divf %176, %177 : vector<8x1xf32>
    %179 = vector.broadcast %178 : vector<8x1xf32> to vector<8x32xf32>
    %180 = arith.subf %174, %179 : vector<8x32xf32>
    %181 = arith.mulf %180, %180 : vector<8x32xf32>
    %cst_86 = arith.constant dense<0.000000e+00> : vector<8xf32>
    %182 = vector.multi_reduction <add>, %181, %cst_86 [1] : vector<8x32xf32> to vector<8xf32>
    %183 = vector.shape_cast %182 : vector<8xf32> to vector<8x1xf32>
    %cst_87 = arith.constant 3.200000e+01 : f32
    %184 = vector.broadcast %cst_87 : f32 to vector<8x1xf32>
    %185 = arith.divf %183, %184 : vector<8x1xf32>
    %186 = vector.broadcast %178 : vector<8x1xf32> to vector<8x32xf32>
    %187 = arith.subf %174, %186 : vector<8x32xf32>
    %cst_88 = arith.constant 9.99999974E-6 : f32
    %188 = vector.broadcast %cst_88 : f32 to vector<8x1xf32>
    %189 = arith.addf %185, %188 : vector<8x1xf32>
    %190 = math.rsqrt %189 : vector<8x1xf32>
    %191 = vector.broadcast %190 : vector<8x1xf32> to vector<8x32xf32>
    %192 = arith.mulf %187, %191 : vector<8x32xf32>
    %193 = vector.broadcast %135 : vector<1x32xf32> to vector<8x32xf32>
    %194 = arith.mulf %192, %193 : vector<8x32xf32>
    %195 = vector.broadcast %136 : vector<1x32xf32> to vector<8x32xf32>
    %196 = arith.addf %194, %195 : vector<8x32xf32>
    %cst_89 = arith.constant dense<0.000000e+00> : vector<8x32xf32>
    %197 = tpu.matmul %196, %137, %cst_89 {dimension_numbers = #tpu.dot_dimension_numbers<[1], [0], [0], [1], [0, 0, 1, 1], [], []>} : vector<8x32xf32>, vector<32x32xf32>, vector<8x32xf32> -> vector<8x32xf32>
    %198 = vector.broadcast %138 : vector<1x32xf32> to vector<8x32xf32>
    %199 = arith.addf %197, %198 : vector<8x32xf32>
    %cst_90 = arith.constant 0.000000e+00 : f32
    %200 = vector.broadcast %cst_90 : f32 to vector<8x32xf32>
    %201 = arith.maximumf %199, %200 : vector<8x32xf32>
    %cst_91 = arith.constant dense<0.000000e+00> : vector<8x32xf32>
    %202 = tpu.matmul %201, %139, %cst_91 {dimension_numbers = #tpu.dot_dimension_numbers<[1], [0], [0], [1], [0, 0, 1, 1], [], []>} : vector<8x32xf32>, vector<32x32xf32>, vector<8x32xf32> -> vector<8x32xf32>
    %203 = vector.broadcast %140 : vector<1x32xf32> to vector<8x32xf32>
    %204 = arith.addf %202, %203 : vector<8x32xf32>
    %205 = arith.addf %196, %204 : vector<8x32xf32>
    %cst_92 = arith.constant dense<0.000000e+00> : vector<8xf32>
    %206 = vector.multi_reduction <add>, %205, %cst_92 [1] : vector<8x32xf32> to vector<8xf32>
    %207 = vector.shape_cast %206 : vector<8xf32> to vector<8x1xf32>
    %cst_93 = arith.constant 3.200000e+01 : f32
    %208 = vector.broadcast %cst_93 : f32 to vector<8x1xf32>
    %209 = arith.divf %207, %208 : vector<8x1xf32>
    %210 = vector.broadcast %209 : vector<8x1xf32> to vector<8x32xf32>
    %211 = arith.subf %205, %210 : vector<8x32xf32>
    %212 = arith.mulf %211, %211 : vector<8x32xf32>
    %cst_94 = arith.constant dense<0.000000e+00> : vector<8xf32>
    %213 = vector.multi_reduction <add>, %212, %cst_94 [1] : vector<8x32xf32> to vector<8xf32>
    %214 = vector.shape_cast %213 : vector<8xf32> to vector<8x1xf32>
    %cst_95 = arith.constant 3.200000e+01 : f32
    %215 = vector.broadcast %cst_95 : f32 to vector<8x1xf32>
    %216 = arith.divf %214, %215 : vector<8x1xf32>
    %217 = vector.broadcast %209 : vector<8x1xf32> to vector<8x32xf32>
    %218 = arith.subf %205, %217 : vector<8x32xf32>
    %cst_96 = arith.constant 9.99999974E-6 : f32
    %219 = vector.broadcast %cst_96 : f32 to vector<8x1xf32>
    %220 = arith.addf %216, %219 : vector<8x1xf32>
    %221 = math.rsqrt %220 : vector<8x1xf32>
    %222 = vector.broadcast %221 : vector<8x1xf32> to vector<8x32xf32>
    %223 = arith.mulf %218, %222 : vector<8x32xf32>
    %224 = vector.broadcast %141 : vector<1x32xf32> to vector<8x32xf32>
    %225 = arith.mulf %223, %224 : vector<8x32xf32>
    %226 = vector.broadcast %142 : vector<1x32xf32> to vector<8x32xf32>
    %227 = arith.addf %225, %226 : vector<8x32xf32>
    %c480 = arith.constant 480 : index
    %c0_97 = arith.constant 0 : index
    %228 = vector.load %arg3[%c480, %c0_97] : memref<992x128xf32, #tpu.memory_space<vmem>>, vector<32x32xf32>
    %c24 = arith.constant 24 : index
    %c0_98 = arith.constant 0 : index
    %229 = vector.load %arg4[%c24, %c0_98] : memref<48x128xf32, #tpu.memory_space<vmem>>, vector<1x32xf32>
    %cst_99 = arith.constant dense<0.000000e+00> : vector<8x32xf32>
    %230 = tpu.matmul %227, %228, %cst_99 {dimension_numbers = #tpu.dot_dimension_numbers<[1], [0], [0], [1], [0, 0, 1, 1], [], []>} : vector<8x32xf32>, vector<32x32xf32>, vector<8x32xf32> -> vector<8x32xf32>
    %231 = vector.broadcast %229 : vector<1x32xf32> to vector<8x32xf32>
    %232 = arith.addf %230, %231 : vector<8x32xf32>
    %cst_100 = arith.constant 0.000000e+00 : f32
    %233 = vector.broadcast %cst_100 : f32 to vector<8x32xf32>
    %234 = arith.maximumf %232, %233 : vector<8x32xf32>
    %c512 = arith.constant 512 : index
    %c0_101 = arith.constant 0 : index
    %235 = vector.load %arg3[%c512, %c0_101] : memref<992x128xf32, #tpu.memory_space<vmem>>, vector<32x32xf32>
    %c25 = arith.constant 25 : index
    %c0_102 = arith.constant 0 : index
    %236 = vector.load %arg4[%c25, %c0_102] : memref<48x128xf32, #tpu.memory_space<vmem>>, vector<1x32xf32>
    %cst_103 = arith.constant dense<0.000000e+00> : vector<8x32xf32>
    %237 = tpu.matmul %234, %235, %cst_103 {dimension_numbers = #tpu.dot_dimension_numbers<[1], [0], [0], [1], [0, 0, 1, 1], [], []>} : vector<8x32xf32>, vector<32x32xf32>, vector<8x32xf32> -> vector<8x32xf32>
    %238 = vector.broadcast %236 : vector<1x32xf32> to vector<8x32xf32>
    %239 = arith.addf %237, %238 : vector<8x32xf32>
    %c544 = arith.constant 544 : index
    %c0_104 = arith.constant 0 : index
    %240 = vector.load %arg3[%c544, %c0_104] : memref<992x128xf32, #tpu.memory_space<vmem>>, vector<32x32xf32>
    %c26 = arith.constant 26 : index
    %c0_105 = arith.constant 0 : index
    %241 = vector.load %arg4[%c26, %c0_105] : memref<48x128xf32, #tpu.memory_space<vmem>>, vector<1x32xf32>
    %c576 = arith.constant 576 : index
    %c0_106 = arith.constant 0 : index
    %242 = vector.load %arg3[%c576, %c0_106] : memref<992x128xf32, #tpu.memory_space<vmem>>, vector<32x32xf32>
    %c27 = arith.constant 27 : index
    %c0_107 = arith.constant 0 : index
    %243 = vector.load %arg4[%c27, %c0_107] : memref<48x128xf32, #tpu.memory_space<vmem>>, vector<1x32xf32>
    %c608 = arith.constant 608 : index
    %c0_108 = arith.constant 0 : index
    %244 = vector.load %arg3[%c608, %c0_108] : memref<992x128xf32, #tpu.memory_space<vmem>>, vector<32x32xf32>
    %c28 = arith.constant 28 : index
    %c0_109 = arith.constant 0 : index
    %245 = vector.load %arg4[%c28, %c0_109] : memref<48x128xf32, #tpu.memory_space<vmem>>, vector<1x32xf32>
    %c640 = arith.constant 640 : index
    %c0_110 = arith.constant 0 : index
    %246 = vector.load %arg3[%c640, %c0_110] : memref<992x128xf32, #tpu.memory_space<vmem>>, vector<32x32xf32>
    %c29 = arith.constant 29 : index
    %c0_111 = arith.constant 0 : index
    %247 = vector.load %arg4[%c29, %c0_111] : memref<48x128xf32, #tpu.memory_space<vmem>>, vector<1x32xf32>
    %c30 = arith.constant 30 : index
    %c0_112 = arith.constant 0 : index
    %248 = vector.load %arg4[%c30, %c0_112] : memref<48x128xf32, #tpu.memory_space<vmem>>, vector<1x32xf32>
    %c31 = arith.constant 31 : index
    %c0_113 = arith.constant 0 : index
    %249 = vector.load %arg4[%c31, %c0_113] : memref<48x128xf32, #tpu.memory_space<vmem>>, vector<1x32xf32>
    %c672 = arith.constant 672 : index
    %c0_114 = arith.constant 0 : index
    %250 = vector.load %arg3[%c672, %c0_114] : memref<992x128xf32, #tpu.memory_space<vmem>>, vector<32x32xf32>
    %c32 = arith.constant 32 : index
    %c0_115 = arith.constant 0 : index
    %251 = vector.load %arg4[%c32, %c0_115] : memref<48x128xf32, #tpu.memory_space<vmem>>, vector<1x32xf32>
    %c704 = arith.constant 704 : index
    %c0_116 = arith.constant 0 : index
    %252 = vector.load %arg3[%c704, %c0_116] : memref<992x128xf32, #tpu.memory_space<vmem>>, vector<32x32xf32>
    %c33 = arith.constant 33 : index
    %c0_117 = arith.constant 0 : index
    %253 = vector.load %arg4[%c33, %c0_117] : memref<48x128xf32, #tpu.memory_space<vmem>>, vector<1x32xf32>
    %c34 = arith.constant 34 : index
    %c0_118 = arith.constant 0 : index
    %254 = vector.load %arg4[%c34, %c0_118] : memref<48x128xf32, #tpu.memory_space<vmem>>, vector<1x32xf32>
    %c35 = arith.constant 35 : index
    %c0_119 = arith.constant 0 : index
    %255 = vector.load %arg4[%c35, %c0_119] : memref<48x128xf32, #tpu.memory_space<vmem>>, vector<1x32xf32>
    %cst_120 = arith.constant dense<0.000000e+00> : vector<1x32xf32>
    %256 = tpu.matmul %25, %240, %cst_120 {dimension_numbers = #tpu.dot_dimension_numbers<[1], [0], [0], [1], [0, 0, 1, 1], [], []>} : vector<1x32xf32>, vector<32x32xf32>, vector<1x32xf32> -> vector<1x32xf32>
    %257 = arith.addf %256, %241 : vector<1x32xf32>
    %cst_121 = arith.constant dense<0.000000e+00> : vector<8x32xf32>
    %258 = tpu.matmul %239, %242, %cst_121 {dimension_numbers = #tpu.dot_dimension_numbers<[1], [0], [0], [1], [0, 0, 1, 1], [], []>} : vector<8x32xf32>, vector<32x32xf32>, vector<8x32xf32> -> vector<8x32xf32>
    %259 = vector.broadcast %243 : vector<1x32xf32> to vector<8x32xf32>
    %260 = arith.addf %258, %259 : vector<8x32xf32>
    %cst_122 = arith.constant dense<0.000000e+00> : vector<8x32xf32>
    %261 = tpu.matmul %239, %244, %cst_122 {dimension_numbers = #tpu.dot_dimension_numbers<[1], [0], [0], [1], [0, 0, 1, 1], [], []>} : vector<8x32xf32>, vector<32x32xf32>, vector<8x32xf32> -> vector<8x32xf32>
    %262 = vector.broadcast %245 : vector<1x32xf32> to vector<8x32xf32>
    %263 = arith.addf %261, %262 : vector<8x32xf32>
    %264 = vector.shape_cast %257 : vector<1x32xf32> to vector<1x4x8xf32>
    %265 = vector.shape_cast %260 : vector<8x32xf32> to vector<8x4x8xf32>
    %266 = vector.shape_cast %263 : vector<8x32xf32> to vector<8x4x8xf32>
    "tpu.trace_start"() <{level = 10 : i32, message = "qhd,khd->hqk"}> : () -> ()
    %cst_123 = arith.constant dense<0.000000e+00> : vector<4x1x8xf32>
    %267 = tpu.matmul %264, %265, %cst_123 {dimension_numbers = #tpu.dot_dimension_numbers<[2], [2], [0], [0], [0, 1, 0, 0, 1, 0], [1], [1]>} : vector<1x4x8xf32>, vector<8x4x8xf32>, vector<4x1x8xf32> -> vector<4x1x8xf32>
    "tpu.trace_stop"() : () -> ()
    %cst_124 = arith.constant 0.353553385 : f32
    %268 = vector.broadcast %cst_124 : f32 to vector<4x1x8xf32>
    %269 = arith.mulf %267, %268 : vector<4x1x8xf32>
    %cst_125 = arith.constant dense<0xFF800000> : vector<4x1xf32>
    %270 = vector.multi_reduction <maximumf>, %269, %cst_125 [2] : vector<4x1x8xf32> to vector<4x1xf32>
    %271 = vector.shape_cast %270 : vector<4x1xf32> to vector<4x1x1xf32>
    %272 = vector.broadcast %271 : vector<4x1x1xf32> to vector<4x1x8xf32>
    %273 = arith.subf %269, %272 : vector<4x1x8xf32>
    %274 = math.exp %273 : vector<4x1x8xf32>
    %cst_126 = arith.constant dense<0.000000e+00> : vector<4x1xf32>
    %275 = vector.multi_reduction <add>, %274, %cst_126 [2] : vector<4x1x8xf32> to vector<4x1xf32>
    %276 = vector.shape_cast %275 : vector<4x1xf32> to vector<4x1x1xf32>
    %277 = tpu.reciprocal %276 {approx = true} : vector<4x1x1xf32> -> vector<4x1x1xf32>
    %278 = vector.broadcast %277 : vector<4x1x1xf32> to vector<4x1x8xf32>
    %279 = arith.mulf %274, %278 : vector<4x1x8xf32>
    "tpu.trace_start"() <{level = 10 : i32, message = "hqk,khd->qhd"}> : () -> ()
    %cst_127 = arith.constant dense<0.000000e+00> : vector<4x8x1xf32>
    %280 = tpu.matmul %266, %279, %cst_127 {dimension_numbers = #tpu.dot_dimension_numbers<[0], [2], [2], [1], [0, 1, 0, 2, 1, 1], [1], [0]>} : vector<8x4x8xf32>, vector<4x1x8xf32>, vector<4x8x1xf32> -> vector<4x8x1xf32>
    %281 = tpu.transpose %280, [2, 0, 1] : vector<4x8x1xf32> -> vector<1x4x8xf32>
    "tpu.trace_stop"() : () -> ()
    %282 = vector.shape_cast %281 : vector<1x4x8xf32> to vector<1x32xf32>
    %cst_128 = arith.constant dense<0.000000e+00> : vector<1x32xf32>
    %283 = tpu.matmul %282, %246, %cst_128 {dimension_numbers = #tpu.dot_dimension_numbers<[1], [0], [0], [1], [0, 0, 1, 1], [], []>} : vector<1x32xf32>, vector<32x32xf32>, vector<1x32xf32> -> vector<1x32xf32>
    %284 = arith.addf %283, %247 : vector<1x32xf32>
    %285 = arith.addf %25, %284 : vector<1x32xf32>
    %cst_129 = arith.constant dense<0.000000e+00> : vector<1xf32>
    %286 = vector.multi_reduction <add>, %285, %cst_129 [1] : vector<1x32xf32> to vector<1xf32>
    %287 = vector.shape_cast %286 : vector<1xf32> to vector<1x1xf32>
    %cst_130 = arith.constant 3.200000e+01 : f32
    %288 = vector.broadcast %cst_130 : f32 to vector<1x1xf32>
    %289 = arith.divf %287, %288 : vector<1x1xf32>
    %290 = vector.broadcast %289 : vector<1x1xf32> to vector<1x32xf32>
    %291 = arith.subf %285, %290 : vector<1x32xf32>
    %292 = arith.mulf %291, %291 : vector<1x32xf32>
    %cst_131 = arith.constant dense<0.000000e+00> : vector<1xf32>
    %293 = vector.multi_reduction <add>, %292, %cst_131 [1] : vector<1x32xf32> to vector<1xf32>
    %294 = vector.shape_cast %293 : vector<1xf32> to vector<1x1xf32>
    %cst_132 = arith.constant 3.200000e+01 : f32
    %295 = vector.broadcast %cst_132 : f32 to vector<1x1xf32>
    %296 = arith.divf %294, %295 : vector<1x1xf32>
    %297 = vector.broadcast %289 : vector<1x1xf32> to vector<1x32xf32>
    %298 = arith.subf %285, %297 : vector<1x32xf32>
    %cst_133 = arith.constant 9.99999974E-6 : f32
    %299 = vector.broadcast %cst_133 : f32 to vector<1x1xf32>
    %300 = arith.addf %296, %299 : vector<1x1xf32>
    %301 = math.rsqrt %300 : vector<1x1xf32>
    %302 = vector.broadcast %301 : vector<1x1xf32> to vector<1x32xf32>
    %303 = arith.mulf %298, %302 : vector<1x32xf32>
    %304 = arith.mulf %303, %248 : vector<1x32xf32>
    %305 = arith.addf %304, %249 : vector<1x32xf32>
    %cst_134 = arith.constant dense<0.000000e+00> : vector<1x32xf32>
    %306 = tpu.matmul %305, %250, %cst_134 {dimension_numbers = #tpu.dot_dimension_numbers<[1], [0], [0], [1], [0, 0, 1, 1], [], []>} : vector<1x32xf32>, vector<32x32xf32>, vector<1x32xf32> -> vector<1x32xf32>
    %307 = arith.addf %306, %251 : vector<1x32xf32>
    %cst_135 = arith.constant 0.000000e+00 : f32
    %308 = vector.broadcast %cst_135 : f32 to vector<1x32xf32>
    %309 = arith.maximumf %307, %308 : vector<1x32xf32>
    %cst_136 = arith.constant dense<0.000000e+00> : vector<1x32xf32>
    %310 = tpu.matmul %309, %252, %cst_136 {dimension_numbers = #tpu.dot_dimension_numbers<[1], [0], [0], [1], [0, 0, 1, 1], [], []>} : vector<1x32xf32>, vector<32x32xf32>, vector<1x32xf32> -> vector<1x32xf32>
    %311 = arith.addf %310, %253 : vector<1x32xf32>
    %312 = arith.addf %305, %311 : vector<1x32xf32>
    %cst_137 = arith.constant dense<0.000000e+00> : vector<1xf32>
    %313 = vector.multi_reduction <add>, %312, %cst_137 [1] : vector<1x32xf32> to vector<1xf32>
    %314 = vector.shape_cast %313 : vector<1xf32> to vector<1x1xf32>
    %cst_138 = arith.constant 3.200000e+01 : f32
    %315 = vector.broadcast %cst_138 : f32 to vector<1x1xf32>
    %316 = arith.divf %314, %315 : vector<1x1xf32>
    %317 = vector.broadcast %316 : vector<1x1xf32> to vector<1x32xf32>
    %318 = arith.subf %312, %317 : vector<1x32xf32>
    %319 = arith.mulf %318, %318 : vector<1x32xf32>
    %cst_139 = arith.constant dense<0.000000e+00> : vector<1xf32>
    %320 = vector.multi_reduction <add>, %319, %cst_139 [1] : vector<1x32xf32> to vector<1xf32>
    %321 = vector.shape_cast %320 : vector<1xf32> to vector<1x1xf32>
    %cst_140 = arith.constant 3.200000e+01 : f32
    %322 = vector.broadcast %cst_140 : f32 to vector<1x1xf32>
    %323 = arith.divf %321, %322 : vector<1x1xf32>
    %324 = vector.broadcast %316 : vector<1x1xf32> to vector<1x32xf32>
    %325 = arith.subf %312, %324 : vector<1x32xf32>
    %cst_141 = arith.constant 9.99999974E-6 : f32
    %326 = vector.broadcast %cst_141 : f32 to vector<1x1xf32>
    %327 = arith.addf %323, %326 : vector<1x1xf32>
    %328 = math.rsqrt %327 : vector<1x1xf32>
    %329 = vector.broadcast %328 : vector<1x1xf32> to vector<1x32xf32>
    %330 = arith.mulf %325, %329 : vector<1x32xf32>
    %331 = arith.mulf %330, %254 : vector<1x32xf32>
    %332 = arith.addf %331, %255 : vector<1x32xf32>
    %c736 = arith.constant 736 : index
    %c0_142 = arith.constant 0 : index
    %333 = vector.load %arg3[%c736, %c0_142] : memref<992x128xf32, #tpu.memory_space<vmem>>, vector<32x32xf32>
    %c36 = arith.constant 36 : index
    %c0_143 = arith.constant 0 : index
    %334 = vector.load %arg4[%c36, %c0_143] : memref<48x128xf32, #tpu.memory_space<vmem>>, vector<1x32xf32>
    %c768 = arith.constant 768 : index
    %c0_144 = arith.constant 0 : index
    %335 = vector.load %arg3[%c768, %c0_144] : memref<992x128xf32, #tpu.memory_space<vmem>>, vector<32x32xf32>
    %c37 = arith.constant 37 : index
    %c0_145 = arith.constant 0 : index
    %336 = vector.load %arg4[%c37, %c0_145] : memref<48x128xf32, #tpu.memory_space<vmem>>, vector<1x32xf32>
    %c800 = arith.constant 800 : index
    %c0_146 = arith.constant 0 : index
    %337 = vector.load %arg3[%c800, %c0_146] : memref<992x128xf32, #tpu.memory_space<vmem>>, vector<32x32xf32>
    %c38 = arith.constant 38 : index
    %c0_147 = arith.constant 0 : index
    %338 = vector.load %arg4[%c38, %c0_147] : memref<48x128xf32, #tpu.memory_space<vmem>>, vector<1x32xf32>
    %c832 = arith.constant 832 : index
    %c0_148 = arith.constant 0 : index
    %339 = vector.load %arg3[%c832, %c0_148] : memref<992x128xf32, #tpu.memory_space<vmem>>, vector<32x32xf32>
    %c39 = arith.constant 39 : index
    %c0_149 = arith.constant 0 : index
    %340 = vector.load %arg4[%c39, %c0_149] : memref<48x128xf32, #tpu.memory_space<vmem>>, vector<1x32xf32>
    %c40 = arith.constant 40 : index
    %c0_150 = arith.constant 0 : index
    %341 = vector.load %arg4[%c40, %c0_150] : memref<48x128xf32, #tpu.memory_space<vmem>>, vector<1x32xf32>
    %c41 = arith.constant 41 : index
    %c0_151 = arith.constant 0 : index
    %342 = vector.load %arg4[%c41, %c0_151] : memref<48x128xf32, #tpu.memory_space<vmem>>, vector<1x32xf32>
    %c864 = arith.constant 864 : index
    %c0_152 = arith.constant 0 : index
    %343 = vector.load %arg3[%c864, %c0_152] : memref<992x128xf32, #tpu.memory_space<vmem>>, vector<32x32xf32>
    %c42 = arith.constant 42 : index
    %c0_153 = arith.constant 0 : index
    %344 = vector.load %arg4[%c42, %c0_153] : memref<48x128xf32, #tpu.memory_space<vmem>>, vector<1x32xf32>
    %c896 = arith.constant 896 : index
    %c0_154 = arith.constant 0 : index
    %345 = vector.load %arg3[%c896, %c0_154] : memref<992x128xf32, #tpu.memory_space<vmem>>, vector<32x32xf32>
    %c43 = arith.constant 43 : index
    %c0_155 = arith.constant 0 : index
    %346 = vector.load %arg4[%c43, %c0_155] : memref<48x128xf32, #tpu.memory_space<vmem>>, vector<1x32xf32>
    %c44 = arith.constant 44 : index
    %c0_156 = arith.constant 0 : index
    %347 = vector.load %arg4[%c44, %c0_156] : memref<48x128xf32, #tpu.memory_space<vmem>>, vector<1x32xf32>
    %c45 = arith.constant 45 : index
    %c0_157 = arith.constant 0 : index
    %348 = vector.load %arg4[%c45, %c0_157] : memref<48x128xf32, #tpu.memory_space<vmem>>, vector<1x32xf32>
    %cst_158 = arith.constant dense<0.000000e+00> : vector<1x32xf32>
    %349 = tpu.matmul %332, %333, %cst_158 {dimension_numbers = #tpu.dot_dimension_numbers<[1], [0], [0], [1], [0, 0, 1, 1], [], []>} : vector<1x32xf32>, vector<32x32xf32>, vector<1x32xf32> -> vector<1x32xf32>
    %350 = arith.addf %349, %334 : vector<1x32xf32>
    %cst_159 = arith.constant dense<0.000000e+00> : vector<8x32xf32>
    %351 = tpu.matmul %239, %335, %cst_159 {dimension_numbers = #tpu.dot_dimension_numbers<[1], [0], [0], [1], [0, 0, 1, 1], [], []>} : vector<8x32xf32>, vector<32x32xf32>, vector<8x32xf32> -> vector<8x32xf32>
    %352 = vector.broadcast %336 : vector<1x32xf32> to vector<8x32xf32>
    %353 = arith.addf %351, %352 : vector<8x32xf32>
    %cst_160 = arith.constant dense<0.000000e+00> : vector<8x32xf32>
    %354 = tpu.matmul %239, %337, %cst_160 {dimension_numbers = #tpu.dot_dimension_numbers<[1], [0], [0], [1], [0, 0, 1, 1], [], []>} : vector<8x32xf32>, vector<32x32xf32>, vector<8x32xf32> -> vector<8x32xf32>
    %355 = vector.broadcast %338 : vector<1x32xf32> to vector<8x32xf32>
    %356 = arith.addf %354, %355 : vector<8x32xf32>
    %357 = vector.shape_cast %350 : vector<1x32xf32> to vector<1x4x8xf32>
    %358 = vector.shape_cast %353 : vector<8x32xf32> to vector<8x4x8xf32>
    %359 = vector.shape_cast %356 : vector<8x32xf32> to vector<8x4x8xf32>
    "tpu.trace_start"() <{level = 10 : i32, message = "qhd,khd->hqk"}> : () -> ()
    %cst_161 = arith.constant dense<0.000000e+00> : vector<4x1x8xf32>
    %360 = tpu.matmul %357, %358, %cst_161 {dimension_numbers = #tpu.dot_dimension_numbers<[2], [2], [0], [0], [0, 1, 0, 0, 1, 0], [1], [1]>} : vector<1x4x8xf32>, vector<8x4x8xf32>, vector<4x1x8xf32> -> vector<4x1x8xf32>
    "tpu.trace_stop"() : () -> ()
    %cst_162 = arith.constant 0.353553385 : f32
    %361 = vector.broadcast %cst_162 : f32 to vector<4x1x8xf32>
    %362 = arith.mulf %360, %361 : vector<4x1x8xf32>
    %cst_163 = arith.constant dense<0xFF800000> : vector<4x1xf32>
    %363 = vector.multi_reduction <maximumf>, %362, %cst_163 [2] : vector<4x1x8xf32> to vector<4x1xf32>
    %364 = vector.shape_cast %363 : vector<4x1xf32> to vector<4x1x1xf32>
    %365 = vector.broadcast %364 : vector<4x1x1xf32> to vector<4x1x8xf32>
    %366 = arith.subf %362, %365 : vector<4x1x8xf32>
    %367 = math.exp %366 : vector<4x1x8xf32>
    %cst_164 = arith.constant dense<0.000000e+00> : vector<4x1xf32>
    %368 = vector.multi_reduction <add>, %367, %cst_164 [2] : vector<4x1x8xf32> to vector<4x1xf32>
    %369 = vector.shape_cast %368 : vector<4x1xf32> to vector<4x1x1xf32>
    %370 = tpu.reciprocal %369 {approx = true} : vector<4x1x1xf32> -> vector<4x1x1xf32>
    %371 = vector.broadcast %370 : vector<4x1x1xf32> to vector<4x1x8xf32>
    %372 = arith.mulf %367, %371 : vector<4x1x8xf32>
    "tpu.trace_start"() <{level = 10 : i32, message = "hqk,khd->qhd"}> : () -> ()
    %cst_165 = arith.constant dense<0.000000e+00> : vector<4x8x1xf32>
    %373 = tpu.matmul %359, %372, %cst_165 {dimension_numbers = #tpu.dot_dimension_numbers<[0], [2], [2], [1], [0, 1, 0, 2, 1, 1], [1], [0]>} : vector<8x4x8xf32>, vector<4x1x8xf32>, vector<4x8x1xf32> -> vector<4x8x1xf32>
    %374 = tpu.transpose %373, [2, 0, 1] : vector<4x8x1xf32> -> vector<1x4x8xf32>
    "tpu.trace_stop"() : () -> ()
    %375 = vector.shape_cast %374 : vector<1x4x8xf32> to vector<1x32xf32>
    %cst_166 = arith.constant dense<0.000000e+00> : vector<1x32xf32>
    %376 = tpu.matmul %375, %339, %cst_166 {dimension_numbers = #tpu.dot_dimension_numbers<[1], [0], [0], [1], [0, 0, 1, 1], [], []>} : vector<1x32xf32>, vector<32x32xf32>, vector<1x32xf32> -> vector<1x32xf32>
    %377 = arith.addf %376, %340 : vector<1x32xf32>
    %378 = arith.addf %332, %377 : vector<1x32xf32>
    %cst_167 = arith.constant dense<0.000000e+00> : vector<1xf32>
    %379 = vector.multi_reduction <add>, %378, %cst_167 [1] : vector<1x32xf32> to vector<1xf32>
    %380 = vector.shape_cast %379 : vector<1xf32> to vector<1x1xf32>
    %cst_168 = arith.constant 3.200000e+01 : f32
    %381 = vector.broadcast %cst_168 : f32 to vector<1x1xf32>
    %382 = arith.divf %380, %381 : vector<1x1xf32>
    %383 = vector.broadcast %382 : vector<1x1xf32> to vector<1x32xf32>
    %384 = arith.subf %378, %383 : vector<1x32xf32>
    %385 = arith.mulf %384, %384 : vector<1x32xf32>
    %cst_169 = arith.constant dense<0.000000e+00> : vector<1xf32>
    %386 = vector.multi_reduction <add>, %385, %cst_169 [1] : vector<1x32xf32> to vector<1xf32>
    %387 = vector.shape_cast %386 : vector<1xf32> to vector<1x1xf32>
    %cst_170 = arith.constant 3.200000e+01 : f32
    %388 = vector.broadcast %cst_170 : f32 to vector<1x1xf32>
    %389 = arith.divf %387, %388 : vector<1x1xf32>
    %390 = vector.broadcast %382 : vector<1x1xf32> to vector<1x32xf32>
    %391 = arith.subf %378, %390 : vector<1x32xf32>
    %cst_171 = arith.constant 9.99999974E-6 : f32
    %392 = vector.broadcast %cst_171 : f32 to vector<1x1xf32>
    %393 = arith.addf %389, %392 : vector<1x1xf32>
    %394 = math.rsqrt %393 : vector<1x1xf32>
    %395 = vector.broadcast %394 : vector<1x1xf32> to vector<1x32xf32>
    %396 = arith.mulf %391, %395 : vector<1x32xf32>
    %397 = arith.mulf %396, %341 : vector<1x32xf32>
    %398 = arith.addf %397, %342 : vector<1x32xf32>
    %cst_172 = arith.constant dense<0.000000e+00> : vector<1x32xf32>
    %399 = tpu.matmul %398, %343, %cst_172 {dimension_numbers = #tpu.dot_dimension_numbers<[1], [0], [0], [1], [0, 0, 1, 1], [], []>} : vector<1x32xf32>, vector<32x32xf32>, vector<1x32xf32> -> vector<1x32xf32>
    %400 = arith.addf %399, %344 : vector<1x32xf32>
    %cst_173 = arith.constant 0.000000e+00 : f32
    %401 = vector.broadcast %cst_173 : f32 to vector<1x32xf32>
    %402 = arith.maximumf %400, %401 : vector<1x32xf32>
    %cst_174 = arith.constant dense<0.000000e+00> : vector<1x32xf32>
    %403 = tpu.matmul %402, %345, %cst_174 {dimension_numbers = #tpu.dot_dimension_numbers<[1], [0], [0], [1], [0, 0, 1, 1], [], []>} : vector<1x32xf32>, vector<32x32xf32>, vector<1x32xf32> -> vector<1x32xf32>
    %404 = arith.addf %403, %346 : vector<1x32xf32>
    %405 = arith.addf %398, %404 : vector<1x32xf32>
    %cst_175 = arith.constant dense<0.000000e+00> : vector<1xf32>
    %406 = vector.multi_reduction <add>, %405, %cst_175 [1] : vector<1x32xf32> to vector<1xf32>
    %407 = vector.shape_cast %406 : vector<1xf32> to vector<1x1xf32>
    %cst_176 = arith.constant 3.200000e+01 : f32
    %408 = vector.broadcast %cst_176 : f32 to vector<1x1xf32>
    %409 = arith.divf %407, %408 : vector<1x1xf32>
    %410 = vector.broadcast %409 : vector<1x1xf32> to vector<1x32xf32>
    %411 = arith.subf %405, %410 : vector<1x32xf32>
    %412 = arith.mulf %411, %411 : vector<1x32xf32>
    %cst_177 = arith.constant dense<0.000000e+00> : vector<1xf32>
    %413 = vector.multi_reduction <add>, %412, %cst_177 [1] : vector<1x32xf32> to vector<1xf32>
    %414 = vector.shape_cast %413 : vector<1xf32> to vector<1x1xf32>
    %cst_178 = arith.constant 3.200000e+01 : f32
    %415 = vector.broadcast %cst_178 : f32 to vector<1x1xf32>
    %416 = arith.divf %414, %415 : vector<1x1xf32>
    %417 = vector.broadcast %409 : vector<1x1xf32> to vector<1x32xf32>
    %418 = arith.subf %405, %417 : vector<1x32xf32>
    %cst_179 = arith.constant 9.99999974E-6 : f32
    %419 = vector.broadcast %cst_179 : f32 to vector<1x1xf32>
    %420 = arith.addf %416, %419 : vector<1x1xf32>
    %421 = math.rsqrt %420 : vector<1x1xf32>
    %422 = vector.broadcast %421 : vector<1x1xf32> to vector<1x32xf32>
    %423 = arith.mulf %418, %422 : vector<1x32xf32>
    %424 = arith.mulf %423, %347 : vector<1x32xf32>
    %425 = arith.addf %424, %348 : vector<1x32xf32>
    %c928 = arith.constant 928 : index
    %c0_180 = arith.constant 0 : index
    %426 = vector.load %arg3[%c928, %c0_180] : memref<992x128xf32, #tpu.memory_space<vmem>>, vector<32x32xf32>
    %c46 = arith.constant 46 : index
    %c0_181 = arith.constant 0 : index
    %427 = vector.load %arg4[%c46, %c0_181] : memref<48x128xf32, #tpu.memory_space<vmem>>, vector<1x32xf32>
    %cst_182 = arith.constant dense<0.000000e+00> : vector<1x32xf32>
    %428 = tpu.matmul %425, %426, %cst_182 {dimension_numbers = #tpu.dot_dimension_numbers<[1], [0], [0], [1], [0, 0, 1, 1], [], []>} : vector<1x32xf32>, vector<32x32xf32>, vector<1x32xf32> -> vector<1x32xf32>
    %429 = arith.addf %428, %427 : vector<1x32xf32>
    %cst_183 = arith.constant 0.000000e+00 : f32
    %430 = vector.broadcast %cst_183 : f32 to vector<1x32xf32>
    %431 = arith.maximumf %429, %430 : vector<1x32xf32>
    %c960 = arith.constant 960 : index
    %c0_184 = arith.constant 0 : index
    %432 = vector.load %arg3[%c960, %c0_184] : memref<992x128xf32, #tpu.memory_space<vmem>>, vector<32x32xf32>
    %c47 = arith.constant 47 : index
    %c0_185 = arith.constant 0 : index
    %433 = vector.load %arg4[%c47, %c0_185] : memref<48x128xf32, #tpu.memory_space<vmem>>, vector<1x32xf32>
    %cst_186 = arith.constant dense<0.000000e+00> : vector<1x32xf32>
    %434 = tpu.matmul %431, %432, %cst_186 {dimension_numbers = #tpu.dot_dimension_numbers<[1], [0], [0], [1], [0, 0, 1, 1], [], []>} : vector<1x32xf32>, vector<32x32xf32>, vector<1x32xf32> -> vector<1x32xf32>
    %435 = arith.addf %434, %433 : vector<1x32xf32>
    %c0_187 = arith.constant 0 : index
    %c0_188 = arith.constant 0 : index
    %c0_189 = arith.constant 0 : index
    %436 = vector.load %arg5[%c0_187, %c0_188, %c0_189] : memref<1x1x32xf32, #tpu.memory_space<vmem>>, vector<1x1x32xf32>
    %437 = vector.shape_cast %436 : vector<1x1x32xf32> to vector<1x32xf32>
    %438 = vector.shape_cast %435 : vector<1x32xf32> to vector<1x1x32xf32>
    tpu.vector_store %arg5[%c0_187, %c0_188, %c0_189], %438 {strides = array<i32>} : memref<1x1x32xf32, #tpu.memory_space<vmem>>, vector<1x1x32xf32>,
    return
  }
  func.func @transform_0(%arg0: i32) -> (i32, i32, i32) {
    %c0_i32 = arith.constant 0 : i32
    %c0_i32_0 = arith.constant 0 : i32
    %c0_i32_1 = arith.constant 0 : i32
    return %arg0, %c0_i32, %c0_i32_0 : i32, i32, i32
  }
  func.func @transform_1(%arg0: i32) -> (i32, i32, i32) {
    %c0_i32 = arith.constant 0 : i32
    %c0_i32_0 = arith.constant 0 : i32
    %c0_i32_1 = arith.constant 0 : i32
    return %arg0, %c0_i32, %c0_i32_0 : i32, i32, i32
  }
  func.func @transform_2(%arg0: i32) -> (i32, i32) {
    %c0_i32 = arith.constant 0 : i32
    %c0_i32_0 = arith.constant 0 : i32
    %c0_i32_1 = arith.constant 0 : i32
    return %c0_i32, %c0_i32_0 : i32, i32
  }
  func.func @transform_3(%arg0: i32) -> (i32, i32) {
    %c0_i32 = arith.constant 0 : i32
    %c0_i32_0 = arith.constant 0 : i32
    %c0_i32_1 = arith.constant 0 : i32
    return %c0_i32, %c0_i32_0 : i32, i32
  }
  func.func @transform_4(%arg0: i32) -> (i32, i32, i32) {
    %c0_i32 = arith.constant 0 : i32
    %c0_i32_0 = arith.constant 0 : i32
    %c0_i32_1 = arith.constant 0 : i32
    return %arg0, %c0_i32, %c0_i32_0 : i32, i32, i32
  }
}

</mosaic_0001>

<bundles_post_ra>
// kernel: tpu_custom_call.1
= control target key start
LH: loop header
LB: loop body
LE: loop exit
PB: predicated region body
PF: predicated region fallthrough
CT: control target
= control target key end

     0   :  { %s5423_s0 = inlined_call_operand.hbm [shape: f32[2,8,16], index: 0, kind: input, shape index: {}]   ;;  %s5424_s1 = inlined_call_operand.hbm [shape: f32[2,1,16], index: 1, kind: input, shape index: {}]   ;;  %s5425_s2 = inlined_call_operand.hbm [shape: f32[992,128], index: 2, kind: input, shape index: {}]   ;;  %s5426_s3 = inlined_call_operand.hbm [shape: f32[48,128], index: 3, kind: input, shape index: {}]   ;;  %s5427_s4 = inlined_call_operand.hbm [shape: f32[2,1,32], index: 4, kind: output, shape index: {}]  }
   0x1   :  { %5428 = sst [smem:[#allocation16_spill]] %s5425_s2 }
   0x2   :  { %5429 = sst [smem:[#allocation17_spill]] %s5426_s3 }
   0x3   :  { %9 = vsyncpa [#allocation3], 0 }
   0x4   :  { %11 = vsyncpa [#allocation3 + $0x1], 0 }
   0x5   :  { %12 = vsyncpa [#allocation6], 0 }
   0x6   :  { %14 = vsyncpa [#allocation6 + $0x1], 0 }
   0x7   :  { %15 = vsyncpa [#allocation9], 0 }
   0x8   :  { %16 = vsyncpa [#allocation4], 0 }
   0x9   :  { %18 = vsyncpa [#allocation4 + $0x1], 0  ;;  %s4892_s15 = smov 0   ;;  %s4894_s16 = smov 0  }
   0xa   :  { %s4896_s17 = smov 0   ;;  %s4898_s18 = smov 0  }
   0xb LB: > { %s5430_s2 = sld [smem:[#allocation16_spill]]  ;;  %s4916_s22 = sadd.s32 4294967295, %s4852_s18   ;;  %s4852_s18 = sphi %s4898_s18, %s5442_s18   ;;  %s4848_s17 = sphi %s4896_s17, %s5441_s17   ;;  %s4844_s16 = sphi %s4894_s16, %s5440_s16   ;;  %s4840_s15 = sphi %s4892_s15, %s5439_s15  }
   0xc   : > { %p4328_p0 = scmp.ge.s32.totalorder %s4852_s18, 1  ;;  %p45_p1 = scmp.eq.s32.totalorder %s4916_s22, 0 }
   0xd   : > { %p149_p2 = scmp.lt.s32.totalorder %s4852_s18, 3  ;;  %s4854_s24 = smov [#allocation7]  }
   0xe   : > { %s162_s25 = sshll.u32 %s4854_s24, 4  ;;  %s5432_s3 = sld [smem:[#allocation17_spill]]  ;;  %s163_s25 = int_to_ptr.vmem [resolvable:$true] %s162_s25 }
   0xf   : > { %p4921_p3 = pnand %p4328_p0, %p149_p2  ;;  %s4855_s29 = smov [#allocation8]  }
  0x10   : > { %s176_s30 = sshll.u32 %s4855_s29, 4  ;;  %s4856_s5 = smov 128   ;;  %s177_s30 = int_to_ptr.vmem [resolvable:$true] %s176_s30 }
  0x11   : > { %s160_s21 = sshll.u32 %s5430_s2, 4  ;;  %p4418_p4 = pneg %p4921_p3  ;;  %s161_s21 = int_to_ptr.hbm [resolvable:$true] %s160_s21 }
  0x12   : > { %s4857_s6 = smov 8   ;;  %s4327_s7 = sadd.s32 4294967294, %s4852_s18  }
  0x13   : > { %p4419_p6 = pnand %p4418_p4, %p45_p1  ;;  %s4935_s8 = sadd.s32 1, %s4852_s18  }
  0x14   : > { %s174_s28 = sshll.u32 %s5432_s3, 4  ;;  %s28_s9 = ssub.s32 %s4852_s18, %s4935_s8  ;;  %s175_s28 = int_to_ptr.hbm [resolvable:$true] %s174_s28 }
  0x15   : > { %4421 = dma.hbm_to_vmem [thread:$0]  (!%p4419_p6), %s161_s21, 15872, %s163_s25, [#allocation6], %s4856_s5, %s4856_s5, %s4857_s6  }
  0x16   : > { %4424 = dma.hbm_to_vmem [thread:$0]  (!%p4419_p6), %s175_s28, 768, %s177_s30, [#allocation9], %s4856_s5, %s4856_s5, %s4857_s6  }
  0x17   : > { %s31_s10 = sadd.s32 1, %s4848_s17  ;;  %p29_p7 = scmp.eq.s32.totalorder %s28_s9, 0 }
  0x18   : > { %p38_p8 = scmp.ne.s32.totalorder %s4848_s17, %s4844_s16  ;;  %p39_p9 = scmp.eq.s32.totalorder %s4852_s18, 0 }
  0x19   : > { %p44_p10 = scmp.ne.s32.totalorder %s4844_s16, %s4840_s15  ;;  %p136_p13 = scmp.eq.s32.totalorder %s4916_s22, 1 }
  0x1a   : > { %s4946_s11 = scalar_select %p29_p7, %s4848_s17, %s31_s10  }
  0x1b   : > { %p4948_p11 = por %p39_p9, %p38_p8  ;;  %p4954_p12 = por %p45_p1, %p44_p10 }
  0x1c   : > { %p142_p0 = scmp.eq.s32.totalorder %s4327_s7, 1  ;;  %p4438_p2 = scmp.lt.s32.totalorder %s4852_s18, 2 }
  0x1d   : > { %s4961_s14 = sand.u32 1, %s4848_s17   ;;  %p4963_p4 = por %p136_p13, %p38_p8 }
  0x1e   : > { %p4967_p6 = por %p142_p0, %p44_p10  ;;  %s4332_s21 = sshll.u32 %s4961_s14, 3 }
  0x1f   : > { %s4333_s24 = sshll.u32 %s4852_s18, 3  ;;  %s194_s28 = scalar_lea.vmem [#allocation2], %s4332_s21 }
  0x20   : > { %s198_s27 = scalar_lea.hbm %s5423_s0, %s4333_s24  ;;  %s202_s29 = sshll.u32 %s194_s28, 4  ;;  %s203_s29 = int_to_ptr.vmem [resolvable:$true] %s202_s29 }
  0x21   : > { %s200_s30 = sshll.u32 %s198_s27, 4  ;;  %p4978_p7 = pnand %p4438_p2, %p4948_p11  ;;  %s201_s30 = int_to_ptr.hbm [resolvable:$true] %s200_s30 }
  0x22   : > { %s209_s6 = sand.u32 1, %s4852_s18   ;;  %s191_s7 = scalar_lea.sflag [#allocation3], %s4961_s14 }
  0x23   : > { %s4714_s9 = sshra.s32 %s201_s30, 4  ;;  %p4718_p9 = pneg %p4978_p7  ;;  %s4715_s9 = int_to_ptr.hbm [resolvable:$true] %s4714_s9 }
  0x24   : > { %s4716_s10 = scalar_lea.hbm %s4715_s9, 8  ;;  %s4721_s24 = scalar_lea.hbm %s5423_s0, 16 }
  0x25   : > { %p4717_p8 = scmp.ne.s32.totalorder %s4715_s9, %s4716_s10  ;;  %p4722_p11 = scmp.lt.s32.totalorder %s4715_s9, %s5423_s0 }
  0x26   : > { %p4723_p0 = scmp.lt.s32.totalorder %s4721_s24, %s4716_s10 }
  0x27   : > { %p4719_p10 = pnand %p4718_p9, %p4717_p8 }
  0x28   : > { %p4724_p2 = por %p4723_p0, %p4722_p11 }
  0x29   : > { %p4720_p13 = pneg %p4719_p10 }
  0x2b   : > { %p4725_p5 = pnand %p4724_p2, %p4720_p13 }
  0x2d   : > { %4728 = shalt.err (!%p4725_p5)
}
  0x2e   : > { %4428 = dma.hbm_to_vmem [thread:$0]  (!%p4978_p7), %s201_s30, 128, %s203_s29, %s191_s7  }
  0x2f   : > { %s215_s2 = scalar_lea.hbm %s5424_s1, %s4852_s18  ;;  %s212_s21 = scalar_lea.vmem [#allocation5], %s4961_s14 }
  0x30   : > { %s219_s12 = sshll.u32 %s212_s21, 4  ;;  %s217_s3 = sshll.u32 %s215_s2, 4  ;;  %s220_s12 = int_to_ptr.vmem [resolvable:$true] %s219_s12  ;;  %s218_s3 = int_to_ptr.hbm [resolvable:$true] %s217_s3 }
  0x31   : > { %s210_s9 = scalar_lea.sflag [#allocation6], %s209_s6  ;;  %s4744_s10 = sshra.s32 %s218_s3, 4  ;;  %s4745_s10 = int_to_ptr.hbm [resolvable:$true] %s4744_s10 }
  0x32   : > { %s4746_s24 = scalar_lea.hbm %s4745_s10, 1  ;;  %s4751_s30 = scalar_lea.hbm %s5424_s1, 2 }
  0x33   : > { %p4747_p5 = scmp.ne.s32.totalorder %s4745_s10, %s4746_s24  ;;  %p4752_p13 = scmp.lt.s32.totalorder %s4745_s10, %s5424_s1 }
  0x34   : > { %p4753_p11 = scmp.lt.s32.totalorder %s4751_s30, %s4746_s24 }
  0x35   : > { %p4749_p8 = pnand %p4747_p5, %p4718_p9 }
  0x36   : > { %p4754_p0 = por %p4753_p11, %p4752_p13 }
  0x37   : > { %p4750_p10 = pneg %p4749_p8 }
  0x39   : > { %p4755_p2 = pnand %p4754_p0, %p4750_p10 }
  0x3b   : > { %4758 = shalt.err (!%p4755_p2)
}
  0x3c   : > { %4431 = dma.hbm_to_vmem [thread:$0]  (!%p4978_p7), %s218_s3, 16, %s220_s12, %s210_s9  }
  0x3d   : > { %228 = sbr.rel (%p4921_p3) target bundleno = 10009 (0x2719), region = 36  ;;  %s5016_s2 = sand.u32 (!%p4921_p3), 1, %s4844_s16  }
  0x3e   : > { %s4335_s14 = sshll.u32 (!%p4921_p3), %s5016_s2, 3  ;;  %s231_s6 = scalar_lea.sflag (!%p4921_p3), [#allocation3], %s5016_s2 }
  0x3f   : > { %s234_s27 = scalar_lea.vmem (!%p4921_p3), [#allocation2], %s4335_s14 }
  0x42   : > { %4819 = dma.done.wait (%p4954_p12), %s231_s6, 128  }
  0x43   : > { %4821 = vsyncadd (%p4954_p12), %s231_s6, 4294967168  ;;  %s240_s3 = sand.u32 1, %s4916_s22   ;;  %s243_s5 = scalar_lea.vmem [#allocation5], %s5016_s2 }
  0x44   : > { %s241_s23 = scalar_lea.sflag [#allocation6], %s240_s3 }
  0x45   : > { %4823 = dma.done.wait (%p4954_p12), %s241_s23, 16  }
  0x46   : > { %4825 = vsyncadd (%p4954_p12), %s241_s23, 4294967280 }
  0x47   : > { %4827 = dma.done.wait (%p45_p1), [#allocation6], 15872  }
  0x48   : > { %4829 = vsyncadd (%p45_p1), [#allocation6], 4294951424 }
  0x49   : > { %4831 = dma.done.wait (%p45_p1), [#allocation9], 768  }
  0x4a   : > { %4833 = vsyncadd (%p45_p1), [#allocation9], 4294966528  ;;  %v284_v0 = vld [vmem:[#allocation7 + $0x8] sm:$0xff]  ;;  %v283_v1 = vld [vmem:[#allocation7] sm:$0xff]  ;;  %vm287_vm0 = vcmask 130048   ;;  %vm318_vm1 = vcmask 261120   ;;  %s4219_s29 = scalar_lea.hbm %s5427_s4, %s4916_s22 }
  0x4b   : > { %305 = vmatpush.msra.mxu0 %v284_v0  ;;  %v282_v2 = vld [vmem:[%s234_s27] sm:$0xff]  ;;  %v314_v4 = vld [vmem:[#allocation7 + $0x20] sm:$0xff]  ;;  %s4858_s13 = smov 104   ;;  %s4859_s28 = smov 112   ;;  %vm653_vm2 = vcmask 64512   ;;  %vm1151_vm3 = vcmask 1047556  }
  0x4c   : > { %v315_v3 = vld [vmem:[#allocation7 + $0x28] sm:$0xff]  ;;  %v313_v5 = vld [vmem:[#allocation7 + $0x18] sm:$0xff]  ;;  %v312_v6 = vld [vmem:[#allocation7 + $0x10] sm:$0xff]  ;;  %s4860_s21 = smov 120   ;;  %s4863_s12 = smov 16   ;;  %vm1275_vm4 = vcmask 195584  }
  0x4d   : > { %334 = vmatpush.msra.mxu1 %v315_v3  ;;  %306 = vmatpush.msra.mxu0 %v283_v1  ;;  %v344_v7 = vld [vmem:[#allocation7 + $0x38] sm:$0xff]  ;;  %v343_v8 = vld [vmem:[#allocation7 + $0x30] sm:$0xff]  ;;  %v342_v9 = vld [vmem:[%s243_s5] sm:$0x1]  ;;  %s4864_s9 = smov 24   ;;  %s4865_s10 = smov 8  }
  0x4e   : > { %4338 = vmatmul.msk.f32.vlgmr.msra.gmra.mxu0 %vm287_vm0, %v282_v2  ;;  %363 = vmatpush.msra.mxu2 %v344_v7  ;;  %v401_v10 = vld [vmem:[#allocation7 + $0x78] sm:$0xff]  ;;  %v400_v13 = vld [vmem:[#allocation7 + $0x70] sm:$0xff]  ;;  %v4544_v16 = vld [vmem:[#allocation8] ss:$0 sm:$0xff]  ;;  %s281_s30 = scalar_lea.vmem [#allocation10], %s5016_s2  ;;  %s4223_s26 = sshll.u32 %s4219_s29, 4  ;;  %s4224_s26 = int_to_ptr.hbm [resolvable:$true] %s4223_s26 }
  0x4f   : > { %335 = vmatpush.msra.mxu1 %v314_v4  ;;  %v411_v11 = vld [vmem:[#allocation7 + $0xb8] sm:$0xff]  ;;  %448 = vmatpush.msrb.mxu0 %v401_v10  ;;  %v410_v14 = vld [vmem:[#allocation7 + $0xb0] sm:$0xff]  ;;  %v399_v20 = vld [vmem:[#allocation7 + $0x68] sm:$0xff]  ;;  %s4221_s7 = sshll.u32 %s281_s30, 4  ;;  %s4211_s14 = scalar_lea.sflag [#allocation4], %s5016_s2  ;;  %s4222_s7 = int_to_ptr.vmem [resolvable:$true] %s4221_s7 }
  0x50   : > { %v406_v12 = vld [vmem:[#allocation7 + $0x98] sm:$0xff]  ;;  %364 = vmatpush.msra.mxu2 %v343_v8  ;;  %v405_v15 = vld [vmem:[#allocation7 + $0x90] sm:$0xff]  ;;  %v404_v21 = vld [vmem:[#allocation7 + $0x88] sm:$0xff]  ;;  %s4788_s6 = sshra.s32 %s4224_s26, 4  ;;  %s4794_s23 = scalar_lea.hbm %s5427_s4, 2  ;;  %s4789_s6 = int_to_ptr.hbm [resolvable:$true] %s4788_s6 }
  0x51   : > { %336 = vmatpush.msra.mxu1 %v313_v5  ;;  %4340 = vmatmul.msk.f32.vlgmr.msra.gmra.mxu2 %vm287_vm0, %v342_v9  ;;  %v409_v22 = vld [vmem:[#allocation7 + $0xa8] sm:$0xff]  ;;  %v398_v23 = vld [vmem:[#allocation7 + $0x60] sm:$0xff]  ;;  %v373_v26 = vld [vmem:[#allocation7 + $0x58] sm:$0xff]  ;;  %s4790_s27 = scalar_lea.hbm %s4789_s6, 1  ;;  %p4795_p7 = scmp.lt.s32.totalorder %s4789_s6, %s5427_s4 }
  0x52   : > { %449 = vmatpush.msrb.mxu0 %v400_v13  ;;  %469 = vmatpush.msrb.mxu2 %v406_v12  ;;  %v403_v24 = vld [vmem:[#allocation7 + $0x80] sm:$0xff]  ;;  %v372_v27 = vld [vmem:[#allocation7 + $0x50] sm:$0xff]  ;;  %v371_v28 = vld [vmem:[#allocation7 + $0x48] sm:$0xff]  ;;  %p4791_p1 = scmp.ne.s32.totalorder %s4789_s6, %s4790_s27  ;;  %p4796_p9 = scmp.lt.s32.totalorder %s4794_s23, %s4790_s27 }
  0x53   : > { %337 = vmatpush.msra.mxu1 %v312_v6  ;;  %v408_v25 = vld [vmem:[#allocation7 + $0xa0] sm:$0xff]  ;;  %390 = vmatpush.msra.mxu3 %v373_v26 }
  0x54   : > { %470 = vmatpush.msrb.mxu2 %v405_v15  ;;  %450 = vmatpush.msrb.mxu0 %v399_v20  ;;  %v4545_v29 = vld [vmem:[#allocation8 + $0x1] ss:$0 sm:$0xff]  ;;  %v345_v32 = vld [vmem:[#allocation8 + $0x2] sm:$0x1]  ;;  %v4546_v37 = vld [vmem:[#allocation8 + $0x4] ss:$0 sm:$0xff]  ;;  %p4792_p3 = pnand %p4791_p1, %p4963_p4  ;;  %p4797_p5 = por %p4796_p9, %p4795_p7 }
  0x55   : > { %490 = vmatpush.msrb.mxu1 %v411_v11  ;;  %391 = vmatpush.msra.mxu3 %v372_v27  ;;  %v370_v36 = vld [vmem:[#allocation7 + $0x40] sm:$0xff] }
  0x56   : > { %471 = vmatpush.msrb.mxu2 %v404_v21  ;;  %451 = vmatpush.msrb.mxu0 %v398_v23  ;;  %v4548_v40 = vld [vmem:[#allocation8 + $0x5] ss:$0 sm:$0xff]  ;;  %v4547_v43 = vld [vmem:[#allocation8 + $0x6] ss:$0 sm:$0xff]  ;;  %p4793_p12 = pneg %p4792_p3 }
  0x57   : > { %491 = vmatpush.msrb.mxu1 %v410_v14  ;;  %392 = vmatpush.msra.mxu3 %v371_v28 }
  0x58   : > { %472 = vmatpush.msrb.mxu2 %v403_v24  ;;  %p4798_p8 = pnand %p4797_p5, %p4793_p12 }
  0x59   : > { %492 = vmatpush.msrb.mxu1 %v409_v22  ;;  %393 = vmatpush.msra.mxu3 %v370_v36 }
  0x5b   : > { %493 = vmatpush.msrb.mxu1 %v408_v25 }
  0xcb   : > { %v308_v17 = vpop.f32.mrf.mxu0 }
  0xcc   : > { %v309_v18 = vadd.f32 %v4544_v16, %v308_v17 }
  0xce   : > { %v311_v19 = vmax.f32 %v309_v18, 0.0 }
  0xd0   : > { %4339 = vmatmul.msk.f32.vlgmr.msra.gmra.mxu1 %vm318_vm1, %v311_v19 }
  0xd4   : > { %v366_v33 = vpop.f32.mrf.mxu2 }
  0xd5   : > { %v367_v34 = vadd.f32 %v366_v33, %v345_v32 }
  0xd7   : > { %v369_v35 = vmax.f32 %v367_v34, 0.0 }
  0xd9   : > { %4341 = vmatmul.msk.f32.vlgmr.msra.gmra.mxu3 %vm318_vm1, %v369_v35 }
 0x14d   : > { %v339_v30 = vpop.f32.mrf.mxu1 }
 0x14e   : > { %v5041_v31 = vadd.f32 %v4545_v29, %v339_v30 }
 0x150   : > { %4342 = vmatmul.msk.f32.vlgmr.msrb.gmra.mxu0 %vm318_vm1, %v5041_v31  ;;  %4343 = vmatmul.msk.f32.vlgmr.msrb.gmra.mxu2 %vm318_vm1, %v5041_v31 }
 0x151   : > { %4344 = vmatmul.msk.f32.vlgmr.msrb.gmra.mxu1 %vm318_vm1, %v5041_v31 }
 0x15c   : > { %v5062_v60 = vpop.f32.mrf.mxu3 }
 0x1cd   : > { %v453_v38 = vpop.f32.mrf.mxu0 }
 0x1ce   : > { %v454_v39 = vadd.f32 %v4546_v37, %v453_v38  ;;  %v495_v44 = vpop.f32.mrf.mxu1 }
 0x1cf   : > { %v496_v45 = vadd.f32 %v4547_v43, %v495_v44 }
 0x1d0   : > { %503 = vrot.lane.b32.xlu2 %v454_v39, %s4858_s13  ;;  %501 = vrot.lane.b32.xlu1 %v454_v39, %s4859_s28 }
 0x1d3   : > { %v474_v41 = vpop.f32.mrf.mxu2 }
 0x1d4   : > { %v475_v42 = vadd.f32 %v4548_v40, %v474_v41 }
 0x1d6   : > { %509 = vrot.lane.b32.xlu0 %v475_v42, %s4859_s28 }
 0x1d8   : > { %499 = vrot.lane.b32.xlu2 %v454_v39, %s4860_s21  ;;  %506 = vrot.lane.b32.xlu1 %v475_v42, %s4860_s21 }
 0x1de   : > { %512 = vrot.lane.b32.xlu0 %v475_v42, %s4858_s13 }
 0x1e0   : > { %522 = vrot.lane.b32.xlu2 %v496_v45, %s4858_s13 }
 0x22a   : > { %v504_v53 = vpop.permute.xlu2 %503 }
 0x232   : > { %v500_v59 = vpop.permute.xlu2 %499 }
 0x23a   : > { %v523_v9 = vpop.permute.xlu2 %522 }
 0x242   : > { %v502_v46 = vpop.permute.xlu1 %501 }
 0x248   : > { %v510_v47 = vpop.permute.xlu0 %509 }
 0x249   : > { %v4488_v48 = vpack.i.bf16 %v475_v42, %v510_v47 }
 0x24a   : > { %v507_v49 = vpop.permute.xlu1 %506 }
 0x24b   : > { %4489 = vxpose.xlu0.b32.start.end [1/1] (short) (narrow) %v4488_v48, 8 }
 0x250   : > { %v513_v50 = vpop.permute.xlu0 %512 }
 0x251   : > { %v4495_v51 = vpack.i.bf16 %v507_v49, %v513_v50 }
 0x253   : > { %4496 = vxpose.xlu1.b32.start.end [1/1] (short) (narrow) %v4495_v51, 8 }
 0x2ad   : > { %519 = vrot.lane.b32.xlu1 %v496_v45, %s4859_s28 }
 0x2ef   : > { %v4490_v52 = vpop.trf.xlu0 }
 0x2f0   : > { %v4491_v54 = vunpack.i.l.bf16 %v4490_v52  ;;  %v4494_v55 = vunpack.i.h.bf16 %v4490_v52 }
 0x2f2   : > { %671 = vmatpush.msrb.mxu3 %v4494_v55  ;;  %715 = vmatpush.msra.mxu2 %v4491_v54  ;;  %v4861_v55 = vmov 1983009808  }
 0x2f3   : > { %4345 = vmatmul.msk.f32.vlgmr.msrb.gmra.mxu3 %vm653_vm2, %v454_v39  ;;  %4347 = vmatmul.msk.f32.vlgmr.msra.gmra.mxu2 %vm653_vm2, %v502_v46 }
 0x2f7   : > { %v4497_v56 = vpop.trf.xlu1 }
 0x2f8   : > { %v4501_v57 = vunpack.i.h.bf16 %v4497_v56  ;;  %v4498_v58 = vunpack.i.l.bf16 %v4497_v56  ;;  %v1156_v56 = vunpack.c.l.s4 %v4861_v55 }
 0x2fa   : > { %693 = vmatpush.msra.mxu0 %v4501_v57  ;;  %737 = vmatpush.msra.mxu1 %v4498_v58 }
 0x2fb   : > { %4346 = vmatmul.msk.f32.vlgmr.msra.gmra.mxu0 %vm653_vm2, %v500_v59  ;;  %4348 = vmatmul.msk.f32.vlgmr.msra.gmra.mxu1 %vm653_vm2, %v504_v53 }
 0x31f   : > { %v520_v30 = vpop.permute.xlu1 %519 }
 0x376   : > { %v673_v61 = vpop.f32.mrf.mxu3  ;;  %v717_v6 = vpop.f32.mrf.mxu2 }
 0x377   : > { %v742_v62 = vmul.f32 0.35355338, %v673_v61  ;;  %v744_v7 = vmul.f32 0.35355338, %v717_v6  ;;  %v5081_v61 = vunpack.c.0.s8 %v1156_v56 }
 0x378   : > { %v739_v63 = vpop.f32.mrf.mxu1  ;;  %v695_v3 = vpop.f32.mrf.mxu0 }
 0x379   : > { %v745_v0 = vmul.f32 0.35355338, %v739_v63  ;;  %v746_v1 = vsel %vm653_vm2, %v742_v62, -inf  ;;  %v743_v4 = vmul.f32 0.35355338, %v695_v3  ;;  %v752_v8 = vsel %vm653_vm2, %v744_v7, -inf }
 0x37a   : > { %747 = vmax.xlane.f32.xlu0 %v746_v1 }
 0x37b   : > { %v755_v2 = vsel %vm653_vm2, %v745_v0, -inf  ;;  %v749_v5 = vsel %vm653_vm2, %v743_v4, -inf }
 0x37c   : > { %756 = vmax.xlane.f32.xlu2 %v755_v2 }
 0x384   : > { %750 = vmax.xlane.f32.xlu2 %v749_v5 }
 0x38c   : > { %753 = vmax.xlane.f32.xlu2 %v752_v8 }
 0x3a3   : > { %790 = vxpose.xlu0.b32.start.end [1/1] (short) (narrow) %v496_v45, 8 }
 0x3a4   : > { %516 = vrot.lane.b32.xlu2 %v496_v45, %s4860_s21 }
 0x3ed   : > { %v748_v10 = vpop.xlane.xlu0 %747 }
 0x3ee   : > { %v758_v11 = vsub.f32 %v742_v62, %v748_v10 }
 0x3ef   : > { %v757_v12 = vpop.xlane.xlu2 %756 }
 0x3f0   : > { %v762_v13 = vmul.f32 1.442695, %v758_v11  ;;  %v761_v14 = vsub.f32 %v745_v0, %v757_v12  ;;  %v4862_v0 = vmov 1934713408  }
 0x3f1   : > { %v1180_v1 = vunpack.c.l.s4 %v4862_v0 }
 0x3f2   : > { %4572 = vpow2.f32 %v762_v13  ;;  %v768_v15 = vmul.f32 1.442695, %v761_v14 }
 0x3f3   : > { %v5087_v6 = vunpack.c.0.s8 %v1180_v1  ;;  %v416_v1 = vld [vmem:[#allocation7 + $0xd8] sm:$0xff] }
 0x3f4   : > { %4574 = vpow2.f32 %v768_v15 }
 0x3f7   : > { %v751_v16 = vpop.xlane.xlu2 %750 }
 0x3f8   : > { %v4573_v17 = vpop.eup %4572  ;;  %v759_v18 = vsub.f32 %v743_v4, %v751_v16 }
 0x3f9   : > { %v770_v19 = vsel %vm653_vm2, %v4573_v17, 0.0 }
 0x3fa   : > { %v764_v20 = vmul.f32 1.442695, %v759_v18  ;;  %771 = vadd.xlane.f32.xlu2 %v770_v19  ;;  %v4575_v21 = vpop.eup %4574 }
 0x3fb   : > { %v779_v24 = vsel %vm653_vm2, %v4575_v21, 0.0 }
 0x3fc   : > { %4576 = vpow2.f32 %v764_v20 }
 0x3ff   : > { %v754_v22 = vpop.xlane.xlu2 %753 }
 0x400   : > { %v760_v23 = vsub.f32 %v744_v7, %v754_v22 }
 0x402   : > { %v4577_v25 = vpop.eup %4576  ;;  %v766_v26 = vmul.f32 1.442695, %v760_v23  ;;  %780 = vadd.xlane.f32.xlu2 %v779_v24 }
 0x403   : > { %v773_v27 = vsel %vm653_vm2, %v4577_v25, 0.0 }
 0x404   : > { %4578 = vpow2.f32 %v766_v26  ;;  %774 = vadd.xlane.f32.xlu1 %v773_v27 }
 0x407   : > { %v517_v32 = vpop.permute.xlu2 %516 }
 0x40a   : > { %v4579_v28 = vpop.eup %4578 }
 0x40b   : > { %v776_v29 = vsel %vm653_vm2, %v4579_v28, 0.0 }
 0x40c   : > { %777 = vadd.xlane.f32.xlu2 %v776_v29 }
 0x435   : > { %854 = vxpose.xlu2.b32.start.end [1/1] (short) (narrow) %v520_v30, 8 }
 0x43d   : > { %822 = vxpose.xlu2.b32.start.end [1/1] (short) (narrow) %v517_v32, 8 }
 0x43e   : > { %886 = vxpose.xlu1.b32.start.end [1/1] (short) (narrow) %v523_v9, 8 }
 0x447   : > { %v806_v38 = vpop.trf.xlu0 }
 0x46d   : > { %v772_v33 = vpop.xlane.xlu2 %771 }
 0x46e   : > { %4580 = vrcp.f32 %v772_v33 }
 0x474   : > { %v4581_v34 = vpop.eup %4580 }
 0x475   : > { %v786_v35 = vmul.f32 %v4581_v34, %v4573_v17  ;;  %v781_v36 = vpop.xlane.xlu2 %780 }
 0x476   : > { %4582 = vrcp.f32 %v781_v36 }
 0x477   : > { %v775_v37 = vpop.xlane.xlu1 %774  ;;  %4349 = vmatpush.xpose.msk.msra.mxu3 %vm653_vm2, %v786_v35 }
 0x478   : > { %4584 = vrcp.f32 %v775_v37 }
 0x47a   : > { %4350 = vmatmul.msk.f32.vlgmr.msra.gmra.mxu3 %vm653_vm2, %v806_v38 }
 0x47b   : > { %1293 = vmatpush.msrb.mxu3 %v416_v1 }
 0x47c   : > { %v4583_v39 = vpop.eup %4582 }
 0x47d   : > { %v789_v40 = vmul.f32 %v4583_v39, %v4575_v21 }
 0x47e   : > { %v4585_v41 = vpop.eup %4584 }
 0x47f   : > { %v787_v42 = vmul.f32 %v4585_v41, %v4577_v25  ;;  %4355 = vmatpush.xpose.msk.msrb.mxu1 %vm653_vm2, %v789_v40  ;;  %v778_v43 = vpop.xlane.xlu2 %777 }
 0x480   : > { %4586 = vrcp.f32 %v778_v43 }
 0x481   : > { %4351 = vmatpush.xpose.msk.msrb.mxu0 %vm653_vm2, %v787_v42 }
 0x486   : > { %v4587_v44 = vpop.eup %4586 }
 0x487   : > { %v788_v45 = vmul.f32 %v4587_v44, %v4579_v28 }
 0x489   : > { %4353 = vmatpush.xpose.msk.msrb.mxu2 %vm653_vm2, %v788_v45 }
 0x4ce   : > { %v870_v46 = vpop.trf.xlu2 }
 0x4cf   : > { %4354 = vmatmul.msk.f32.vlgmr.msrb.gmra.mxu2 %vm653_vm2, %v870_v46 }
 0x4d6   : > { %v838_v47 = vpop.trf.xlu2 }
 0x4d7   : > { %4352 = vmatmul.msk.f32.vlgmr.msrb.gmra.mxu0 %vm653_vm2, %v838_v47 }
 0x4e2   : > { %v902_v48 = vpop.trf.xlu1 }
 0x4e3   : > { %4356 = vmatmul.msk.f32.vlgmr.msrb.gmra.mxu1 %vm653_vm2, %v902_v48 }
 0x4fd   : > { %v941_v49 = vpop.f32.mrf.mxu3 }
 0x4fe   : > { %1022 = vxpose.xlu2.b32.start.end [1/1] (short) (narrow) %v941_v49, 8 }
 0x552   : > { %v993_v52 = vpop.f32.mrf.mxu2 }
 0x554   : > { %v967_v50 = vpop.f32.mrf.mxu0 }
 0x555   : > { %1054 = vxpose.xlu2.b32.start.end [1/1] (short) (narrow) %v967_v50, 8 }
 0x560   : > { %v1019_v51 = vpop.f32.mrf.mxu1 }
 0x561   : > { %1118 = vxpose.xlu0.b32.start.end [1/1] (short) (narrow) %v1019_v51, 8 }
 0x569   : > { %1086 = vxpose.xlu0.b32.start.end [1/1] (short) (narrow) %v993_v52, 8 }
 0x597   : > { %v1038_v53 = vpop.trf.xlu2 }
 0x598   : > { %v1153_v3 = vrot.slane %v1038_v53, 4 }
 0x5ee   : > { %v1070_v54 = vpop.trf.xlu2 }
 0x5ef   : > { %v1165_v57 = vrot.slane %v1070_v54, 4 }
 0x605   : > { %v1134_v58 = vpop.trf.xlu0 }
 0x606   : > { %v1163_v59 = vrot.slane %v1134_v58, 4  ;;  %v1166_v62 = vsel %vm1151_vm3, %v1134_v58, %v1165_v57 }
 0x607   : > { %v1174_v2 = vperm.slane %v1166_v62, %v5081_v61 }
 0x608   : > { %v1164_v63 = vsel %vm1151_vm3, %v1163_v59, %v1070_v54 }
 0x609   : > { %v1170_v4 = vperm.slane %v1164_v63, %v5081_v61  ;;  %v1187_v9 = vrot.slane %v1174_v2, 4 }
 0x60b   : > { %v1175_v12 = vrot.slane %v1170_v4, 4 }
 0x60d   : > { %v1102_v5 = vpop.trf.xlu0 }
 0x60e   : > { %v1150_v7 = vrot.slane %v1102_v5, 4  ;;  %v1154_v8 = vsel %vm1151_vm3, %v1102_v5, %v1153_v3  ;;  %v414_v3 = vld [vmem:[#allocation7 + $0xc8] sm:$0xff] }
 0x60f   : > { %v1162_v10 = vperm.slane %v1154_v8, %v5081_v61 }
 0x610   : > { %v1152_v11 = vsel %vm1151_vm3, %v1150_v7, %v1038_v53 }
 0x611   : > { %v1158_v13 = vperm.slane %v1152_v11, %v5081_v61  ;;  %v1188_v14 = vsel %vm1151_vm3, %v1187_v9, %v1162_v10  ;;  %v1189_v15 = vrot.slane %v1162_v10, 4 }
 0x612   : > { %v1194_v16 = vperm.slane %v1188_v14, %v5087_v6 }
 0x613   : > { %v1176_v17 = vsel %vm1151_vm3, %v1175_v12, %v1158_v13  ;;  %v1177_v18 = vrot.slane %v1158_v13, 4  ;;  %v1190_v19 = vsel %vm1151_vm3, %v1174_v2, %v1189_v15  ;;  %v415_v2 = vld [vmem:[#allocation7 + $0xd0] sm:$0xff]  ;;  %v4549_v12 = vld [vmem:[#allocation8 + $0x7] ss:$0 sm:$0xff] }
 0x614   : > { %v1182_v20 = vperm.slane %v1176_v17, %v5087_v6  ;;  %v1198_v21 = vperm.slane %v1190_v19, %v5087_v6  ;;  %v1203_v24 = vrot.slane %v1194_v16, 4  ;;  %1294 = vmatpush.msrb.mxu3 %v415_v2  ;;  %v4866_v17 = vmov 32.0  }
 0x615   : > { %v1178_v22 = vsel %vm1151_vm3, %v1170_v4, %v1177_v18  ;;  %v413_v4 = vld [vmem:[#allocation7 + $0xc0] sm:$0xff]  ;;  %4588 = vrcp.f32 %v4866_v17 }
 0x616   : > { %v1186_v23 = vperm.slane %v1178_v22, %v5087_v6  ;;  %v1205_v25 = vrot.slane %v1198_v21, 4  ;;  %v1199_v26 = vrot.slane %v1182_v20, 4  ;;  %v1204_v34 = vsel %vm1151_vm3, 0.0, %v1203_v24  ;;  %1295 = vmatpush.msrb.mxu3 %v414_v3 }
 0x618   : > { %v1201_v27 = vrot.slane %v1186_v23, 4  ;;  %v1206_v28 = vsel %vm1151_vm3, 0.0, %v1205_v25  ;;  %v1218_v29 = vsel %vm1151_vm3, %v1205_v25, %v1194_v16  ;;  %v1200_v40 = vsel %vm1151_vm3, 0.0, %v1199_v26  ;;  %1296 = vmatpush.msrb.mxu3 %v413_v4  ;;  %v1414_v4 = vld [vmem:[#allocation7 + $0x138] sm:$0xff] }
 0x619   : > { %v1222_v30 = vperm.slane %v1218_v29, %v5081_v61  ;;  %v1223_v32 = vrot.slane %v1206_v28, 4  ;;  %v423_v28 = vld [vmem:[#allocation7 + $0xf8] sm:$0xff]  ;;  %v422_v29 = vld [vmem:[#allocation7 + $0xf0] sm:$0xff]  ;;  %1461 = vmatpush.msra.mxu1 %v1414_v4 }
 0x61a   : > { %v1202_v33 = vsel %vm1151_vm3, 0.0, %v1201_v27  ;;  %v1207_v35 = vsel %vm1151_vm3, %v1201_v27, %v1182_v20  ;;  %1351 = vmatpush.msra.mxu0 %v423_v28 }
 0x61b   : > { %v1224_v36 = vsel %vm1151_vm3, %v1223_v32, %v1204_v34  ;;  %v1211_v37 = vperm.slane %v1207_v35, %v5081_v61  ;;  %v1212_v38 = vrot.slane %v1202_v33, 4  ;;  %v1243_v39 = vrot.slane %v1222_v30, 4  ;;  %v4589_v18 = vpop.eup %4588  ;;  %v420_v32 = vld [vmem:[#allocation7 + $0xe0] sm:$0xff]  ;;  %v428_v33 = vld [vmem:[#allocation7 + $0x118] sm:$0xff] }
 0x61c   : > { %v1228_v41 = vperm.slane %v1224_v36, %v5081_v61  ;;  %v1306_v19 = vmul.f32 32.0, %v4589_v18  ;;  %vm1310_vm5 = vweird.f32 %v4589_v18  ;;  %1352 = vmatpush.msra.mxu0 %v422_v29  ;;  %1376 = vmatpush.msra.mxu2 %v428_v33  ;;  %v4555_v29 = vld [vmem:[#allocation8 + $0xd] ss:$0 sm:$0xff]  ;;  %v4558_v33 = vld [vmem:[#allocation8 + $0xf] ss:$0 sm:$0xff] }
 0x61d   : > { %v1213_v42 = vsel %vm1151_vm3, %v1212_v38, %v1200_v40  ;;  %v1231_v43 = vrot.slane %v1211_v37, 4 }
 0x61e   : > { %v1217_v44 = vperm.slane %v1213_v42, %v5081_v61  ;;  %v1244_v45 = vsel %vm1151_vm3, %v1228_v41, %v1243_v39  ;;  %v1241_v46 = vrot.slane %v1228_v41, 4  ;;  %v1307_v20 = vsub.f32 1.0, %v1306_v19 }
 0x61f   : > { %v1252_v47 = vperm.slane %v1244_v45, %v5087_v6 }
 0x620   : > { %v1232_v48 = vsel %vm1151_vm3, %v1217_v44, %v1231_v43  ;;  %v1229_v49 = vrot.slane %v1217_v44, 4  ;;  %v1242_v50 = vsel %vm1151_vm3, %v1241_v46, %v1222_v30  ;;  %v1308_v21 = vmul.f32 %v4589_v18, %v1307_v20  ;;  %v421_v30 = vld [vmem:[#allocation7 + $0xe8] sm:$0xff] }
 0x621   : > { %v1240_v51 = vperm.slane %v1232_v48, %v5087_v6  ;;  %v1257_v52 = vrot.slane %v1252_v47, 4  ;;  %v1248_v53 = vperm.slane %v1242_v50, %v5087_v6  ;;  %1353 = vmatpush.msra.mxu0 %v421_v30  ;;  %v4550_v43 = vld [vmem:[#allocation8 + $0x8] ss:$0 sm:$0xff]  ;;  %v4551_v46 = vld [vmem:[#allocation8 + $0x9] ss:$0 sm:$0xff] }
 0x622   : > { %v1230_v54 = vsel %vm1151_vm3, %v1229_v49, %v1211_v37  ;;  %v1309_v22 = vadd.f32 %v4589_v18, %v1308_v21  ;;  %v427_v49 = vld [vmem:[#allocation7 + $0x110] sm:$0xff]  ;;  %v426_v50 = vld [vmem:[#allocation7 + $0x108] sm:$0xff] }
 0x623   : > { %v1258_v55 = vsel %vm1151_vm3, %v1257_v52, %v1240_v51  ;;  %v1259_v56 = vrot.slane %v1240_v51, 4  ;;  %v1236_v57 = vperm.slane %v1230_v54, %v5087_v6  ;;  %v1253_v58 = vrot.slane %v1248_v53, 4  ;;  %1354 = vmatpush.msra.mxu0 %v420_v32  ;;  %1377 = vmatpush.msra.mxu2 %v427_v49  ;;  %v425_v51 = vld [vmem:[#allocation7 + $0x100] sm:$0xff]  ;;  %v4552_v52 = vld [vmem:[#allocation8 + $0xa] ss:$0 sm:$0xff] }
 0x624   : > { %1266 = vrot.lane.b32.xlu2 %v1258_v55, %s4863_s12  ;;  %v5134_v23 = vsel %vm1310_vm5, %v4589_v18, %v1309_v22 }
 0x625   : > { %v1260_v59 = vsel %vm1151_vm3, %v1252_v47, %v1259_v56  ;;  %v1255_v62 = vrot.slane %v1236_v57, 4  ;;  %v1254_v63 = vsel %vm1151_vm3, %v1253_v58, %v1236_v57  ;;  %1378 = vmatpush.msra.mxu2 %v426_v50  ;;  %v4553_v56 = vld [vmem:[#allocation8 + $0xb] ss:$0 sm:$0xff] }
 0x626   : > { %1270 = vrot.lane.b32.xlu1 %v1260_v59, %s4864_s9 }
 0x627   : > { %v1256_v0 = vsel %vm1151_vm3, %v1248_v53, %v1255_v62  ;;  %1379 = vmatpush.msra.mxu2 %v425_v51 }
 0x628   : > { %1262 = vrot.lane.b32.xlu0 %v1256_v0, %s4865_s10 }
 0x67e   : > { %v1267_v7 = vpop.permute.xlu2 %1266 }
 0x698   : > { %v1271_v9 = vpop.permute.xlu1 %1270 }
 0x69a   : > { %v1263_v5 = vpop.permute.xlu0 %1262 }
 0x69b   : > { %v1273_v8 = vsel %vm653_vm2, %v1254_v63, %v1263_v5  ;;  %v1419_v5 = vld [vmem:[#allocation7 + $0x158] sm:$0xff] }
 0x69c   : > { %v1274_v10 = vsel %vm287_vm0, %v1273_v8, %v1267_v7  ;;  %v1424_v7 = vld [vmem:[#allocation7 + $0x178] sm:$0xff]  ;;  %1482 = vmatpush.msra.mxu3 %v1419_v5  ;;  %v1413_v8 = vld [vmem:[#allocation7 + $0x130] sm:$0xff] }
 0x69d   : > { %v1276_v11 = vsel %vm1275_vm4, %v1274_v10, %v1271_v9  ;;  %1503 = vmatpush.msrb.mxu0 %v1424_v7  ;;  %v1418_v9 = vld [vmem:[#allocation7 + $0x150] sm:$0xff]  ;;  %1462 = vmatpush.msra.mxu1 %v1413_v8 }
 0x69e   : > { %4357 = vmatmul.msk.f32.vlgmr.msrb.gmra.mxu3 %vm318_vm1, %v1276_v11  ;;  %v1423_v10 = vld [vmem:[#allocation7 + $0x170] sm:$0xff]  ;;  %v1412_v11 = vld [vmem:[#allocation7 + $0x128] sm:$0xff] }
 0x69f   : > { %1483 = vmatpush.msra.mxu3 %v1418_v9  ;;  %1504 = vmatpush.msrb.mxu0 %v1423_v10 }
 0x6a0   : > { %1463 = vmatpush.msra.mxu1 %v1412_v11 }
 0x721   : > { %v1298_v13 = vpop.f32.mrf.mxu3 }
 0x722   : > { %v1299_v14 = vadd.f32 %v4549_v12, %v1298_v13  ;;  %v1417_v12 = vld [vmem:[#allocation7 + $0x148] sm:$0xff] }
 0x723   : > { %v1422_v13 = vld [vmem:[#allocation7 + $0x168] sm:$0xff]  ;;  %1484 = vmatpush.msra.mxu3 %v1417_v12 }
 0x724   : > { %v1301_v15 = vadd.f32 %v1299_v14, %v5041_v31  ;;  %v1411_v14 = vld [vmem:[#allocation7 + $0x120] sm:$0xff]  ;;  %1505 = vmatpush.msrb.mxu0 %v1422_v13 }
 0x725   : > { %1464 = vmatpush.msra.mxu1 %v1411_v14 }
 0x726   : > { %v1302_v16 = vsel %vm318_vm1, %v1301_v15, 0.0 }
 0x727   : > { %1303 = vadd.xlane.f32.xlu0 %v1302_v16  ;;  %v1421_v16 = vld [vmem:[#allocation7 + $0x160] sm:$0xff] }
 0x728   : > { %1506 = vmatpush.msrb.mxu0 %v1421_v16 }
 0x79a   : > { %v1304_v24 = vpop.xlane.xlu0 %1303 }
 0x79b   : > { %v1312_v25 = vmul.f32 %v5134_v23, %v1304_v24 }
 0x79d   : > { %v1313_v26 = vsub.f32 %v1301_v15, %v1312_v25  ;;  %v1416_v15 = vld [vmem:[#allocation7 + $0x140] sm:$0xff] }
 0x79e   : > { %1485 = vmatpush.msra.mxu3 %v1416_v15 }
 0x79f   : > { %v1314_v27 = vmul.f32 %v1313_v26, %v1313_v26 }
 0x7a1   : > { %v1315_v31 = vsel %vm318_vm1, %v1314_v27, 0.0  ;;  %v4554_v27 = vld [vmem:[#allocation8 + $0xc] ss:$0 sm:$0xff] }
 0x7a2   : > { %1316 = vadd.xlane.f32.xlu2 %v1315_v31 }
 0x815   : > { %v1317_v34 = vpop.xlane.xlu2 %1316 }
 0x816   : > { %v1318_v35 = vmul.f32 %v1317_v34, %v5134_v23 }
 0x818   : > { %v1319_v36 = vadd.f32 1e-05, %v1318_v35 }
 0x81a   : > { %4590 = vrsqrt.f32 %v1319_v36  ;;  %vm1326_vm7 = vweird.f32 %v1319_v36 }
 0x820   : > { %v4591_v37 = vpop.eup %4590 }
 0x821   : > { %v1321_v38 = vmul.f32 %v4591_v37, %v1319_v36  ;;  %vm1327_vm6 = vweird.f32 %v4591_v37  ;;  %v4556_v36 = vld [vmem:[#allocation8 + $0xe] ss:$0 sm:$0xff] }
 0x822   : > { %vm1328_vm8 = vmor %vm1326_vm7, %vm1327_vm6  ;;  %vm2822_vm7 = vcmask 57344  }
 0x823   : > { %v1322_v39 = vmul.f32 %v4591_v37, %v1321_v38 }
 0x825   : > { %v1323_v40 = vmul.f32 0.5, %v1322_v39 }
 0x827   : > { %v1324_v41 = vsub.f32 1.5, %v1323_v40 }
 0x829   : > { %v1325_v42 = vmul.f32 %v4591_v37, %v1324_v41 }
 0x82b   : > { %v1329_v44 = vsel %vm1328_vm8, %v4591_v37, %v1325_v42  ;;  %v4557_v37 = vld [vmem:[#allocation8 + $0x10] ss:$0 sm:$0xff]  ;;  %vm3218_vm8 = vcmask 253952  }
 0x82c   : > { %v1330_v45 = vmul.f32 %v1329_v44, %v1313_v26 }
 0x82e   : > { %v1332_v47 = vmul.f32 %v4550_v43, %v1330_v45 }
 0x830   : > { %v1334_v48 = vadd.f32 %v4551_v46, %v1332_v47 }
 0x832   : > { %4358 = vmatmul.msk.f32.vlgmr.msra.gmra.mxu0 %vm318_vm1, %v1334_v48 }
 0x8af   : > { %v1356_v53 = vpop.f32.mrf.mxu0 }
 0x8b0   : > { %v1357_v54 = vadd.f32 %v4552_v52, %v1356_v53 }
 0x8b2   : > { %v1359_v55 = vmax.f32 %v1357_v54, 0.0 }
 0x8b4   : > { %4359 = vmatmul.msk.f32.vlgmr.msra.gmra.mxu2 %vm318_vm1, %v1359_v55 }
 0x937   : > { %v1381_v57 = vpop.f32.mrf.mxu2 }
 0x938   : > { %v1382_v58 = vadd.f32 %v4553_v56, %v1381_v57 }
 0x93a   : > { %v1384_v59 = vadd.f32 %v1382_v58, %v1334_v48 }
 0x93c   : > { %v1385_v62 = vsel %vm318_vm1, %v1384_v59, 0.0 }
 0x93d   : > { %1386 = vadd.xlane.f32.xlu1 %v1385_v62 }
 0x9b0   : > { %v1387_v63 = vpop.xlane.xlu1 %1386 }
 0x9b1   : > { %v1388_v0 = vmul.f32 %v1387_v63, %v5134_v23 }
 0x9b3   : > { %v1389_v1 = vsub.f32 %v1384_v59, %v1388_v0 }
 0x9b5   : > { %v1390_v2 = vmul.f32 %v1389_v1, %v1389_v1 }
 0x9b7   : > { %v1391_v3 = vsel %vm318_vm1, %v1390_v2, 0.0 }
 0x9b8   : > { %1392 = vadd.xlane.f32.xlu0 %v1391_v3 }
 0xa2b   : > { %v1393_v17 = vpop.xlane.xlu0 %1392 }
 0xa2c   : > { %v1394_v18 = vmul.f32 %v1393_v17, %v5134_v23 }
 0xa2e   : > { %v1395_v19 = vadd.f32 1e-05, %v1394_v18 }
 0xa30   : > { %4592 = vrsqrt.f32 %v1395_v19  ;;  %vm1402_vm10 = vweird.f32 %v1395_v19 }
 0xa36   : > { %v4593_v20 = vpop.eup %4592 }
 0xa37   : > { %v1397_v21 = vmul.f32 %v4593_v20, %v1395_v19  ;;  %vm1403_vm9 = vweird.f32 %v4593_v20 }
 0xa38   : > { %vm1404_vm11 = vmor %vm1402_vm10, %vm1403_vm9 }
 0xa39   : > { %v1398_v22 = vmul.f32 %v4593_v20, %v1397_v21 }
 0xa3b   : > { %v1399_v24 = vmul.f32 0.5, %v1398_v22 }
 0xa3d   : > { %v1400_v25 = vsub.f32 1.5, %v1399_v24 }
 0xa3f   : > { %v1401_v26 = vmul.f32 %v4593_v20, %v1400_v25 }
 0xa41   : > { %v1405_v31 = vsel %vm1404_vm11, %v4593_v20, %v1401_v26 }
 0xa42   : > { %v1406_v28 = vmul.f32 %v1405_v31, %v1389_v1 }
 0xa44   : > { %v1408_v30 = vmul.f32 %v4554_v27, %v1406_v28 }
 0xa46   : > { %v5145_v32 = vadd.f32 %v4555_v29, %v1408_v30 }
 0xa48   : > { %4360 = vmatmul.msk.f32.vlgmr.msra.gmra.mxu1 %vm318_vm1, %v5145_v32  ;;  %4361 = vmatmul.msk.f32.vlgmr.msra.gmra.mxu3 %vm318_vm1, %v5145_v32 }
 0xa49   : > { %4362 = vmatmul.msk.f32.vlgmr.msrb.gmra.mxu0 %vm318_vm1, %v5145_v32 }
 0xac5   : > { %v1466_v38 = vpop.f32.mrf.mxu1 }
 0xac6   : > { %v1508_v39 = vpop.f32.mrf.mxu0  ;;  %v1467_v40 = vadd.f32 %v4556_v36, %v1466_v38 }
 0xac7   : > { %v1509_v41 = vadd.f32 %v4557_v37, %v1508_v39 }
 0xacb   : > { %v1487_v34 = vpop.f32.mrf.mxu3 }
 0xacc   : > { %v1488_v35 = vadd.f32 %v4558_v33, %v1487_v34 }
 0xace   : > { %1519 = vrot.lane.b32.xlu1 %v1488_v35, %s4860_s21  ;;  %1525 = vrot.lane.b32.xlu0 %v1488_v35, %s4858_s13 }
 0xacf   : > { %1522 = vrot.lane.b32.xlu2 %v1488_v35, %s4859_s28 }
 0xad6   : > { %1532 = vrot.lane.b32.xlu1 %v1509_v41, %s4859_s28  ;;  %1516 = vrot.lane.b32.xlu0 %v1467_v40, %s4858_s13 }
 0xad7   : > { %1514 = vrot.lane.b32.xlu2 %v1467_v40, %s4859_s28 }
 0xadf   : > { %1512 = vrot.lane.b32.xlu2 %v1467_v40, %s4860_s21 }
 0xb29   : > { %v1523_v42 = vpop.permute.xlu2 %1522 }
 0xb2a   : > { %v4502_v43 = vpack.i.bf16 %v1488_v35, %v1523_v42 }
 0xb2c   : > { %4503 = vxpose.xlu0.b32.start.end [1/1] (short) (narrow) %v4502_v43, 8 }
 0xb31   : > { %v1515_v48 = vpop.permute.xlu2 %1514 }
 0xb39   : > { %v1513_v52 = vpop.permute.xlu2 %1512 }
 0xb40   : > { %v1520_v44 = vpop.permute.xlu1 %1519  ;;  %v1526_v45 = vpop.permute.xlu0 %1525 }
 0xb41   : > { %v4509_v46 = vpack.i.bf16 %v1520_v44, %v1526_v45 }
 0xb43   : > { %4510 = vxpose.xlu2.b32.start.end [1/1] (short) (narrow) %v4509_v46, 8 }
 0xb48   : > { %v1517_v47 = vpop.permute.xlu0 %1516  ;;  %v1533_v7 = vpop.permute.xlu1 %1532 }
 0xbd0   : > { %v4504_v49 = vpop.trf.xlu0 }
 0xbd1   : > { %v4508_v50 = vunpack.i.h.bf16 %v4504_v49  ;;  %v4505_v51 = vunpack.i.l.bf16 %v4504_v49 }
 0xbd3   : > { %1683 = vmatpush.msrb.mxu2 %v4508_v50  ;;  %1727 = vmatpush.msrb.mxu3 %v4505_v51 }
 0xbd4   : > { %4363 = vmatmul.msk.f32.vlgmr.msrb.gmra.mxu2 %vm653_vm2, %v1467_v40  ;;  %4365 = vmatmul.msk.f32.vlgmr.msrb.gmra.mxu3 %vm653_vm2, %v1515_v48 }
 0xbdc   : > { %v4511_v53 = vpop.trf.xlu2 }
 0xbdd   : > { %v4515_v54 = vunpack.i.h.bf16 %v4511_v53  ;;  %v4512_v55 = vunpack.i.l.bf16 %v4511_v53 }
 0xbdf   : > { %1705 = vmatpush.msrb.mxu1 %v4515_v54  ;;  %1749 = vmatpush.msra.mxu0 %v4512_v55 }
 0xbe0   : > { %4364 = vmatmul.msk.f32.vlgmr.msrb.gmra.mxu1 %vm653_vm2, %v1513_v52  ;;  %4366 = vmatmul.msk.f32.vlgmr.msra.gmra.mxu0 %vm653_vm2, %v1517_v47 }
 0xc57   : > { %v1685_v56 = vpop.f32.mrf.mxu2  ;;  %v1729_v3 = vpop.f32.mrf.mxu3 }
 0xc58   : > { %v1754_v57 = vmul.f32 0.35355338, %v1685_v56  ;;  %v1756_v4 = vmul.f32 0.35355338, %v1729_v3 }
 0xc5a   : > { %v1758_v58 = vsel %vm653_vm2, %v1754_v57, -inf  ;;  %v1764_v5 = vsel %vm653_vm2, %v1756_v4, -inf }
 0xc5b   : > { %1759 = vmax.xlane.f32.xlu0 %v1758_v58 }
 0xc5d   : > { %v1707_v59 = vpop.f32.mrf.mxu1  ;;  %v1751_v62 = vpop.f32.mrf.mxu0 }
 0xc5e   : > { %v1755_v63 = vmul.f32 0.35355338, %v1707_v59  ;;  %v1757_v0 = vmul.f32 0.35355338, %v1751_v62 }
 0xc60   : > { %v1761_v1 = vsel %vm653_vm2, %v1755_v63, -inf  ;;  %v1767_v2 = vsel %vm653_vm2, %v1757_v0, -inf }
 0xc61   : > { %1762 = vmax.xlane.f32.xlu1 %v1761_v1  ;;  %1768 = vmax.xlane.f32.xlu2 %v1767_v2 }
 0xc69   : > { %1765 = vmax.xlane.f32.xlu1 %v1764_v5 }
 0xc6f   : > { %1529 = vrot.lane.b32.xlu0 %v1509_v41, %s4860_s21 }
 0xc82   : > { %1535 = vrot.lane.b32.xlu1 %v1509_v41, %s4858_s13 }
 0xc91   : > { %1802 = vxpose.xlu0.b32.start.end [1/1] (short) (narrow) %v1509_v41, 8 }
 0xcce   : > { %v1760_v8 = vpop.xlane.xlu0 %1759 }
 0xccf   : > { %v1770_v9 = vsub.f32 %v1754_v57, %v1760_v8 }
 0xcd1   : > { %v1774_v10 = vmul.f32 1.442695, %v1770_v9 }
 0xcd3   : > { %4594 = vpow2.f32 %v1774_v10 }
 0xcd4   : > { %v1763_v11 = vpop.xlane.xlu1 %1762  ;;  %v1769_v12 = vpop.xlane.xlu2 %1768 }
 0xcd5   : > { %v1771_v13 = vsub.f32 %v1755_v63, %v1763_v11  ;;  %v1773_v14 = vsub.f32 %v1757_v0, %v1769_v12 }
 0xcd7   : > { %v1776_v15 = vmul.f32 1.442695, %v1771_v13  ;;  %v1780_v16 = vmul.f32 1.442695, %v1773_v14 }
 0xcd9   : > { %v4595_v17 = vpop.eup %4594  ;;  %4596 = vpow2.f32 %v1776_v15 }
 0xcda   : > { %4598 = vpow2.f32 %v1780_v16  ;;  %v1782_v18 = vsel %vm653_vm2, %v4595_v17, 0.0 }
 0xcdb   : > { %1783 = vadd.xlane.f32.xlu1 %v1782_v18 }
 0xcdc   : > { %v1766_v19 = vpop.xlane.xlu1 %1765 }
 0xcdd   : > { %v1772_v20 = vsub.f32 %v1756_v4, %v1766_v19 }
 0xcdf   : > { %v4597_v21 = vpop.eup %4596  ;;  %v1778_v22 = vmul.f32 1.442695, %v1772_v20 }
 0xce0   : > { %v4599_v24 = vpop.eup %4598  ;;  %v1785_v25 = vsel %vm653_vm2, %v4597_v21, 0.0 }
 0xce1   : > { %4600 = vpow2.f32 %v1778_v22  ;;  %v1530_v26 = vpop.permute.xlu0 %1529  ;;  %v1791_v27 = vsel %vm653_vm2, %v4599_v24, 0.0 }
 0xce2   : > { %1834 = vxpose.xlu0.b32.start.end [1/1] (short) (narrow) %v1530_v26, 8  ;;  %1792 = vadd.xlane.f32.xlu2 %v1791_v27 }
 0xce3   : > { %1786 = vadd.xlane.f32.xlu1 %v1785_v25 }
 0xce7   : > { %v4601_v31 = vpop.eup %4600 }
 0xce8   : > { %v1788_v28 = vsel %vm653_vm2, %v4601_v31, 0.0 }
 0xceb   : > { %1789 = vadd.xlane.f32.xlu1 %v1788_v28 }
 0xcf4   : > { %v1536_v29 = vpop.permute.xlu1 %1535 }
 0xd0b   : > { %1866 = vxpose.xlu2.b32.start.end [1/1] (short) (narrow) %v1533_v7, 8 }
 0xd25   : > { %1898 = vxpose.xlu1.b32.start.end [1/1] (short) (narrow) %v1536_v29, 8 }
 0xd35   : > { %v1818_v37 = vpop.trf.xlu0 }
 0xd4e   : > { %v1784_v30 = vpop.xlane.xlu1 %1783 }
 0xd4f   : > { %4602 = vrcp.f32 %v1784_v30 }
 0xd55   : > { %v4603_v33 = vpop.eup %4602  ;;  %v1793_v34 = vpop.xlane.xlu2 %1792 }
 0xd56   : > { %v1798_v35 = vmul.f32 %v4603_v33, %v4595_v17  ;;  %4604 = vrcp.f32 %v1793_v34  ;;  %v1787_v36 = vpop.xlane.xlu1 %1786 }
 0xd57   : > { %4606 = vrcp.f32 %v1787_v36 }
 0xd58   : > { %4367 = vmatpush.xpose.msk.msra.mxu2 %vm653_vm2, %v1798_v35 }
 0xd5b   : > { %4368 = vmatmul.msk.f32.vlgmr.msra.gmra.mxu2 %vm653_vm2, %v1818_v37 }
 0xd5c   : > { %v4605_v38 = vpop.eup %4604 }
 0xd5d   : > { %v4607_v39 = vpop.eup %4606  ;;  %v1801_v40 = vmul.f32 %v4605_v38, %v4599_v24 }
 0xd5e   : > { %v1799_v41 = vmul.f32 %v4607_v39, %v4597_v21  ;;  %v1790_v42 = vpop.xlane.xlu1 %1789 }
 0xd5f   : > { %4608 = vrcp.f32 %v1790_v42  ;;  %4373 = vmatpush.xpose.msk.msrb.mxu0 %vm653_vm2, %v1801_v40 }
 0xd60   : > { %4369 = vmatpush.xpose.msk.msra.mxu1 %vm653_vm2, %v1799_v41 }
 0xd65   : > { %v4609_v43 = vpop.eup %4608 }
 0xd66   : > { %v1800_v44 = vmul.f32 %v4609_v43, %v4601_v31 }
 0xd68   : > { %4371 = vmatpush.xpose.msk.msra.mxu3 %vm653_vm2, %v1800_v44 }
 0xd86   : > { %v1850_v45 = vpop.trf.xlu0 }
 0xd87   : > { %4370 = vmatmul.msk.f32.vlgmr.msra.gmra.mxu1 %vm653_vm2, %v1850_v45 }
 0xda4   : > { %v1882_v46 = vpop.trf.xlu2 }
 0xda5   : > { %4372 = vmatmul.msk.f32.vlgmr.msra.gmra.mxu3 %vm653_vm2, %v1882_v46 }
 0xdc9   : > { %v1914_v47 = vpop.trf.xlu1 }
 0xdca   : > { %4374 = vmatmul.msk.f32.vlgmr.msrb.gmra.mxu0 %vm653_vm2, %v1914_v47 }
 0xdde   : > { %v1953_v48 = vpop.f32.mrf.mxu2 }
 0xddf   : > { %2034 = vxpose.xlu0.b32.start.end [1/1] (short) (narrow) %v1953_v48, 8 }
 0xe04   : > { %v1979_v49 = vpop.f32.mrf.mxu1 }
 0xe05   : > { %2066 = vxpose.xlu0.b32.start.end [1/1] (short) (narrow) %v1979_v49, 8 }
 0xe28   : > { %v2005_v51 = vpop.f32.mrf.mxu3 }
 0xe47   : > { %v2031_v50 = vpop.f32.mrf.mxu0 }
 0xe48   : > { %2130 = vxpose.xlu2.b32.start.end [1/1] (short) (narrow) %v2031_v50, 8 }
 0xe50   : > { %2098 = vxpose.xlu2.b32.start.end [1/1] (short) (narrow) %v2005_v51, 8 }
 0xe83   : > { %v2050_v52 = vpop.trf.xlu0 }
 0xe84   : > { %v2164_v62 = vrot.slane %v2050_v52, 4 }
 0xea9   : > { %v2082_v53 = vpop.trf.xlu0 }
 0xeaa   : > { %v2176_v54 = vrot.slane %v2082_v53, 4 }
 0xee1   : > { %v2146_v55 = vpop.trf.xlu2 }
 0xee2   : > { %v2174_v56 = vrot.slane %v2146_v55, 4  ;;  %v2177_v57 = vsel %vm1151_vm3, %v2146_v55, %v2176_v54 }
 0xee3   : > { %v2185_v59 = vperm.slane %v2177_v57, %v5081_v61 }
 0xee4   : > { %v2175_v58 = vsel %vm1151_vm3, %v2174_v56, %v2082_v53 }
 0xee5   : > { %v2181_v63 = vperm.slane %v2175_v58, %v5081_v61  ;;  %v2198_v3 = vrot.slane %v2185_v59, 4 }
 0xee7   : > { %v2186_v7 = vrot.slane %v2181_v63, 4 }
 0xee9   : > { %v2114_v0 = vpop.trf.xlu2 }
 0xeea   : > { %v2162_v1 = vrot.slane %v2114_v0, 4  ;;  %v2165_v2 = vsel %vm1151_vm3, %v2114_v0, %v2164_v62  ;;  %v1428_v62 = vld [vmem:[#allocation7 + $0x190] sm:$0xff]  ;;  %v1426_v0 = vld [vmem:[#allocation7 + $0x180] sm:$0xff] }
 0xeeb   : > { %v2173_v4 = vperm.slane %v2165_v2, %v5081_v61 }
 0xeec   : > { %v2163_v5 = vsel %vm1151_vm3, %v2162_v1, %v2050_v52 }
 0xeed   : > { %v2169_v8 = vperm.slane %v2163_v5, %v5081_v61  ;;  %v2199_v9 = vsel %vm1151_vm3, %v2198_v3, %v2173_v4  ;;  %v2200_v10 = vrot.slane %v2173_v4, 4 }
 0xeee   : > { %v2205_v11 = vperm.slane %v2199_v9, %v5087_v6 }
 0xeef   : > { %v2187_v12 = vsel %vm1151_vm3, %v2186_v7, %v2169_v8  ;;  %v2188_v13 = vrot.slane %v2169_v8, 4  ;;  %v2201_v14 = vsel %vm1151_vm3, %v2185_v59, %v2200_v10  ;;  %v1429_v59 = vld [vmem:[#allocation7 + $0x198] sm:$0xff]  ;;  %v4559_v8 = vld [vmem:[#allocation8 + $0x11] ss:$0 sm:$0xff] }
 0xef0   : > { %v2193_v15 = vperm.slane %v2187_v12, %v5087_v6  ;;  %v2209_v16 = vperm.slane %v2201_v14, %v5087_v6  ;;  %v2214_v19 = vrot.slane %v2205_v11, 4  ;;  %2303 = vmatpush.msrb.mxu2 %v1429_v59 }
 0xef1   : > { %v2189_v17 = vsel %vm1151_vm3, %v2181_v63, %v2188_v13  ;;  %v1427_v63 = vld [vmem:[#allocation7 + $0x188] sm:$0xff] }
 0xef2   : > { %v2197_v18 = vperm.slane %v2189_v17, %v5087_v6  ;;  %v2216_v20 = vrot.slane %v2209_v16, 4  ;;  %v2210_v21 = vrot.slane %v2193_v15, 4  ;;  %v2215_v28 = vsel %vm1151_vm3, 0.0, %v2214_v19  ;;  %2304 = vmatpush.msrb.mxu2 %v1428_v62  ;;  %v1435_v19 = vld [vmem:[#allocation7 + $0x1b0] sm:$0xff] }
 0xef4   : > { %v2212_v22 = vrot.slane %v2197_v18, 4  ;;  %v2217_v24 = vsel %vm1151_vm3, 0.0, %v2216_v20  ;;  %v2229_v25 = vsel %vm1151_vm3, %v2216_v20, %v2205_v11  ;;  %v2211_v36 = vsel %vm1151_vm3, 0.0, %v2210_v21  ;;  %2305 = vmatpush.msrb.mxu2 %v1427_v63  ;;  %v1436_v18 = vld [vmem:[#allocation7 + $0x1b8] sm:$0xff]  ;;  %v1434_v20 = vld [vmem:[#allocation7 + $0x1a8] sm:$0xff]  ;;  %v1433_v21 = vld [vmem:[#allocation7 + $0x1a0] sm:$0xff] }
 0xef5   : > { %v2233_v26 = vperm.slane %v2229_v25, %v5081_v61  ;;  %v2234_v27 = vrot.slane %v2217_v24, 4  ;;  %2354 = vmatpush.msrb.mxu1 %v1436_v18  ;;  %v2474_v24 = vld [vmem:[#allocation7 + $0x228] sm:$0xff] }
 0xef6   : > { %v2213_v31 = vsel %vm1151_vm3, 0.0, %v2212_v22  ;;  %v2218_v29 = vsel %vm1151_vm3, %v2212_v22, %v2193_v15  ;;  %2306 = vmatpush.msrb.mxu2 %v1426_v0  ;;  %v2475_v22 = vld [vmem:[#allocation7 + $0x230] sm:$0xff] }
 0xef7   : > { %v2235_v30 = vsel %vm1151_vm3, %v2234_v27, %v2215_v28  ;;  %v2222_v33 = vperm.slane %v2218_v29, %v5081_v61  ;;  %v2223_v34 = vrot.slane %v2213_v31, 4  ;;  %v2254_v35 = vrot.slane %v2233_v26, 4  ;;  %2355 = vmatpush.msrb.mxu1 %v1435_v19  ;;  %v2473_v27 = vld [vmem:[#allocation7 + $0x220] sm:$0xff]  ;;  %v1441_v28 = vld [vmem:[#allocation7 + $0x1d8] sm:$0xff] }
 0xef8   : > { %v2239_v37 = vperm.slane %v2235_v30, %v5081_v61  ;;  %2379 = vmatpush.msrb.mxu3 %v1441_v28  ;;  %v2485_v28 = vld [vmem:[#allocation7 + $0x270] sm:$0xff] }
 0xef9   : > { %v2224_v38 = vsel %vm1151_vm3, %v2223_v34, %v2211_v36  ;;  %v2242_v39 = vrot.slane %v2222_v33, 4  ;;  %2356 = vmatpush.msrb.mxu1 %v1434_v20  ;;  %v4565_v20 = vld [vmem:[#allocation8 + $0x17] ss:$0 sm:$0xff] }
 0xefa   : > { %v2228_v40 = vperm.slane %v2224_v38, %v5081_v61  ;;  %v2255_v41 = vsel %vm1151_vm3, %v2239_v37, %v2254_v35  ;;  %v2252_v42 = vrot.slane %v2239_v37, 4  ;;  %v4560_v37 = vld [vmem:[#allocation8 + $0x12] ss:$0 sm:$0xff] }
 0xefb   : > { %v2263_v43 = vperm.slane %v2255_v41, %v5087_v6  ;;  %2357 = vmatpush.msrb.mxu1 %v1433_v21 }
 0xefc   : > { %v2243_v44 = vsel %vm1151_vm3, %v2228_v40, %v2242_v39  ;;  %v2240_v45 = vrot.slane %v2228_v40, 4  ;;  %v2253_v46 = vsel %vm1151_vm3, %v2252_v42, %v2233_v26  ;;  %v4561_v40 = vld [vmem:[#allocation8 + $0x13] ss:$0 sm:$0xff] }
 0xefd   : > { %v2251_v47 = vperm.slane %v2243_v44, %v5087_v6  ;;  %v2268_v48 = vrot.slane %v2263_v43, 4  ;;  %v2259_v49 = vperm.slane %v2253_v46, %v5087_v6  ;;  %v1439_v46 = vld [vmem:[#allocation7 + $0x1c8] sm:$0xff] }
 0xefe   : > { %v2241_v50 = vsel %vm1151_vm3, %v2240_v45, %v2222_v33  ;;  %v1440_v45 = vld [vmem:[#allocation7 + $0x1d0] sm:$0xff] }
 0xeff   : > { %v2269_v51 = vsel %vm1151_vm3, %v2268_v48, %v2251_v47  ;;  %v2270_v52 = vrot.slane %v2251_v47, 4  ;;  %v2247_v53 = vperm.slane %v2241_v50, %v5087_v6  ;;  %v2264_v54 = vrot.slane %v2259_v49, 4  ;;  %2380 = vmatpush.msrb.mxu3 %v1440_v45  ;;  %v1438_v47 = vld [vmem:[#allocation7 + $0x1c0] sm:$0xff]  ;;  %v4562_v48 = vld [vmem:[#allocation8 + $0x14] ss:$0 sm:$0xff] }
 0xf00   : > { %2277 = vrot.lane.b32.xlu0 %v2269_v51, %s4863_s12 }
 0xf01   : > { %v2271_v55 = vsel %vm1151_vm3, %v2263_v43, %v2270_v52  ;;  %v2266_v56 = vrot.slane %v2247_v53, 4  ;;  %v2265_v57 = vsel %vm1151_vm3, %v2264_v54, %v2247_v53  ;;  %v374_v43 = vld [vmem:[#allocation8 + $0x3] sm:$0x1]  ;;  %2381 = vmatpush.msrb.mxu3 %v1439_v46  ;;  %v2477_v52 = vld [vmem:[#allocation8 + $0x1a] sm:$0x1] }
 0xf02   : > { %2281 = vrot.lane.b32.xlu1 %v2271_v55, %s4864_s9  ;;  %v5236_v44 = vadd.f32 %v5062_v60, %v374_v43  ;;  %v4563_v60 = vld [vmem:[#allocation8 + $0x15] ss:$0 sm:$0xff]  ;;  %v4568_v46 = vld [vmem:[#allocation8 + $0x1c] ss:$0 sm:$0xff] }
 0xf03   : > { %v2267_v58 = vsel %vm1151_vm3, %v2259_v49, %v2266_v56  ;;  %2382 = vmatpush.msrb.mxu3 %v1438_v47 }
 0xf04   : > { %2273 = vrot.lane.b32.xlu2 %v2267_v58, %s4865_s10 }
 0xf5e   : > { %v2274_v1 = vpop.permute.xlu2 %2273 }
 0xf5f   : > { %v2284_v2 = vsel %vm653_vm2, %v2265_v57, %v2274_v1 }
 0xf72   : > { %v2278_v3 = vpop.permute.xlu0 %2277 }
 0xf73   : > { %v2285_v4 = vsel %vm287_vm0, %v2284_v2, %v2278_v3  ;;  %v2417_v2 = vld [vmem:[#allocation7 + $0x1f8] sm:$0xff]  ;;  %v2416_v3 = vld [vmem:[#allocation7 + $0x1f0] sm:$0xff] }
 0xf74   : > { %v2282_v5 = vpop.permute.xlu1 %2281  ;;  %2435 = vmatpush.msra.mxu0 %v2417_v2 }
 0xf75   : > { %v2286_v7 = vsel %vm1275_vm4, %v2285_v4, %v2282_v5  ;;  %v2415_v4 = vld [vmem:[#allocation7 + $0x1e8] sm:$0xff]  ;;  %v2414_v5 = vld [vmem:[#allocation7 + $0x1e0] sm:$0xff] }
 0xf76   : > { %4375 = vmatmul.msk.f32.vlgmr.msrb.gmra.mxu2 %vm318_vm1, %v2286_v7  ;;  %2436 = vmatpush.msra.mxu0 %v2416_v3  ;;  %v2447_v7 = vld [vmem:[#allocation7 + $0x218] sm:$0xff] }
 0xf77   : > { %2465 = vmatpush.msra.mxu2 %v2447_v7 }
 0xf78   : > { %2437 = vmatpush.msra.mxu0 %v2415_v4 }
 0xf7a   : > { %2438 = vmatpush.msra.mxu0 %v2414_v5 }
 0xff9   : > { %v2308_v9 = vpop.f32.mrf.mxu2 }
 0xffa   : > { %v2309_v10 = vadd.f32 %v4559_v8, %v2308_v9 }
 0xffc   : > { %v2311_v11 = vadd.f32 %v2309_v10, %v5145_v32  ;;  %v2476_v32 = vld [vmem:[#allocation7 + $0x238] sm:$0xff] }
 0xffd   : > { %2522 = vmatpush.msra.mxu1 %v2476_v32 }
 0xffe   : > { %v2312_v12 = vsel %vm318_vm1, %v2311_v11, 0.0 }
 0xfff   : > { %2313 = vadd.xlane.f32.xlu2 %v2312_v12  ;;  %2523 = vmatpush.msra.mxu1 %v2475_v22  ;;  %v2446_v22 = vld [vmem:[#allocation7 + $0x210] sm:$0xff] }
0x1000   : > { %2466 = vmatpush.msra.mxu2 %v2446_v22 }
0x1001   : > { %2524 = vmatpush.msra.mxu1 %v2474_v24  ;;  %v2445_v24 = vld [vmem:[#allocation7 + $0x208] sm:$0xff] }
0x1002   : > { %2467 = vmatpush.msra.mxu2 %v2445_v24 }
0x1003   : > { %2525 = vmatpush.msra.mxu1 %v2473_v27  ;;  %v2486_v27 = vld [vmem:[#allocation7 + $0x278] sm:$0xff] }
0x1004   : > { %2567 = vmatpush.msrb.mxu0 %v2486_v27 }
0x1006   : > { %2568 = vmatpush.msrb.mxu0 %v2485_v28 }
0x1072   : > { %v2314_v13 = vpop.xlane.xlu2 %2313 }
0x1073   : > { %v2315_v14 = vmul.f32 %v2314_v13, %v5134_v23 }
0x1075   : > { %v2316_v15 = vsub.f32 %v2311_v11, %v2315_v14 }
0x1077   : > { %v2317_v16 = vmul.f32 %v2316_v15, %v2316_v15 }
0x1079   : > { %v2318_v17 = vsel %vm318_vm1, %v2317_v16, 0.0 }
0x107a   : > { %2319 = vadd.xlane.f32.xlu0 %v2318_v17  ;;  %v4564_v17 = vld [vmem:[#allocation8 + $0x16] ss:$0 sm:$0xff] }
0x10ed   : > { %v2320_v25 = vpop.xlane.xlu0 %2319 }
0x10ee   : > { %v2321_v26 = vmul.f32 %v2320_v25, %v5134_v23  ;;  %v2444_v25 = vld [vmem:[#allocation7 + $0x200] sm:$0xff] }
0x10ef   : > { %2468 = vmatpush.msra.mxu2 %v2444_v25 }
0x10f0   : > { %v2322_v31 = vadd.f32 1e-05, %v2321_v26  ;;  %v2481_v26 = vld [vmem:[#allocation7 + $0x258] sm:$0xff] }
0x10f1   : > { %2546 = vmatpush.msra.mxu3 %v2481_v26 }
0x10f2   : > { %4610 = vrsqrt.f32 %v2322_v31  ;;  %vm2329_vm13 = vweird.f32 %v2322_v31 }
0x10f8   : > { %v4611_v29 = vpop.eup %4610 }
0x10f9   : > { %v2324_v30 = vmul.f32 %v4611_v29, %v2322_v31  ;;  %vm2330_vm12 = vweird.f32 %v4611_v29  ;;  %v2480_v31 = vld [vmem:[#allocation7 + $0x250] sm:$0xff] }
0x10fa   : > { %vm2331_vm14 = vmor %vm2329_vm13, %vm2330_vm12  ;;  %2547 = vmatpush.msra.mxu3 %v2480_v31 }
0x10fb   : > { %v2325_v33 = vmul.f32 %v4611_v29, %v2324_v30 }
0x10fd   : > { %v2326_v34 = vmul.f32 0.5, %v2325_v33 }
0x10ff   : > { %v2327_v35 = vsub.f32 1.5, %v2326_v34 }
0x1101   : > { %v2328_v36 = vmul.f32 %v4611_v29, %v2327_v35  ;;  %v2479_v35 = vld [vmem:[#allocation7 + $0x248] sm:$0xff] }
0x1102   : > { %2548 = vmatpush.msra.mxu3 %v2479_v35 }
0x1103   : > { %v2332_v38 = vsel %vm2331_vm14, %v4611_v29, %v2328_v36  ;;  %v4566_v29 = vld [vmem:[#allocation8 + $0x18] ss:$0 sm:$0xff]  ;;  %v2484_v36 = vld [vmem:[#allocation7 + $0x268] sm:$0xff] }
0x1104   : > { %v2333_v39 = vmul.f32 %v2332_v38, %v2316_v15  ;;  %2569 = vmatpush.msrb.mxu0 %v2484_v36  ;;  %v2483_v38 = vld [vmem:[#allocation7 + $0x260] sm:$0xff] }
0x1106   : > { %v2335_v41 = vmul.f32 %v4560_v37, %v2333_v39  ;;  %v2478_v37 = vld [vmem:[#allocation7 + $0x240] sm:$0xff]  ;;  %2570 = vmatpush.msrb.mxu0 %v2483_v38  ;;  %v4567_v39 = vld [vmem:[#allocation8 + $0x19] ss:$0 sm:$0xff] }
0x1107   : > { %2549 = vmatpush.msra.mxu3 %v2478_v37 }
0x1108   : > { %v2337_v42 = vadd.f32 %v4561_v40, %v2335_v41 }
0x110a   : > { %4376 = vmatmul.msk.f32.vlgmr.msrb.gmra.mxu1 %vm318_vm1, %v2337_v42 }
0x1112   : > { %4380 = vmatmul.msk.f32.vlgmr.msra.gmra.mxu1 %vm318_vm1, %v5236_v44 }
0x1187   : > { %v2359_v49 = vpop.f32.mrf.mxu1 }
0x1188   : > { %v2360_v50 = vadd.f32 %v4562_v48, %v2359_v49 }
0x118a   : > { %v2362_v51 = vmax.f32 %v2360_v50, 0.0 }
0x118c   : > { %4377 = vmatmul.msk.f32.vlgmr.msrb.gmra.mxu3 %vm318_vm1, %v2362_v51 }
0x118f   : > { %v2527_v53 = vpop.f32.mrf.mxu1 }
0x1190   : > { %v5241_v54 = vadd.f32 %v2527_v53, %v2477_v52 }
0x1192   : > { %2578 = vrot.lane.b32.xlu0 %v5241_v54, %s4859_s28 }
0x119a   : > { %2576 = vrot.lane.b32.xlu0 %v5241_v54, %s4860_s21 }
0x1204   : > { %v2579_v52 = vpop.permute.xlu0 %2578 }
0x120f   : > { %v2384_v55 = vpop.f32.mrf.mxu3 }
0x1210   : > { %v2385_v56 = vadd.f32 %v4563_v60, %v2384_v55  ;;  %v2577_v60 = vpop.permute.xlu0 %2576 }
0x1212   : > { %v2387_v57 = vadd.f32 %v2385_v56, %v2337_v42  ;;  %v4569_v42 = vld [vmem:[#allocation8 + $0x1b] ss:$0 sm:$0xff] }
0x1214   : > { %v2388_v58 = vsel %vm318_vm1, %v2387_v57, 0.0 }
0x1215   : > { %2389 = vadd.xlane.f32.xlu1 %v2388_v58 }
0x1288   : > { %v2390_v59 = vpop.xlane.xlu1 %2389 }
0x1289   : > { %v2391_v62 = vmul.f32 %v2390_v59, %v5134_v23 }
0x128b   : > { %v2392_v63 = vsub.f32 %v2387_v57, %v2391_v62 }
0x128d   : > { %v2393_v0 = vmul.f32 %v2392_v63, %v2392_v63 }
0x128f   : > { %v2394_v1 = vsel %vm318_vm1, %v2393_v0, 0.0 }
0x1290   : > { %2395 = vadd.xlane.f32.xlu2 %v2394_v1 }
0x12a8   : > { %2580 = vrot.lane.b32.xlu2 %v5241_v54, %s4858_s13 }
0x1303   : > { %v2396_v8 = vpop.xlane.xlu2 %2395 }
0x1304   : > { %v2397_v9 = vmul.f32 %v2396_v8, %v5134_v23 }
0x1306   : > { %v2398_v10 = vadd.f32 1e-05, %v2397_v9 }
0x1308   : > { %4612 = vrsqrt.f32 %v2398_v10  ;;  %vm2405_vm5 = vweird.f32 %v2398_v10 }
0x130b   : > { %v2581_v49 = vpop.permute.xlu2 %2580 }
0x130e   : > { %v4613_v11 = vpop.eup %4612 }
0x130f   : > { %v2400_v12 = vmul.f32 %v4613_v11, %v2398_v10  ;;  %vm2406_vm15 = vweird.f32 %v4613_v11 }
0x1310   : > { %vm2407_vm6 = vmor %vm2405_vm5, %vm2406_vm15 }
0x1311   : > { %v2401_v13 = vmul.f32 %v4613_v11, %v2400_v12 }
0x1313   : > { %v2402_v14 = vmul.f32 0.5, %v2401_v13 }
0x1315   : > { %v2403_v15 = vsub.f32 1.5, %v2402_v14 }
0x1317   : > { %v2404_v16 = vmul.f32 %v4613_v11, %v2403_v15 }
0x1319   : > { %v2408_v18 = vsel %vm2407_vm6, %v4613_v11, %v2404_v16 }
0x131a   : > { %v2409_v19 = vmul.f32 %v2408_v18, %v2392_v63 }
0x131c   : > { %v2411_v21 = vmul.f32 %v4564_v17, %v2409_v19 }
0x131e   : > { %v2413_v32 = vadd.f32 %v4565_v20, %v2411_v21 }
0x1320   : > { %4378 = vmatmul.msk.f32.vlgmr.msra.gmra.mxu0 %vm318_vm1, %v2413_v32 }
0x139d   : > { %v2440_v30 = vpop.f32.mrf.mxu0 }
0x139e   : > { %v2441_v33 = vadd.f32 %v4566_v29, %v2440_v30 }
0x13a0   : > { %v2443_v34 = vmax.f32 %v2441_v33, 0.0 }
0x13a2   : > { %4379 = vmatmul.msk.f32.vlgmr.msra.gmra.mxu2 %vm318_vm1, %v2443_v34 }
0x1425   : > { %v2470_v40 = vpop.f32.mrf.mxu2 }
0x1426   : > { %v5255_v41 = vadd.f32 %v4567_v39, %v2470_v40 }
0x1428   : > { %4381 = vmatmul.msk.f32.vlgmr.msra.gmra.mxu3 %vm318_vm1, %v5255_v41  ;;  %4382 = vmatmul.msk.f32.vlgmr.msrb.gmra.mxu0 %vm318_vm1, %v5255_v41 }
0x14a5   : > { %v2572_v47 = vpop.f32.mrf.mxu0 }
0x14a6   : > { %v2573_v48 = vadd.f32 %v4568_v46, %v2572_v47 }
0x14ab   : > { %v2551_v43 = vpop.f32.mrf.mxu3 }
0x14ac   : > { %v2552_v45 = vadd.f32 %v4569_v42, %v2551_v43 }
0x14ae   : > { %2583 = vrot.lane.b32.xlu1 %v2552_v45, %s4860_s21  ;;  %2589 = vrot.lane.b32.xlu0 %v2552_v45, %s4858_s13 }
0x14af   : > { %2586 = vrot.lane.b32.xlu2 %v2552_v45, %s4859_s28 }
0x14b6   : > { %2599 = vrot.lane.b32.xlu1 %v2573_v48, %s4858_s13 }
0x14be   : > { %2593 = vrot.lane.b32.xlu1 %v2573_v48, %s4860_s21 }
0x14c6   : > { %2596 = vrot.lane.b32.xlu1 %v2573_v48, %s4859_s28 }
0x1509   : > { %v2587_v50 = vpop.permute.xlu2 %2586 }
0x150a   : > { %v4516_v51 = vpack.i.bf16 %v2552_v45, %v2587_v50 }
0x150c   : > { %4517 = vxpose.xlu2.b32.start.end [1/1] (short) (narrow) %v4516_v51, 8 }
0x1520   : > { %v2584_v53 = vpop.permute.xlu1 %2583  ;;  %v2590_v56 = vpop.permute.xlu0 %2589 }
0x1521   : > { %v4523_v57 = vpack.i.bf16 %v2584_v53, %v2590_v56 }
0x1528   : > { %v2600_v55 = vpop.permute.xlu1 %2599 }
0x1529   : > { %2963 = vxpose.xlu0.b32.start.end [1/1] (short) (narrow) %v2600_v55, 8 }
0x1530   : > { %v2594_v58 = vpop.permute.xlu1 %2593 }
0x1531   : > { %2899 = vxpose.xlu1.b32.start.end [1/1] (short) (narrow) %v2594_v58, 8  ;;  %4524 = vxpose.xlu0.b32.start.end [1/1] (short) (narrow) %v4523_v57, 8 }
0x1538   : > { %v2597_v16 = vpop.permute.xlu1 %2596 }
0x15a5   : > { %v4518_v59 = vpop.trf.xlu2 }
0x15a6   : > { %v4522_v62 = vunpack.i.h.bf16 %v4518_v59  ;;  %v4519_v63 = vunpack.i.l.bf16 %v4518_v59 }
0x15a8   : > { %2747 = vmatpush.msrb.mxu2 %v4522_v62  ;;  %2791 = vmatpush.msrb.mxu3 %v4519_v63 }
0x15a9   : > { %4383 = vmatmul.msk.f32.vlgmr.msrb.gmra.mxu2 %vm653_vm2, %v5241_v54  ;;  %4385 = vmatmul.msk.f32.vlgmr.msrb.gmra.mxu3 %vm653_vm2, %v2579_v52 }
0x15cd   : > { %v5270_v0 = vpop.trf.xlu0 }
0x15d5   : > { %v4525_v1 = vpop.trf.xlu0  ;;  %v2915_v17 = vpop.trf.xlu1 }
0x15d6   : > { %v4529_v2 = vunpack.i.h.bf16 %v4525_v1  ;;  %v4526_v3 = vunpack.i.l.bf16 %v4525_v1 }
0x15d8   : > { %2769 = vmatpush.msrb.mxu1 %v4529_v2  ;;  %2813 = vmatpush.msra.mxu0 %v4526_v3 }
0x15d9   : > { %4384 = vmatmul.msk.f32.vlgmr.msrb.gmra.mxu1 %vm653_vm2, %v2577_v60  ;;  %4386 = vmatmul.msk.f32.vlgmr.msra.gmra.mxu0 %vm653_vm2, %v2581_v49 }
0x162c   : > { %v2749_v4 = vpop.f32.mrf.mxu2  ;;  %v2793_v5 = vpop.f32.mrf.mxu3 }
0x162d   : > { %v2818_v7 = vmul.f32 0.35355338, %v2749_v4  ;;  %v2820_v8 = vmul.f32 0.35355338, %v2793_v5 }
0x162f   : > { %v2823_v54 = vsel %vm2822_vm7, %v2818_v7, -inf  ;;  %v2829_v9 = vsel %vm2822_vm7, %v2820_v8, -inf }
0x1630   : > { %2824 = vmax.xlane.f32.xlu1 %v2823_v54  ;;  %2830 = vmax.xlane.f32.xlu0 %v2829_v9 }
0x1656   : > { %v2771_v10 = vpop.f32.mrf.mxu1  ;;  %v2815_v11 = vpop.f32.mrf.mxu0 }
0x1657   : > { %v2819_v12 = vmul.f32 0.35355338, %v2771_v10  ;;  %v2821_v13 = vmul.f32 0.35355338, %v2815_v11 }
0x1659   : > { %2867 = vxpose.xlu0.b32.start.end [1/1] (short) (narrow) %v2573_v48, 8  ;;  %v2826_v14 = vsel %vm2822_vm7, %v2819_v12, -inf  ;;  %v2832_v15 = vsel %vm2822_vm7, %v2821_v13, -inf }
0x165a   : > { %2827 = vmax.xlane.f32.xlu2 %v2826_v14  ;;  %2833 = vmax.xlane.f32.xlu1 %v2832_v15 }
0x1683   : > { %2931 = vxpose.xlu2.b32.start.end [1/1] (short) (narrow) %v2597_v16, 8 }
0x16a3   : > { %v2825_v18 = vpop.xlane.xlu1 %2824  ;;  %v2831_v25 = vpop.xlane.xlu0 %2830 }
0x16a4   : > { %v2837_v27 = vsub.f32 %v2820_v8, %v2831_v25  ;;  %v2835_v30 = vsub.f32 %v2818_v7, %v2825_v18 }
0x16a6   : > { %v2843_v28 = vmul.f32 1.442695, %v2837_v27  ;;  %v2839_v34 = vmul.f32 1.442695, %v2835_v30  ;;  %v2491_v30 = vld [vmem:[#allocation7 + $0x298] sm:$0xff] }
0x16a7   : > { %3209 = vmatpush.msra.mxu2 %v2491_v30 }
0x16cd   : > { %v2834_v19 = vpop.xlane.xlu1 %2833  ;;  %v2828_v20 = vpop.xlane.xlu2 %2827 }
0x16ce   : > { %v2838_v21 = vsub.f32 %v2821_v13, %v2834_v19  ;;  %v2836_v22 = vsub.f32 %v2819_v12, %v2828_v20 }
0x16d0   : > { %v2845_v32 = vmul.f32 1.442695, %v2838_v21  ;;  %v2841_v24 = vmul.f32 1.442695, %v2836_v22 }
0x16d2   : > { %4614 = vpow2.f32 %v2845_v32 }
0x16d3   : > { %4616 = vpow2.f32 %v2841_v24 }
0x16d4   : > { %4618 = vpow2.f32 %v2843_v28 }
0x16d5   : > { %4620 = vpow2.f32 %v2839_v34  ;;  %v2489_v34 = vld [vmem:[#allocation7 + $0x288] sm:$0xff] }
0x16d8   : > { %v4615_v26 = vpop.eup %4614 }
0x16d9   : > { %v2856_v31 = vsel %vm2822_vm7, %v4615_v26, 0.0  ;;  %v4617_v29 = vpop.eup %4616 }
0x16da   : > { %2857 = vadd.xlane.f32.xlu1 %v2856_v31  ;;  %v2850_v33 = vsel %vm2822_vm7, %v4617_v29, 0.0  ;;  %v4619_v35 = vpop.eup %4618 }
0x16db   : > { %v2853_v36 = vsel %vm2822_vm7, %v4619_v35, 0.0  ;;  %v4621_v37 = vpop.eup %4620 }
0x16dc   : > { %v2847_v38 = vsel %vm2822_vm7, %v4621_v37, 0.0 }
0x16e2   : > { %2851 = vadd.xlane.f32.xlu1 %v2850_v33  ;;  %v2490_v33 = vld [vmem:[#allocation7 + $0x290] sm:$0xff] }
0x16e3   : > { %3210 = vmatpush.msra.mxu2 %v2490_v33 }
0x16e5   : > { %3211 = vmatpush.msra.mxu2 %v2489_v34 }
0x16ea   : > { %2854 = vadd.xlane.f32.xlu1 %v2853_v36  ;;  %v3323_v36 = vld [vmem:[#allocation7 + $0x318] sm:$0xff] }
0x16f4   : > { %2848 = vadd.xlane.f32.xlu2 %v2847_v38  ;;  %v3321_v38 = vld [vmem:[#allocation7 + $0x308] sm:$0xff] }
0x16fd   : > { %v2883_v59 = vpop.trf.xlu0 }
0x171c   : > { %v2947_v49 = vpop.trf.xlu2 }
0x174d   : > { %v2858_v39 = vpop.xlane.xlu1 %2857 }
0x174e   : > { %4622 = vrcp.f32 %v2858_v39  ;;  %v3320_v39 = vld [vmem:[#allocation7 + $0x300] sm:$0xff] }
0x1754   : > { %v4623_v40 = vpop.eup %4622 }
0x1755   : > { %v2852_v42 = vpop.xlane.xlu1 %2851  ;;  %v2866_v43 = vmul.f32 %v4623_v40, %v4615_v26 }
0x1756   : > { %4624 = vrcp.f32 %v2852_v42 }
0x1757   : > { %v3010_v45 = vperm.slane %v2866_v43, 0 }
0x1759   : > { %v3011_v46 = vmul.f32 %v3010_v45, %v5270_v0 }
0x175b   : > { %v3012_v47 = vsel %vm653_vm2, %v3011_v46, 0.0 }
0x175c   : > { %v4625_v48 = vpop.eup %4624  ;;  %3013 = vadd.xlane.f32.xlu2 %v3012_v47 }
0x175d   : > { %v2864_v50 = vmul.f32 %v4625_v48, %v4617_v29  ;;  %v2855_v53 = vpop.xlane.xlu1 %2854  ;;  %v2492_v48 = vld [vmem:[#allocation8 + $0x1d] sm:$0x1] }
0x175e   : > { %4626 = vrcp.f32 %v2855_v53 }
0x175f   : > { %v3000_v51 = vperm.slane %v2864_v50, 0 }
0x1761   : > { %v3001_v52 = vmul.f32 %v3000_v51, %v2915_v17 }
0x1763   : > { %v3002_v60 = vsel %vm653_vm2, %v3001_v52, 0.0 }
0x1764   : > { %3003 = vadd.xlane.f32.xlu0 %v3002_v60  ;;  %v4627_v56 = vpop.eup %4626 }
0x1765   : > { %v2865_v62 = vmul.f32 %v4627_v56, %v4619_v35  ;;  %v2488_v35 = vld [vmem:[#allocation7 + $0x280] sm:$0xff] }
0x1766   : > { %3212 = vmatpush.msra.mxu2 %v2488_v35 }
0x1767   : > { %v2849_v55 = vpop.xlane.xlu2 %2848  ;;  %v3005_v1 = vperm.slane %v2865_v62, 0 }
0x1768   : > { %4628 = vrcp.f32 %v2849_v55  ;;  %3385 = vmatpush.msrb.mxu2 %v3323_v36 }
0x1769   : > { %v3006_v3 = vmul.f32 %v3005_v1, %v2947_v49  ;;  %v2495_v1 = vld [vmem:[#allocation7 + $0x2a0] sm:$0xff] }
0x176b   : > { %v3007_v4 = vsel %vm653_vm2, %v3006_v3, 0.0  ;;  %v3327_v3 = vld [vmem:[#allocation7 + $0x330] sm:$0xff] }
0x176e   : > { %v4629_v57 = vpop.eup %4628 }
0x176f   : > { %v2863_v58 = vmul.f32 %v4629_v57, %v4621_v37  ;;  %v3322_v37 = vld [vmem:[#allocation7 + $0x310] sm:$0xff] }
0x1770   : > { %3386 = vmatpush.msrb.mxu2 %v3322_v37 }
0x1771   : > { %v2995_v63 = vperm.slane %v2863_v58, 0  ;;  %v4570_v58 = vld [vmem:[#allocation8 + $0x25] ss:$0 sm:$0xff] }
0x1772   : > { %3387 = vmatpush.msrb.mxu2 %v3321_v38 }
0x1773   : > { %v2996_v0 = vmul.f32 %v2995_v63, %v2883_v59  ;;  %v2498_v63 = vld [vmem:[#allocation7 + $0x2b8] sm:$0xff] }
0x1774   : > { %3388 = vmatpush.msrb.mxu2 %v3320_v39  ;;  %3258 = vmatpush.msra.mxu1 %v2498_v63  ;;  %v3318_v39 = vld [vmem:[#allocation7 + $0x2f8] sm:$0xff]  ;;  %v3319_v63 = vld [vmem:[#allocation8 + $0x24] sm:$0x1] }
0x1775   : > { %v2997_v2 = vsel %vm653_vm2, %v2996_v0, 0.0  ;;  %v2496_v0 = vld [vmem:[#allocation7 + $0x2a8] sm:$0xff]  ;;  %3364 = vmatpush.msrb.mxu0 %v3318_v39 }
0x1776   : > { %2998 = vadd.xlane.f32.xlu1 %v2997_v2  ;;  %v3328_v2 = vld [vmem:[#allocation7 + $0x338] sm:$0xff] }
0x177e   : > { %3008 = vadd.xlane.f32.xlu1 %v3007_v4 }
0x17cf   : > { %v3014_v8 = vpop.xlane.xlu2 %3013 }
0x17d7   : > { %v3004_v5 = vpop.xlane.xlu0 %3003 }
0x17d8   : > { %3047 = vxpose.xlu0.b32.start.end [1/1] (short) (narrow) %v3004_v5, 8  ;;  %v3326_v5 = vld [vmem:[#allocation7 + $0x328] sm:$0xff] }
0x17e9   : > { %v2999_v7 = vpop.xlane.xlu1 %2998 }
0x17ea   : > { %3015 = vxpose.xlu2.b32.start.end [1/1] (short) (narrow) %v2999_v7, 8 }
0x17f1   : > { %v3009_v54 = vpop.xlane.xlu1 %3008 }
0x17f2   : > { %3111 = vxpose.xlu2.b32.start.end [1/1] (short) (narrow) %v3014_v8, 8  ;;  %3079 = vxpose.xlu1.b32.start.end [1/1] (short) (narrow) %v3009_v54, 8  ;;  %v3325_v8 = vld [vmem:[#allocation7 + $0x320] sm:$0xff] }
0x187c   : > { %v3063_v12 = vpop.trf.xlu0 }
0x1883   : > { %v3031_v9 = vpop.trf.xlu2 }
0x188b   : > { %v3127_v10 = vpop.trf.xlu2 }
0x188c   : > { %v3149_v11 = vrot.slane %v3127_v10, 4 }
0x188e   : > { %v3150_v13 = vsel %vm1151_vm3, %v3149_v11, %v3063_v12 }
0x188f   : > { %v3154_v14 = vperm.slane %v3150_v13, %v5081_v61 }
0x1891   : > { %v3155_v17 = vrot.slane %v3154_v14, 4 }
0x1896   : > { %v3095_v15 = vpop.trf.xlu1 }
0x1897   : > { %v3143_v16 = vrot.slane %v3095_v15, 4 }
0x1899   : > { %v3144_v18 = vsel %vm1151_vm3, %v3143_v16, %v3031_v9  ;;  %v2503_v9 = vld [vmem:[#allocation7 + $0x2d8] sm:$0xff] }
0x189a   : > { %v3148_v19 = vperm.slane %v3144_v18, %v5081_v61  ;;  %3282 = vmatpush.msra.mxu3 %v2503_v9  ;;  %v2493_v16 = vld [vmem:[#allocation8 + $0x1e] sm:$0x1] }
0x189c   : > { %v3156_v20 = vsel %vm1151_vm3, %v3155_v17, %v3148_v19  ;;  %v2494_v19 = vld [vmem:[#allocation8 + $0x1f] sm:$0x1] }
0x189d   : > { %v3160_v21 = vperm.slane %v3156_v20, %v5087_v6 }
0x189f   : > { %v3164_v32 = vperm.slane %v3160_v21, %v5081_v61 }
0x18a1   : > { %v3170_v22 = vperm.slane %v3164_v32, %v5087_v6  ;;  %v3165_v24 = vrot.slane %v3164_v32, 4  ;;  %v2502_v32 = vld [vmem:[#allocation7 + $0x2d0] sm:$0xff] }
0x18a2   : > { %3283 = vmatpush.msra.mxu3 %v2502_v32 }
0x18a3   : > { %v3175_v25 = vrot.slane %v3170_v22, 4  ;;  %v3166_v26 = vsel %vm1151_vm3, 0.0, %v3165_v24  ;;  %v2500_v24 = vld [vmem:[#allocation7 + $0x2c0] sm:$0xff] }
0x18a4   : > { %v3174_v27 = vperm.slane %v3166_v26, %v5087_v6 }
0x18a5   : > { %v3176_v31 = vsel %vm1151_vm3, 0.0, %v3175_v25  ;;  %v2499_v25 = vld [vmem:[#allocation8 + $0x20] sm:$0x1] }
0x18a6   : > { %3180 = vrot.lane.b32.xlu0 %v3176_v31, %s4865_s10  ;;  %3184 = vrot.lane.b32.xlu2 %v3174_v27, %s4863_s12  ;;  %v3177_v28 = vrot.slane %v3174_v27, 4 }
0x18a8   : > { %v3178_v29 = vsel %vm1151_vm3, 0.0, %v3177_v28  ;;  %v2504_v28 = vld [vmem:[#allocation8 + $0x21] sm:$0x1] }
0x18a9   : > { %3188 = vrot.lane.b32.xlu1 %v3178_v29, %s4864_s9 }
0x1900   : > { %v3185_v42 = vpop.permute.xlu2 %3184 }
0x1918   : > { %v3181_v40 = vpop.permute.xlu0 %3180 }
0x1919   : > { %v3191_v43 = vsel %vm653_vm2, %v3170_v22, %v3181_v40  ;;  %v2501_v22 = vld [vmem:[#allocation7 + $0x2c8] sm:$0xff]  ;;  %v3317_v40 = vld [vmem:[#allocation7 + $0x2f0] sm:$0xff] }
0x191a   : > { %v3192_v45 = vsel %vm287_vm0, %v3191_v43, %v3185_v42  ;;  %3284 = vmatpush.msra.mxu3 %v2501_v22  ;;  %v3316_v42 = vld [vmem:[#allocation7 + $0x2e8] sm:$0xff]  ;;  %3365 = vmatpush.msrb.mxu0 %v3317_v40  ;;  %v3315_v43 = vld [vmem:[#allocation7 + $0x2e0] sm:$0xff] }
0x191b   : > { %v3189_v46 = vpop.permute.xlu1 %3188 }
0x191c   : > { %v3193_v47 = vsel %vm1275_vm4, %v3192_v45, %v3189_v46  ;;  %3285 = vmatpush.msra.mxu3 %v2500_v24  ;;  %3366 = vmatpush.msrb.mxu0 %v3316_v42 }
0x191d   : > { %4387 = vmatmul.msk.f32.vlgmr.msra.gmra.mxu2 %vm318_vm1, %v3193_v47 }
0x191e   : > { %3367 = vmatpush.msrb.mxu0 %v3315_v43 }
0x1925   : > { %4391 = vmatmul.msk.f32.vlgmr.msrb.gmra.mxu2 %vm318_vm1, %v5255_v41 }
0x19a0   : > { %v3214_v49 = vpop.f32.mrf.mxu2 }
0x19a1   : > { %v3215_v50 = vadd.f32 %v3214_v49, %v2492_v48 }
0x19a3   : > { %v3217_v51 = vadd.f32 %v3215_v50, %v5236_v44  ;;  %v2497_v44 = vld [vmem:[#allocation7 + $0x2b0] sm:$0xff] }
0x19a4   : > { %3259 = vmatpush.msra.mxu1 %v2497_v44 }
0x19a5   : > { %v3219_v52 = vsel %vm3218_vm8, %v3217_v51, 0.0 }
0x19a6   : > { %3220 = vadd.xlane.f32.xlu0 %v3219_v52  ;;  %3260 = vmatpush.msra.mxu1 %v2496_v0 }
0x19a8   : > { %v3390_v59 = vpop.f32.mrf.mxu2  ;;  %3261 = vmatpush.msra.mxu1 %v2495_v1 }
0x19a9   : > { %v5312_v62 = vadd.f32 %v4570_v58, %v3390_v59 }
0x19aa   : > { %3406 = vmatpush.msrb.mxu1 %v3328_v2 }
0x19ac   : > { %3407 = vmatpush.msrb.mxu1 %v3327_v3 }
0x19ae   : > { %3408 = vmatpush.msrb.mxu1 %v3326_v5 }
0x19b0   : > { %3409 = vmatpush.msrb.mxu1 %v3325_v8 }
0x1a19   : > { %v3221_v53 = vpop.xlane.xlu0 %3220 }
0x1a1a   : > { %v3222_v60 = vmul.f32 %v3221_v53, %v5134_v23 }
0x1a1c   : > { %v3223_v55 = vsub.f32 %v3217_v51, %v3222_v60  ;;  %v2505_v60 = vld [vmem:[#allocation8 + $0x22] sm:$0x1] }
0x1a1e   : > { %v3224_v56 = vmul.f32 %v3223_v55, %v3223_v55 }
0x1a20   : > { %v3225_v57 = vsel %vm3218_vm8, %v3224_v56, 0.0 }
0x1a21   : > { %3226 = vadd.xlane.f32.xlu1 %v3225_v57  ;;  %v2506_v57 = vld [vmem:[#allocation8 + $0x23] sm:$0x1] }
0x1a3a   : > { %3428 = vrot.lane.b32.xlu1 %v5312_v62, %s4858_s13 }
0x1a94   : > { %v3227_v4 = vpop.xlane.xlu1 %3226 }
0x1a95   : > { %v3228_v7 = vmul.f32 %v3227_v4, %v5134_v23 }
0x1a97   : > { %v3229_v54 = vadd.f32 1e-05, %v3228_v7  ;;  %v4571_v7 = vld [vmem:[#allocation8 + $0x26] ss:$0 sm:$0xff] }
0x1a99   : > { %4630 = vrsqrt.f32 %v3229_v54  ;;  %vm3236_vm10 = vweird.f32 %v3229_v54 }
0x1a9f   : > { %v4631_v10 = vpop.eup %4630 }
0x1aa0   : > { %v3231_v11 = vmul.f32 %v4631_v10, %v3229_v54  ;;  %vm3237_vm9 = vweird.f32 %v4631_v10 }
0x1aa1   : > { %vm3238_vm11 = vmor %vm3236_vm10, %vm3237_vm9 }
0x1aa2   : > { %v3232_v12 = vmul.f32 %v4631_v10, %v3231_v11 }
0x1aa4   : > { %v3233_v13 = vmul.f32 0.5, %v3232_v12 }
0x1aa6   : > { %v3234_v14 = vsub.f32 1.5, %v3233_v13 }
0x1aa8   : > { %v3235_v15 = vmul.f32 %v4631_v10, %v3234_v14 }
0x1aaa   : > { %v3239_v17 = vsel %vm3238_vm11, %v4631_v10, %v3235_v15 }
0x1aab   : > { %v3240_v18 = vmul.f32 %v3239_v17, %v3223_v55 }
0x1aac   : > { %v3429_v4 = vpop.permute.xlu1 %3428 }
0x1aad   : > { %v3241_v20 = vmul.f32 %v3240_v18, %v2493_v16 }
0x1aaf   : > { %v3242_v21 = vadd.f32 %v3241_v20, %v2494_v19 }
0x1ab1   : > { %4388 = vmatmul.msk.f32.vlgmr.msra.gmra.mxu1 %vm318_vm1, %v3242_v21 }
0x1ab9   : > { %4392 = vmatmul.msk.f32.vlgmr.msrb.gmra.mxu1 %vm318_vm1, %v5255_v41 }
0x1b2e   : > { %v3263_v26 = vpop.f32.mrf.mxu1 }
0x1b2f   : > { %v3264_v27 = vadd.f32 %v3263_v26, %v2499_v25 }
0x1b31   : > { %v3266_v31 = vmax.f32 %v3264_v27, 0.0 }
0x1b33   : > { %4389 = vmatmul.msk.f32.vlgmr.msra.gmra.mxu3 %vm318_vm1, %v3266_v31 }
0x1b36   : > { %v3411_v8 = vpop.f32.mrf.mxu1 }
0x1b37   : > { %v3412_v54 = vadd.f32 %v4571_v7, %v3411_v8 }
0x1bb6   : > { %v3287_v29 = vpop.f32.mrf.mxu3 }
0x1bb7   : > { %v3288_v30 = vadd.f32 %v3287_v29, %v2504_v28 }
0x1bb9   : > { %v3290_v33 = vadd.f32 %v3288_v30, %v3242_v21 }
0x1bbb   : > { %v3291_v34 = vsel %vm3218_vm8, %v3290_v33, 0.0 }
0x1bbc   : > { %3292 = vadd.xlane.f32.xlu2 %v3291_v34 }
0x1bd4   : > { %3425 = vrot.lane.b32.xlu2 %v5312_v62, %s4859_s28 }
0x1c2f   : > { %v3293_v41 = vpop.xlane.xlu2 %3292 }
0x1c30   : > { %v3294_v35 = vmul.f32 %v3293_v41, %v5134_v23 }
0x1c32   : > { %v3295_v36 = vsub.f32 %v3290_v33, %v3294_v35 }
0x1c34   : > { %v3296_v37 = vmul.f32 %v3295_v36, %v3295_v36 }
0x1c36   : > { %v3297_v38 = vsel %vm3218_vm8, %v3296_v37, 0.0 }
0x1c37   : > { %3298 = vadd.xlane.f32.xlu0 %v3297_v38  ;;  %v3426_v1 = vpop.permute.xlu2 %3425 }
0x1c38   : > { %v4530_v2 = vpack.i.bf16 %v5312_v62, %v3426_v1 }
0x1c4b   : > { %3422 = vrot.lane.b32.xlu0 %v5312_v62, %s4860_s21 }
0x1caa   : > { %v3299_v45 = vpop.xlane.xlu0 %3298 }
0x1cab   : > { %v3300_v46 = vmul.f32 %v3299_v45, %v5134_v23 }
0x1cad   : > { %v3301_v47 = vadd.f32 1e-05, %v3300_v46 }
0x1caf   : > { %4632 = vrsqrt.f32 %v3301_v47  ;;  %vm3308_vm13 = vweird.f32 %v3301_v47 }
0x1cb5   : > { %v4633_v48 = vpop.eup %4632 }
0x1cb6   : > { %v3303_v49 = vmul.f32 %v4633_v48, %v3301_v47  ;;  %vm3309_vm12 = vweird.f32 %v4633_v48 }
0x1cb7   : > { %vm3310_vm14 = vmor %vm3308_vm13, %vm3309_vm12 }
0x1cb8   : > { %v3304_v50 = vmul.f32 %v4633_v48, %v3303_v49 }
0x1cba   : > { %v3305_v51 = vmul.f32 0.5, %v3304_v50 }
0x1cbc   : > { %v3306_v52 = vsub.f32 1.5, %v3305_v51 }
0x1cbd   : > { %v3423_v3 = vpop.permute.xlu0 %3422 }
0x1cbe   : > { %v3307_v53 = vmul.f32 %v4633_v48, %v3306_v52  ;;  %v4537_v5 = vpack.i.bf16 %v3423_v3, %v3429_v4 }
0x1cc0   : > { %v3311_v55 = vsel %vm3310_vm14, %v4633_v48, %v3307_v53 }
0x1cc1   : > { %v3312_v56 = vmul.f32 %v3311_v55, %v3295_v36 }
0x1cc3   : > { %v3313_v58 = vmul.f32 %v3312_v56, %v2505_v60 }
0x1cc5   : > { %v5329_v59 = vadd.f32 %v3313_v58, %v2506_v57 }
0x1cc7   : > { %4390 = vmatmul.msk.f32.vlgmr.msrb.gmra.mxu0 %vm318_vm1, %v5329_v59 }
0x1d44   : > { %v3369_v44 = vpop.f32.mrf.mxu0 }
0x1d45   : > { %v3370_v0 = vadd.f32 %v3369_v44, %v3319_v63 }
0x1d47   : > { %3419 = vrot.lane.b32.xlu1 %v3370_v0, %s4858_s13  ;;  %3417 = vrot.lane.b32.xlu2 %v3370_v0, %s4859_s28 }
0x1d6d   : > { %4531 = vxpose.xlu2.b32.start.end [1/1] (short) (narrow) %v4530_v2, 8 }
0x1d7c   : > { %4538 = vxpose.xlu1.b32.start.end [1/1] (short) (narrow) %v4537_v5, 8 }
0x1da1   : > { %v3418_v9 = vpop.permute.xlu2 %3417 }
0x1db9   : > { %v3420_v62 = vpop.permute.xlu1 %3419 }
0x1dd6   : > { %3438 = vrot.lane.b32.xlu1 %v3412_v54, %s4858_s13 }
0x1e06   : > { %v4532_v10 = vpop.trf.xlu2 }
0x1e07   : > { %v4536_v11 = vunpack.i.h.bf16 %v4532_v10  ;;  %v4533_v12 = vunpack.i.l.bf16 %v4532_v10 }
0x1e09   : > { %3586 = vmatpush.msrb.mxu3 %v4536_v11  ;;  %3630 = vmatpush.msra.mxu2 %v4533_v12 }
0x1e0a   : > { %4393 = vmatmul.msk.f32.vlgmr.msrb.gmra.mxu3 %vm653_vm2, %v3370_v0  ;;  %4395 = vmatmul.msk.f32.vlgmr.msra.gmra.mxu2 %vm653_vm2, %v3418_v9 }
0x1e20   : > { %v4539_v13 = vpop.trf.xlu1 }
0x1e21   : > { %v4543_v14 = vunpack.i.h.bf16 %v4539_v13  ;;  %v4540_v15 = vunpack.i.l.bf16 %v4539_v13 }
0x1e23   : > { %3652 = vmatpush.msra.mxu1 %v4540_v15  ;;  %3608 = vmatpush.msra.mxu0 %v4543_v14 }
0x1e24   : > { %4396 = vmatmul.msk.f32.vlgmr.msra.gmra.mxu1 %vm653_vm2, %v3420_v62 }
0x1e48   : > { %v3439_v16 = vpop.permute.xlu1 %3438 }
0x1e49   : > { %3801 = vxpose.xlu0.b32.start.end [1/1] (short) (narrow) %v3439_v16, 8 }
0x1e8d   : > { %v3588_v17 = vpop.f32.mrf.mxu3  ;;  %v3632_v33 = vpop.f32.mrf.mxu2 }
0x1e8e   : > { %v3657_v18 = vmul.f32 0.35355338, %v3588_v17  ;;  %v3659_v35 = vmul.f32 0.35355338, %v3632_v33 }
0x1e90   : > { %v3661_v19 = vsel %vm2822_vm7, %v3657_v18, -inf  ;;  %v3667_v37 = vsel %vm2822_vm7, %v3659_v35, -inf }
0x1ea1   : > { %v3654_v20 = vpop.f32.mrf.mxu1 }
0x1ea2   : > { %v3660_v21 = vmul.f32 0.35355338, %v3654_v20 }
0x1ea4   : > { %v3670_v32 = vsel %vm2822_vm7, %v3660_v21, -inf }
0x1eb7   : > { %3432 = vrot.lane.b32.xlu0 %v3412_v54, %s4860_s21 }
0x1ebf   : > { %3435 = vrot.lane.b32.xlu0 %v3412_v54, %s4859_s28 }
0x1ec7   : > { %3415 = vrot.lane.b32.xlu0 %v3370_v0, %s4860_s21 }
0x1eed   : > { %v3817_v22 = vpop.trf.xlu0 }
0x1ef1   : > { %3662 = vmax.xlane.f32.xlu0 %v3661_v19 }
0x1ef9   : > { %3671 = vmax.xlane.f32.xlu0 %v3670_v32 }
0x1f22   : > { %3705 = vxpose.xlu0.b32.start.end [1/1] (short) (narrow) %v3412_v54, 8 }
0x1f29   : > { %v3433_v24 = vpop.permute.xlu0 %3432 }
0x1f31   : > { %v3436_v25 = vpop.permute.xlu0 %3435 }
0x1f32   : > { %3769 = vxpose.xlu1.b32.start.end [1/1] (short) (narrow) %v3436_v25, 8 }
0x1f39   : > { %v3416_v26 = vpop.permute.xlu0 %3415 }
0x1f3a   : > { %4394 = vmatmul.msk.f32.vlgmr.msra.gmra.mxu0 %vm653_vm2, %v3416_v26 }
0x1f64   : > { %v3663_v27 = vpop.xlane.xlu0 %3662 }
0x1f65   : > { %v3673_v31 = vsub.f32 %v3657_v18, %v3663_v27 }
0x1f67   : > { %v3677_v28 = vmul.f32 1.442695, %v3673_v31 }
0x1f69   : > { %4634 = vpow2.f32 %v3677_v28 }
0x1f6c   : > { %v3672_v29 = vpop.xlane.xlu0 %3671 }
0x1f6d   : > { %v3676_v30 = vsub.f32 %v3660_v21, %v3672_v29 }
0x1f6f   : > { %v3683_v34 = vmul.f32 1.442695, %v3676_v30  ;;  %v4635_v41 = vpop.eup %4634 }
0x1f70   : > { %v3685_v36 = vsel %vm2822_vm7, %v4635_v41, 0.0 }
0x1f71   : > { %4636 = vpow2.f32 %v3683_v34 }
0x1f77   : > { %v4637_v38 = vpop.eup %4636 }
0x1f78   : > { %v3694_v39 = vsel %vm2822_vm7, %v4637_v38, 0.0 }
0x1f92   : > { %3686 = vadd.xlane.f32.xlu1 %v3685_v36 }
0x1f93   : > { %3668 = vmax.xlane.f32.xlu0 %v3667_v37 }
0x1f9b   : > { %3695 = vadd.xlane.f32.xlu0 %v3694_v39 }
0x1fb7   : > { %v3610_v40 = vpop.f32.mrf.mxu0 }
0x1fb8   : > { %v3658_v42 = vmul.f32 0.35355338, %v3610_v40 }
0x1fba   : > { %v3664_v43 = vsel %vm2822_vm7, %v3658_v42, -inf }
0x1fbb   : > { %3665 = vmax.xlane.f32.xlu2 %v3664_v43 }
0x1fc6   : > { %v3721_v45 = vpop.trf.xlu0 }
0x1fd6   : > { %v3785_v51 = vpop.trf.xlu1 }
0x1fe4   : > { %3737 = vxpose.xlu2.b32.start.end [1/1] (short) (narrow) %v3433_v24, 8 }
0x2005   : > { %v3687_v55 = vpop.xlane.xlu1 %3686 }
0x2006   : > { %v3669_v46 = vpop.xlane.xlu0 %3668 }
0x2007   : > { %v3675_v49 = vsub.f32 %v3659_v35, %v3669_v46 }
0x2009   : > { %v3681_v52 = vmul.f32 1.442695, %v3675_v49  ;;  %v3331_v49 = vld [vmem:[#allocation7 + $0x348] sm:$0xff] }
0x200e   : > { %v3696_v58 = vpop.xlane.xlu0 %3695 }
0x202e   : > { %v3666_v47 = vpop.xlane.xlu2 %3665 }
0x202f   : > { %v3674_v48 = vsub.f32 %v3658_v42, %v3666_v47 }
0x2031   : > { %v3679_v50 = vmul.f32 1.442695, %v3674_v48  ;;  %v3332_v48 = vld [vmem:[#allocation7 + $0x350] sm:$0xff] }
0x2033   : > { %4638 = vpow2.f32 %v3679_v50  ;;  %v3330_v50 = vld [vmem:[#allocation7 + $0x340] sm:$0xff] }
0x2034   : > { %4640 = vpow2.f32 %v3681_v52 }
0x2035   : > { %4642 = vrcp.f32 %v3687_v55 }
0x2036   : > { %4644 = vrcp.f32 %v3696_v58 }
0x2039   : > { %v4639_v53 = vpop.eup %4638 }
0x203a   : > { %v3688_v60 = vsel %vm2822_vm7, %v4639_v53, 0.0  ;;  %v4641_v56 = vpop.eup %4640 }
0x203b   : > { %3689 = vadd.xlane.f32.xlu0 %v3688_v60  ;;  %v3691_v57 = vsel %vm2822_vm7, %v4641_v56, 0.0  ;;  %v4643_v63 = vpop.eup %4642 }
0x203c   : > { %v3701_v44 = vmul.f32 %v4643_v63, %v4635_v41  ;;  %v4645_v1 = vpop.eup %4644 }
0x203d   : > { %v3704_v3 = vmul.f32 %v4645_v1, %v4637_v38 }
0x203e   : > { %v3833_v0 = vperm.slane %v3701_v44, 0 }
0x203f   : > { %v3848_v5 = vperm.slane %v3704_v3, 0 }
0x2040   : > { %v3834_v2 = vmul.f32 %v3833_v0, %v3721_v45 }
0x2041   : > { %v3849_v7 = vmul.f32 %v3848_v5, %v3817_v22  ;;  %v3340_v5 = vld [vmem:[#allocation7 + $0x378] sm:$0xff] }
0x2042   : > { %v3835_v4 = vsel %vm653_vm2, %v3834_v2, 0.0  ;;  %4095 = vmatpush.msrb.mxu0 %v3340_v5  ;;  %v4185_v5 = vld [vmem:[#allocation8 + $0x2f] sm:$0x1] }
0x2043   : > { %3692 = vadd.xlane.f32.xlu0 %v3691_v57  ;;  %v3850_v8 = vsel %vm653_vm2, %v3849_v7, 0.0  ;;  %v3339_v7 = vld [vmem:[#allocation7 + $0x370] sm:$0xff] }
0x2044   : > { %4096 = vmatpush.msrb.mxu0 %v3339_v7 }
0x2055   : > { %3836 = vadd.xlane.f32.xlu2 %v3835_v4 }
0x205d   : > { %3851 = vadd.xlane.f32.xlu2 %v3850_v8  ;;  %v3338_v8 = vld [vmem:[#allocation7 + $0x368] sm:$0xff] }
0x205e   : > { %4097 = vmatpush.msrb.mxu0 %v3338_v8 }
0x207d   : > { %v3753_v12 = vpop.trf.xlu2 }
0x20ae   : > { %v3690_v54 = vpop.xlane.xlu0 %3689 }
0x20af   : > { %4646 = vrcp.f32 %v3690_v54  ;;  %v3337_v54 = vld [vmem:[#allocation7 + $0x360] sm:$0xff] }
0x20b0   : > { %4098 = vmatpush.msrb.mxu0 %v3337_v54 }
0x20b5   : > { %v4647_v9 = vpop.eup %4646 }
0x20b6   : > { %v3693_v10 = vpop.xlane.xlu0 %3692  ;;  %v3702_v11 = vmul.f32 %v4647_v9, %v4639_v53  ;;  %v3345_v9 = vld [vmem:[#allocation7 + $0x398] sm:$0xff] }
0x20b7   : > { %4648 = vrcp.f32 %v3693_v10  ;;  %4119 = vmatpush.msrb.mxu2 %v3345_v9 }
0x20b8   : > { %v3838_v62 = vperm.slane %v3702_v11, 0 }
0x20ba   : > { %v3839_v13 = vmul.f32 %v3838_v62, %v3753_v12 }
0x20bc   : > { %v3840_v14 = vsel %vm653_vm2, %v3839_v13, 0.0 }
0x20bd   : > { %v4649_v15 = vpop.eup %4648  ;;  %3841 = vadd.xlane.f32.xlu0 %v3840_v14 }
0x20be   : > { %v3703_v16 = vmul.f32 %v4649_v15, %v4641_v56  ;;  %v3334_v56 = vld [vmem:[#allocation8 + $0x27] sm:$0x1] }
0x20c0   : > { %v3843_v17 = vperm.slane %v3703_v16, 0 }
0x20c2   : > { %v3844_v18 = vmul.f32 %v3843_v17, %v3785_v51  ;;  %v3335_v17 = vld [vmem:[#allocation8 + $0x28] sm:$0x1] }
0x20c4   : > { %v3845_v19 = vsel %vm653_vm2, %v3844_v18, 0.0 }
0x20c5   : > { %3846 = vadd.xlane.f32.xlu1 %v3845_v19 }
0x20c8   : > { %v3837_v20 = vpop.xlane.xlu2 %3836 }
0x20d0   : > { %v3852_v21 = vpop.xlane.xlu2 %3851 }
0x20e6   : > { %3853 = vxpose.xlu0.b32.start.end [1/1] (short) (narrow) %v3837_v20, 8  ;;  %v3336_v20 = vld [vmem:[#allocation8 + $0x29] sm:$0x1] }
0x20ee   : > { %3949 = vxpose.xlu0.b32.start.end [1/1] (short) (narrow) %v3852_v21, 8 }
0x2130   : > { %v3842_v32 = vpop.xlane.xlu0 %3841 }
0x2131   : > { %3885 = vxpose.xlu2.b32.start.end [1/1] (short) (narrow) %v3842_v32, 8 }
0x2138   : > { %v3847_v22 = vpop.xlane.xlu1 %3846 }
0x2139   : > { %3917 = vxpose.xlu1.b32.start.end [1/1] (short) (narrow) %v3847_v22, 8  ;;  %v3344_v22 = vld [vmem:[#allocation7 + $0x390] sm:$0xff] }
0x213a   : > { %4120 = vmatpush.msrb.mxu2 %v3344_v22 }
0x218a   : > { %v3869_v24 = vpop.trf.xlu0 }
0x2192   : > { %v3965_v25 = vpop.trf.xlu0 }
0x2193   : > { %v3987_v26 = vrot.slane %v3965_v25, 4  ;;  %v3342_v25 = vld [vmem:[#allocation7 + $0x380] sm:$0xff] }
0x21ca   : > { %v3901_v27 = vpop.trf.xlu2 }
0x21cb   : > { %v3988_v31 = vsel %vm1151_vm3, %v3987_v26, %v3901_v27  ;;  %v3341_v26 = vld [vmem:[#allocation8 + $0x2a] sm:$0x1] }
0x21cc   : > { %v3992_v28 = vperm.slane %v3988_v31, %v5081_v61 }
0x21ce   : > { %v3993_v33 = vrot.slane %v3992_v28, 4 }
0x21dd   : > { %v3933_v29 = vpop.trf.xlu1 }
0x21de   : > { %v3981_v30 = vrot.slane %v3933_v29, 4  ;;  %v3346_v29 = vld [vmem:[#allocation8 + $0x2b] sm:$0x1] }
0x21e0   : > { %v3982_v34 = vsel %vm1151_vm3, %v3981_v30, %v3869_v24  ;;  %v3343_v24 = vld [vmem:[#allocation7 + $0x388] sm:$0xff] }
0x21e1   : > { %v3986_v41 = vperm.slane %v3982_v34, %v5081_v61  ;;  %4121 = vmatpush.msrb.mxu2 %v3343_v24 }
0x21e3   : > { %v3994_v35 = vsel %vm1151_vm3, %v3993_v33, %v3986_v41  ;;  %4122 = vmatpush.msrb.mxu2 %v3342_v25 }
0x21e4   : > { %v3998_v36 = vperm.slane %v3994_v35, %v5087_v6 }
0x21e6   : > { %v4002_v37 = vperm.slane %v3998_v36, %v5081_v61  ;;  %v3333_v61 = vld [vmem:[#allocation7 + $0x358] sm:$0xff] }
0x21e7   : > { %4047 = vmatpush.msra.mxu3 %v3333_v61 }
0x21e8   : > { %v4008_v38 = vperm.slane %v4002_v37, %v5087_v6  ;;  %v4003_v39 = vrot.slane %v4002_v37, 4 }
0x21e9   : > { %4048 = vmatpush.msra.mxu3 %v3332_v48 }
0x21ea   : > { %v4013_v40 = vrot.slane %v4008_v38, 4  ;;  %v4004_v42 = vsel %vm1151_vm3, 0.0, %v4003_v39 }
0x21eb   : > { %v4012_v43 = vperm.slane %v4004_v42, %v5087_v6  ;;  %4049 = vmatpush.msra.mxu3 %v3331_v49  ;;  %v4154_v42 = vld [vmem:[#allocation7 + $0x3b0] sm:$0xff] }
0x21ec   : > { %v4014_v45 = vsel %vm1151_vm3, 0.0, %v4013_v40  ;;  %v4155_v40 = vld [vmem:[#allocation7 + $0x3b8] sm:$0xff] }
0x21ed   : > { %4018 = vrot.lane.b32.xlu2 %v4014_v45, %s4865_s10  ;;  %4022 = vrot.lane.b32.xlu0 %v4012_v43, %s4863_s12  ;;  %v4015_v46 = vrot.slane %v4012_v43, 4  ;;  %v4153_v43 = vld [vmem:[#allocation7 + $0x3a8] sm:$0xff]  ;;  %v4152_v45 = vld [vmem:[#allocation7 + $0x3a0] sm:$0xff] }
0x21ee   : > { %4050 = vmatpush.msra.mxu3 %v3330_v50  ;;  %4172 = vmatpush.msrb.mxu1 %v4155_v40 }
0x21ef   : > { %v4016_v47 = vsel %vm1151_vm3, 0.0, %v4015_v46  ;;  %v4184_v46 = vld [vmem:[#allocation7 + $0x3d8] sm:$0xff] }
0x21f0   : > { %4026 = vrot.lane.b32.xlu1 %v4016_v47, %s4864_s9  ;;  %4173 = vmatpush.msrb.mxu1 %v4154_v42 }
0x21f1   : > { %4201 = vmatpush.msrb.mxu3 %v4184_v46 }
0x21f2   : > { %4174 = vmatpush.msrb.mxu1 %v4153_v43 }
0x21f4   : > { %4175 = vmatpush.msrb.mxu1 %v4152_v45 }
0x2247   : > { %v4019_v6 = vpop.permute.xlu2 %4018 }
0x2248   : > { %v4029_v52 = vsel %vm653_vm2, %v4008_v38, %v4019_v6 }
0x225f   : > { %v4023_v51 = vpop.permute.xlu0 %4022 }
0x2260   : > { %v4030_v53 = vsel %vm287_vm0, %v4029_v52, %v4023_v51 }
0x2262   : > { %v4027_v60 = vpop.permute.xlu1 %4026 }
0x2263   : > { %v4031_v55 = vsel %vm1275_vm4, %v4030_v53, %v4027_v60  ;;  %v3347_v60 = vld [vmem:[#allocation8 + $0x2c] sm:$0x1] }
0x2264   : > { %4397 = vmatmul.msk.f32.vlgmr.msra.gmra.mxu3 %vm318_vm1, %v4031_v55 }
0x22e7   : > { %v4052_v57 = vpop.f32.mrf.mxu3 }
0x22e8   : > { %v4053_v58 = vadd.f32 %v4052_v57, %v3334_v56  ;;  %v3348_v57 = vld [vmem:[#allocation8 + $0x2d] sm:$0x1] }
0x22ea   : > { %v4055_v63 = vadd.f32 %v4053_v58, %v5329_v59 }
0x22ec   : > { %v4056_v44 = vsel %vm3218_vm8, %v4055_v63, 0.0 }
0x22ed   : > { %4057 = vadd.xlane.f32.xlu2 %v4056_v44  ;;  %v4182_v44 = vld [vmem:[#allocation7 + $0x3c8] sm:$0xff] }
0x2360   : > { %v4058_v0 = vpop.xlane.xlu2 %4057 }
0x2361   : > { %v4059_v1 = vmul.f32 %v4058_v0, %v5134_v23  ;;  %v4181_v0 = vld [vmem:[#allocation7 + $0x3c0] sm:$0xff] }
0x2363   : > { %v4060_v2 = vsub.f32 %v4055_v63, %v4059_v1  ;;  %v4156_v1 = vld [vmem:[#allocation8 + $0x2e] sm:$0x1] }
0x2365   : > { %v4061_v3 = vmul.f32 %v4060_v2, %v4060_v2 }
0x2367   : > { %v4062_v4 = vsel %vm3218_vm8, %v4061_v3, 0.0 }
0x2368   : > { %4063 = vadd.xlane.f32.xlu0 %v4062_v4 }
0x23db   : > { %v4064_v59 = vpop.xlane.xlu0 %4063 }
0x23dc   : > { %v4065_v10 = vmul.f32 %v4064_v59, %v5134_v23 }
0x23de   : > { %v4066_v11 = vadd.f32 1e-05, %v4065_v10 }
0x23e0   : > { %4650 = vrsqrt.f32 %v4066_v11  ;;  %vm4073_vm2 = vweird.f32 %v4066_v11 }
0x23e6   : > { %v4651_v12 = vpop.eup %4650 }
0x23e7   : > { %v4068_v62 = vmul.f32 %v4651_v12, %v4066_v11  ;;  %vm4074_vm0 = vweird.f32 %v4651_v12 }
0x23e8   : > { %vm4075_vm3 = vmor %vm4073_vm2, %vm4074_vm0 }
0x23e9   : > { %v4069_v13 = vmul.f32 %v4651_v12, %v4068_v62 }
0x23eb   : > { %v4070_v14 = vmul.f32 0.5, %v4069_v13 }
0x23ed   : > { %v4071_v15 = vsub.f32 1.5, %v4070_v14 }
0x23ef   : > { %v4072_v16 = vmul.f32 %v4651_v12, %v4071_v15 }
0x23f1   : > { %v4076_v18 = vsel %vm4075_vm3, %v4651_v12, %v4072_v16 }
0x23f2   : > { %v4077_v19 = vmul.f32 %v4076_v18, %v4060_v2 }
0x23f4   : > { %v4078_v21 = vmul.f32 %v4077_v19, %v3335_v17 }
0x23f6   : > { %v4079_v32 = vadd.f32 %v4078_v21, %v3336_v20 }
0x23f8   : > { %4398 = vmatmul.msk.f32.vlgmr.msrb.gmra.mxu0 %vm318_vm1, %v4079_v32 }
0x2475   : > { %v4100_v27 = vpop.f32.mrf.mxu0 }
0x2476   : > { %v4101_v31 = vadd.f32 %v4100_v27, %v3341_v26 }
0x2478   : > { %v4103_v28 = vmax.f32 %v4101_v31, 0.0 }
0x247a   : > { %4399 = vmatmul.msk.f32.vlgmr.msrb.gmra.mxu2 %vm318_vm1, %v4103_v28 }
0x24fd   : > { %v4124_v30 = vpop.f32.mrf.mxu2 }
0x24fe   : > { %v4125_v33 = vadd.f32 %v4124_v30, %v3346_v29 }
0x2500   : > { %v4127_v34 = vadd.f32 %v4125_v33, %v4079_v32 }
0x2502   : > { %v4128_v41 = vsel %vm3218_vm8, %v4127_v34, 0.0 }
0x2503   : > { %4129 = vadd.xlane.f32.xlu1 %v4128_v41 }
0x2576   : > { %v4130_v35 = vpop.xlane.xlu1 %4129 }
0x2577   : > { %v4131_v36 = vmul.f32 %v4130_v35, %v5134_v23 }
0x2579   : > { %v4132_v37 = vsub.f32 %v4127_v34, %v4131_v36 }
0x257b   : > { %v4133_v38 = vmul.f32 %v4132_v37, %v4132_v37 }
0x257d   : > { %v4134_v39 = vsel %vm3218_vm8, %v4133_v38, 0.0 }
0x257e   : > { %4135 = vadd.xlane.f32.xlu2 %v4134_v39 }
0x25f1   : > { %v4136_v47 = vpop.xlane.xlu2 %4135 }
0x25f2   : > { %v4137_v61 = vmul.f32 %v4136_v47, %v5134_v23  ;;  %v4183_v23 = vld [vmem:[#allocation7 + $0x3d0] sm:$0xff] }
0x25f3   : > { %4202 = vmatpush.msrb.mxu3 %v4183_v23 }
0x25f4   : > { %v4138_v48 = vadd.f32 1e-05, %v4137_v61 }
0x25f5   : > { %4203 = vmatpush.msrb.mxu3 %v4182_v44 }
0x25f6   : > { %4652 = vrsqrt.f32 %v4138_v48  ;;  %vm4145_vm15 = vweird.f32 %v4138_v48 }
0x25f7   : > { %4204 = vmatpush.msrb.mxu3 %v4181_v0 }
0x25fc   : > { %v4653_v49 = vpop.eup %4652 }
0x25fd   : > { %v4140_v50 = vmul.f32 %v4653_v49, %v4138_v48  ;;  %vm4146_vm4 = vweird.f32 %v4653_v49 }
0x25fe   : > { %vm4147_vm5 = vmor %vm4145_vm15, %vm4146_vm4 }
0x25ff   : > { %v4141_v6 = vmul.f32 %v4653_v49, %v4140_v50 }
0x2601   : > { %v4142_v51 = vmul.f32 0.5, %v4141_v6 }
0x2603   : > { %v4143_v52 = vsub.f32 1.5, %v4142_v51 }
0x2605   : > { %v4144_v53 = vmul.f32 %v4653_v49, %v4143_v52 }
0x2607   : > { %v4148_v55 = vsel %vm4147_vm5, %v4653_v49, %v4144_v53 }
0x2608   : > { %v4149_v56 = vmul.f32 %v4148_v55, %v4132_v37 }
0x260a   : > { %v4150_v58 = vmul.f32 %v4149_v56, %v3347_v60 }
0x260c   : > { %v4151_v63 = vadd.f32 %v4150_v58, %v3348_v57 }
0x260e   : > { %4400 = vmatmul.msk.f32.vlgmr.msrb.gmra.mxu1 %vm318_vm1, %v4151_v63 }
0x268b   : > { %v4177_v2 = vpop.f32.mrf.mxu1 }
0x268c   : > { %v4178_v3 = vadd.f32 %v4177_v2, %v4156_v1 }
0x268e   : > { %v4180_v4 = vmax.f32 %v4178_v3, 0.0 }
0x2690   : > { %4401 = vmatmul.msk.f32.vlgmr.msrb.gmra.mxu3 %vm318_vm1, %v4180_v4 }
0x2713   : > { %v4206_v7 = vpop.f32.mrf.mxu3 }
0x2714   : > { %v4207_v8 = vadd.f32 %v4206_v7, %v4185_v5 }
0x2716   : > { %4209 = vst.msk [vmem:[%s281_s30] sm:$0x1] %vm3218_vm8, %v4207_v8 }
0x2717   : > { %4801 = shalt.err (!%p4798_p8)
}
0x2718   : > { %4416 = dma.vmem_to_hbm [thread:$0]  (%p4963_p4), %s4222_s7, 16, %s4224_s26, %s4211_s14  }
0x2719 PF: > { %s4235_s2 = sand.u32 1, %s4840_s15   ;;  %p5438_p10 = scmp.ge.s32.totalorder %s4852_s18, 2 }
0x271a   : > { %s4236_s28 = scalar_lea.sflag [#allocation4], %s4235_s2 }
0x271b   : > { %p4433_p13 = pnand %p5438_p10, %p4967_p6 }
0x271d   : > { %p4434_p11 = pneg %p4433_p13 }
0x271f   : > { %4835 = dma.done.wait (%p4434_p11), %s4236_s28, 16  }
0x2720   : > { %4837 = vsyncadd (%p4434_p11), %s4236_s28, 4294967280  ;;  %p21_p0 = scmp.ge.s32.totalorder %s4935_s8, 4   ;;  %s5439_s15 = smov %s4844_s16 }
0x2721   : > { %s5440_s16 = smov %s4848_s17  ;;  %s5441_s17 = smov %s4946_s11 }
0x2722   : > { %s5442_s18 = smov %s4935_s8  ;;  %23 = sbr.rel (!%p21_p0) target bundleno = 11 (0xb), region = 102 }
0x2727   :  { %4241 = vsyncpa [#allocation3], 1 }
0x2728   :  { %4243 = vsyncpa [#allocation3 + $0x1], 1 }
0x2729   :  { %4244 = vsyncpa [#allocation6], 1 }
0x272a   :  { %4246 = vsyncpa [#allocation6 + $0x1], 1 }
0x272b   :  { %4247 = vsyncpa [#allocation9], 1 }
0x272c   :  { %4248 = vsyncpa [#allocation4], 1 }
0x272d   :  { %4250 = vsyncpa [#allocation4 + $0x1], 1 }

</bundles_post_ra>
